<compile_context>
chip_gen: v7x
topology: tpu7x:2x2x1
jax: 0.10.0
libtpu: 0.0.40
codegen_flags: <defaults>
</compile_context>

<pallas_src>
import functools

import jax
import jax.numpy as jnp
from jax.experimental import pallas as pl
from jax.experimental.pallas import tpu as pltpu

INPUT_SIZE = 8
OUTPUT_SIZE = 1
HIDDEN_SIZE = 64
NUM_LAYERS = 2
PAD = 128            # padded per-gate width = one full vreg of lanes


def _gates_padded(gates, c_prev, P):
    """Padded-layout LSTM cell update.  gates: (B, 4P), gate order [i|f|o|g]."""
    sig = jax.nn.sigmoid(gates[:, :3 * P])     # i, f, o in one contiguous 3-vreg slab
    g_g = jnp.tanh(gates[:, 3 * P:])
    i_g = sig[:, 0 * P:1 * P]
    f_g = sig[:, 1 * P:2 * P]
    o_g = sig[:, 2 * P:3 * P]
    c_t = f_g * c_prev + i_g * g_g
    h_t = o_g * jnp.tanh(c_t)
    return h_t, c_t


# --------------------------- fused forward kernel ----------------------------
def fused_lstm_kernel(x_ref, wih0_ref, whh0_ref, b0_ref,
                      w1_ref, b1_ref, wfc_ref, bfc_ref,
                      out_ref, *, T, B, P):
    """Whole forward pass in one invocation.

    x_ref    : (T*B, D)    time-major flattened input
    wih0_ref : (D, 4P)     layer-0 W_ih^T, gate-padded
    whh0_ref : (P, 4P)     layer-0 W_hh^T, row- and gate-padded
    b0_ref   : (1, 4P)     layer-0 b_ih + b_hh, gate-padded
    w1_ref   : (2P, 4P)    layer-1 [W_ih^T ; W_hh^T], row- and gate-padded
    b1_ref   : (1, 4P)     layer-1 combined bias
    wfc_ref  : (P, O)      FC W^T, row-padded
    bfc_ref  : (1, O)
    out_ref  : (B, O)
    """
    # Hoisted layer-0 input projection for every time step (single MXU matmul).
    xp0 = jnp.dot(x_ref[...], wih0_ref[...],
                  preferred_element_type=jnp.float32) + b0_ref[...]        # (T*B, 4P)
    whh0 = whh0_ref[...]
    w1 = w1_ref[...]
    b1 = jnp.broadcast_to(b1_ref[...], (B, 4 * P))   # hoisted: JAX does not CSE broadcasts

    h0 = jnp.zeros((B, P), jnp.float32)
    c0 = jnp.zeros((B, P), jnp.float32)
    h1 = jnp.zeros((B, P), jnp.float32)
    c1 = jnp.zeros((B, P), jnp.float32)

    for t in range(T):  # static, fully unrolled; layer-0 step t+1 overlaps layer-1 step t
        # ----- layer 0, step t -----
        gates0 = xp0[t * B:(t + 1) * B, :] + jnp.dot(
            h0, whh0, preferred_element_type=jnp.float32)
        h0, c0 = _gates_padded(gates0, c0, P)
        # ----- layer 1, step t (input is h0_t just produced) -----
        inp1 = jnp.concatenate([h0, h1], axis=1)                           # (B, 2P)
        gates1 = jnp.dot(inp1, w1, preferred_element_type=jnp.float32) + b1
        h1, c1 = _gates_padded(gates1, c1, P)

    # TODO(synk): nn.LSTM inter-layer dropout (p=0.2) is training-only; identity here.

    # FC head on out[:, -1, :]  (padded lanes of h1 are 0 and padded rows of wfc are 0).
    out_ref[...] = jnp.dot(h1, wfc_ref[...],
                           preferred_element_type=jnp.float32) + bfc_ref[...]


@jax.jit
def lstm_model_forward(x_btd, kp):
    """x_btd: (B, T, input_size) float32 -> (B, output_size)."""
    B, T, D = x_btd.shape
    P = PAD
    O = OUTPUT_SIZE
    # Time-major flatten; allow_input_fusion lets XLA fuse this into the Pallas input
    # instead of paying a separate launch + HBM round trip.
    x_flat = jnp.transpose(x_btd, (1, 0, 2)).reshape(T * B, D).astype(jnp.float32)

    kernel = functools.partial(fused_lstm_kernel, T=T, B=B, P=P)
    return pl.pallas_call(
        kernel,
        out_shape=jax.ShapeDtypeStruct((B, O), jnp.float32),
        in_specs=[
            pl.BlockSpec((T * B, D), lambda: (0, 0)),
            pl.BlockSpec((D, 4 * P), lambda: (0, 0)),
            pl.BlockSpec((P, 4 * P), lambda: (0, 0)),
            pl.BlockSpec((1, 4 * P), lambda: (0, 0)),
            pl.BlockSpec((2 * P, 4 * P), lambda: (0, 0)),
            pl.BlockSpec((1, 4 * P), lambda: (0, 0)),
            pl.BlockSpec((P, O), lambda: (0, 0)),
            pl.BlockSpec((1, O), lambda: (0, 0)),
        ],
        out_specs=pl.BlockSpec((B, O), lambda: (0, 0)),
        compiler_params=pltpu.CompilerParams(
            allow_input_fusion=[True] + [False] * 7),
    )(x_flat,
      kp["wih0"], kp["whh0"], kp["b0"],
      kp["w1"], kp["b1"],
      kp["wfc"], kp["bfc"])


# ------------------------------ parameter setup -------------------------------
def init_params(key, input_size=INPUT_SIZE, hidden_size=HIDDEN_SIZE,
                num_layers=NUM_LAYERS, output_size=OUTPUT_SIZE):
    """Deterministic PyTorch-style uniform(-1/sqrt(H), 1/sqrt(H)) init (PyTorch layout)."""
    params = {}
    bound = 1.0 / jnp.sqrt(jnp.float32(hidden_size))
    keys = jax.random.split(key, num_layers * 4 + 2)
    k_idx = 0
    for layer in range(num_layers):
        d_in = input_size if layer == 0 else hidden_size
        params[f"w_ih_l{layer}"] = jax.random.uniform(
            keys[k_idx], (4 * hidden_size, d_in), jnp.float32, -bound, bound); k_idx += 1
        params[f"w_hh_l{layer}"] = jax.random.uniform(
            keys[k_idx], (4 * hidden_size, hidden_size), jnp.float32, -bound, bound); k_idx += 1
        params[f"b_ih_l{layer}"] = jax.random.uniform(
            keys[k_idx], (4 * hidden_size,), jnp.float32, -bound, bound); k_idx += 1
        params[f"b_hh_l{layer}"] = jax.random.uniform(
            keys[k_idx], (4 * hidden_size,), jnp.float32, -bound, bound); k_idx += 1
    params["w_fc"] = jax.random.uniform(
        keys[k_idx], (output_size, hidden_size), jnp.float32, -bound, bound); k_idx += 1
    params["b_fc"] = jax.random.uniform(
        keys[k_idx], (output_size,), jnp.float32, -bound, bound)
    return params


def _remap_pad_gate_cols(w_t, H, P):
    """(K, 4H) columns in PyTorch order [i|f|g|o] -> (K, 4P) in [i|f|o|g], gates zero-padded H->P."""
    def pad(x):
        return jnp.pad(x, ((0, 0), (0, P - H)))
    i = w_t[:, 0 * H:1 * H]
    f = w_t[:, 1 * H:2 * H]
    g = w_t[:, 2 * H:3 * H]
    o = w_t[:, 3 * H:4 * H]
    return jnp.concatenate([pad(i), pad(f), pad(o), pad(g)], axis=1)


def prepare_kernel_params(params):
    """One-time layout prep (done at init, not per call): transpose, reorder [i|f|o|g],
    zero-pad each gate to 128 lanes, combine biases, build layer-1 combined [W_ih; W_hh]."""
    H, P, O = HIDDEN_SIZE, PAD, OUTPUT_SIZE
    f32 = lambda a: jnp.asarray(a, jnp.float32)

    # Layer 0
    wih0 = _remap_pad_gate_cols(f32(params["w_ih_l0"]).T, H, P)                      # (D, 4P)
    whh0 = jnp.pad(_remap_pad_gate_cols(f32(params["w_hh_l0"]).T, H, P),
                   ((0, P - H), (0, 0)))                                             # (P, 4P)
    b0 = _remap_pad_gate_cols(
        (f32(params["b_ih_l0"]) + f32(params["b_hh_l0"])).reshape(1, 4 * H), H, P)   # (1, 4P)

    # Layer 1: combined [W_ih^T ; W_hh^T] so concat([h0, h1]) drives one K=2P matmul.
    w1_top = jnp.pad(_remap_pad_gate_cols(f32(params["w_ih_l1"]).T, H, P),
                     ((0, P - H), (0, 0)))                                           # (P, 4P)
    w1_bot = jnp.pad(_remap_pad_gate_cols(f32(params["w_hh_l1"]).T, H, P),
                     ((0, P - H), (0, 0)))                                           # (P, 4P)
    w1 = jnp.concatenate([w1_top, w1_bot], axis=0)                                   # (2P, 4P)
    b1 = _remap_pad_gate_cols(
        (f32(params["b_ih_l1"]) + f32(params["b_hh_l1"])).reshape(1, 4 * H), H, P)   # (1, 4P)

    wfc = jnp.pad(f32(params["w_fc"]).T, ((0, P - H), (0, 0)))                       # (P, O)
    bfc = f32(params["b_fc"]).reshape(1, O)                                          # (1, O)

    return {"wih0": wih0, "whh0": whh0, "b0": b0,
            "w1": w1, "b1": b1, "wfc": wfc, "bfc": bfc}


# ------------------------------ pure-JAX reference -----------------------------
def _reference_forward(x_btd, params):
    B = x_btd.shape[0]
    H = HIDDEN_SIZE
    h_in = jnp.transpose(x_btd, (1, 0, 2)).astype(jnp.float32)
    for layer in range(NUM_LAYERS):
        w_ih = params[f"w_ih_l{layer}"]
        w_hh = params[f"w_hh_l{layer}"]
        b = params[f"b_ih_l{layer}"] + params[f"b_hh_l{layer}"]

        def step(carry, x_t):
            h_prev, c_prev = carry
            gates = x_t @ w_ih.T + h_prev @ w_hh.T + b
            i_g = jax.nn.sigmoid(gates[:, 0 * H:1 * H])
            f_g = jax.nn.sigmoid(gates[:, 1 * H:2 * H])
            g_g = jnp.tanh(gates[:, 2 * H:3 * H])
            o_g = jax.nn.sigmoid(gates[:, 3 * H:4 * H])
            c_t = f_g * c_prev + i_g * g_g
            h_t = o_g * jnp.tanh(c_t)
            return (h_t, c_t), h_t

        init = (jnp.zeros((B, H), jnp.float32), jnp.zeros((B, H), jnp.float32))
        _, h_in = jax.lax.scan(step, init, h_in)
    return h_in[-1] @ params["w_fc"].T + params["b_fc"]


if __name__ == "__main__":
    key = jax.random.PRNGKey(0)
    k_param, k_x = jax.random.split(key)

    B, T = 2, 8
    x = jax.random.normal(k_x, (B, T, INPUT_SIZE), jnp.float32)

    params = init_params(k_param)
    kparams = prepare_kernel_params(params)

    out = lstm_model_forward(x, kparams)
    out = jax.block_until_ready(out)
    assert out.shape == (B, OUTPUT_SIZE), out.shape

    ref = _reference_forward(x, params)
    assert jnp.allclose(out, ref, atol=1e-4, rtol=1e-4), (out, ref)

    print("KERNEL_OK")
</pallas_src>

<mosaic_0001>
module attributes {stable_mosaic.version = 11 : i64} {
  func.func @fused_lstm_kernel(%arg0: memref<16x8xf32, #tpu.memory_space<vmem>>, %arg1: memref<8x512xf32, #tpu.memory_space<vmem>>, %arg2: memref<128x512xf32, #tpu.memory_space<vmem>>, %arg3: memref<1x512xf32, #tpu.memory_space<vmem>>, %arg4: memref<256x512xf32, #tpu.memory_space<vmem>>, %arg5: memref<1x512xf32, #tpu.memory_space<vmem>>, %arg6: memref<128x1xf32, #tpu.memory_space<vmem>>, %arg7: memref<1x1xf32, #tpu.memory_space<vmem>>, %arg8: memref<2x1xf32, #tpu.memory_space<vmem>>) attributes {dimension_semantics = [], scalar_prefetch = 0 : i64, scratch_operands = 0 : i64, tpu.core_type = #tpu.core_type<tc>} {
    %c0 = arith.constant 0 : index
    %c0_0 = arith.constant 0 : index
    %0 = vector.load %arg0[%c0, %c0_0] : memref<16x8xf32, #tpu.memory_space<vmem>>, vector<16x8xf32>
    %c0_1 = arith.constant 0 : index
    %c0_2 = arith.constant 0 : index
    %1 = vector.load %arg1[%c0_1, %c0_2] : memref<8x512xf32, #tpu.memory_space<vmem>>, vector<8x512xf32>
    %cst = arith.constant dense<0.000000e+00> : vector<16x512xf32>
    %2 = tpu.matmul %0, %1, %cst {dimension_numbers = #tpu.dot_dimension_numbers<[1], [0], [0], [1], [0, 0, 1, 1], [], []>} : vector<16x8xf32>, vector<8x512xf32>, vector<16x512xf32> -> vector<16x512xf32>
    %c0_3 = arith.constant 0 : index
    %c0_4 = arith.constant 0 : index
    %3 = vector.load %arg3[%c0_3, %c0_4] : memref<1x512xf32, #tpu.memory_space<vmem>>, vector<1x512xf32>
    %4 = vector.broadcast %3 : vector<1x512xf32> to vector<16x512xf32>
    %5 = arith.addf %2, %4 : vector<16x512xf32>
    %c0_5 = arith.constant 0 : index
    %c0_6 = arith.constant 0 : index
    %6 = vector.load %arg2[%c0_5, %c0_6] : memref<128x512xf32, #tpu.memory_space<vmem>>, vector<128x512xf32>
    %c0_7 = arith.constant 0 : index
    %c0_8 = arith.constant 0 : index
    %7 = vector.load %arg4[%c0_7, %c0_8] : memref<256x512xf32, #tpu.memory_space<vmem>>, vector<256x512xf32>
    %c0_9 = arith.constant 0 : index
    %c0_10 = arith.constant 0 : index
    %8 = vector.load %arg5[%c0_9, %c0_10] : memref<1x512xf32, #tpu.memory_space<vmem>>, vector<1x512xf32>
    %9 = vector.shape_cast %8 : vector<1x512xf32> to vector<1x512xf32>
    %10 = vector.broadcast %9 : vector<1x512xf32> to vector<2x512xf32>
    %cst_11 = arith.constant 0.000000e+00 : f32
    %11 = vector.broadcast %cst_11 : f32 to vector<2x128xf32>
    %cst_12 = arith.constant 0.000000e+00 : f32
    %12 = vector.broadcast %cst_12 : f32 to vector<2x128xf32>
    %cst_13 = arith.constant 0.000000e+00 : f32
    %13 = vector.broadcast %cst_13 : f32 to vector<2x128xf32>
    %cst_14 = arith.constant 0.000000e+00 : f32
    %14 = vector.broadcast %cst_14 : f32 to vector<2x128xf32>
    %15 = vector.extract_strided_slice %5 {offsets = [0, 0], sizes = [2, 512], strides = [1, 1]} : vector<16x512xf32> to vector<2x512xf32>
    %cst_15 = arith.constant dense<0.000000e+00> : vector<2x512xf32>
    %16 = tpu.matmul %11, %6, %cst_15 {dimension_numbers = #tpu.dot_dimension_numbers<[1], [0], [0], [1], [0, 0, 1, 1], [], []>} : vector<2x128xf32>, vector<128x512xf32>, vector<2x512xf32> -> vector<2x512xf32>
    %17 = arith.addf %15, %16 : vector<2x512xf32>
    %18 = vector.extract_strided_slice %17 {offsets = [0, 0], sizes = [2, 384], strides = [1, 1]} : vector<2x512xf32> to vector<2x384xf32>
    %19 = arith.negf %18 : vector<2x384xf32>
    %20 = math.exp %19 : vector<2x384xf32>
    %cst_16 = arith.constant 1.000000e+00 : f32
    %21 = vector.broadcast %cst_16 : f32 to vector<2x384xf32>
    %22 = arith.addf %21, %20 : vector<2x384xf32>
    %23 = arith.divf %21, %22 : vector<2x384xf32>
    %24 = vector.extract_strided_slice %17 {offsets = [0, 384], sizes = [2, 128], strides = [1, 1]} : vector<2x512xf32> to vector<2x128xf32>
    %25 = math.tanh %24 : vector<2x128xf32>
    %26 = vector.extract_strided_slice %23 {offsets = [0, 0], sizes = [2, 128], strides = [1, 1]} : vector<2x384xf32> to vector<2x128xf32>
    %27 = vector.extract_strided_slice %23 {offsets = [0, 128], sizes = [2, 128], strides = [1, 1]} : vector<2x384xf32> to vector<2x128xf32>
    %28 = vector.extract_strided_slice %23 {offsets = [0, 256], sizes = [2, 128], strides = [1, 1]} : vector<2x384xf32> to vector<2x128xf32>
    %29 = arith.mulf %27, %12 : vector<2x128xf32>
    %30 = arith.mulf %26, %25 : vector<2x128xf32>
    %31 = arith.addf %29, %30 : vector<2x128xf32>
    %32 = math.tanh %31 : vector<2x128xf32>
    %33 = arith.mulf %28, %32 : vector<2x128xf32>
    %34 = tpu.concatenate %33, %13 in 1 : vector<2x128xf32>, vector<2x128xf32> -> vector<2x256xf32>
    %cst_17 = arith.constant dense<0.000000e+00> : vector<2x512xf32>
    %35 = tpu.matmul %34, %7, %cst_17 {dimension_numbers = #tpu.dot_dimension_numbers<[1], [0], [0], [1], [0, 0, 1, 1], [], []>} : vector<2x256xf32>, vector<256x512xf32>, vector<2x512xf32> -> vector<2x512xf32>
    %36 = arith.addf %35, %10 : vector<2x512xf32>
    %37 = vector.extract_strided_slice %36 {offsets = [0, 0], sizes = [2, 384], strides = [1, 1]} : vector<2x512xf32> to vector<2x384xf32>
    %38 = arith.negf %37 : vector<2x384xf32>
    %39 = math.exp %38 : vector<2x384xf32>
    %cst_18 = arith.constant 1.000000e+00 : f32
    %40 = vector.broadcast %cst_18 : f32 to vector<2x384xf32>
    %41 = arith.addf %40, %39 : vector<2x384xf32>
    %42 = arith.divf %40, %41 : vector<2x384xf32>
    %43 = vector.extract_strided_slice %36 {offsets = [0, 384], sizes = [2, 128], strides = [1, 1]} : vector<2x512xf32> to vector<2x128xf32>
    %44 = math.tanh %43 : vector<2x128xf32>
    %45 = vector.extract_strided_slice %42 {offsets = [0, 0], sizes = [2, 128], strides = [1, 1]} : vector<2x384xf32> to vector<2x128xf32>
    %46 = vector.extract_strided_slice %42 {offsets = [0, 128], sizes = [2, 128], strides = [1, 1]} : vector<2x384xf32> to vector<2x128xf32>
    %47 = vector.extract_strided_slice %42 {offsets = [0, 256], sizes = [2, 128], strides = [1, 1]} : vector<2x384xf32> to vector<2x128xf32>
    %48 = arith.mulf %46, %14 : vector<2x128xf32>
    %49 = arith.mulf %45, %44 : vector<2x128xf32>
    %50 = arith.addf %48, %49 : vector<2x128xf32>
    %51 = math.tanh %50 : vector<2x128xf32>
    %52 = arith.mulf %47, %51 : vector<2x128xf32>
    %53 = vector.extract_strided_slice %5 {offsets = [2, 0], sizes = [2, 512], strides = [1, 1]} : vector<16x512xf32> to vector<2x512xf32>
    %cst_19 = arith.constant dense<0.000000e+00> : vector<2x512xf32>
    %54 = tpu.matmul %33, %6, %cst_19 {dimension_numbers = #tpu.dot_dimension_numbers<[1], [0], [0], [1], [0, 0, 1, 1], [], []>} : vector<2x128xf32>, vector<128x512xf32>, vector<2x512xf32> -> vector<2x512xf32>
    %55 = arith.addf %53, %54 : vector<2x512xf32>
    %56 = vector.extract_strided_slice %55 {offsets = [0, 0], sizes = [2, 384], strides = [1, 1]} : vector<2x512xf32> to vector<2x384xf32>
    %57 = arith.negf %56 : vector<2x384xf32>
    %58 = math.exp %57 : vector<2x384xf32>
    %cst_20 = arith.constant 1.000000e+00 : f32
    %59 = vector.broadcast %cst_20 : f32 to vector<2x384xf32>
    %60 = arith.addf %59, %58 : vector<2x384xf32>
    %61 = arith.divf %59, %60 : vector<2x384xf32>
    %62 = vector.extract_strided_slice %55 {offsets = [0, 384], sizes = [2, 128], strides = [1, 1]} : vector<2x512xf32> to vector<2x128xf32>
    %63 = math.tanh %62 : vector<2x128xf32>
    %64 = vector.extract_strided_slice %61 {offsets = [0, 0], sizes = [2, 128], strides = [1, 1]} : vector<2x384xf32> to vector<2x128xf32>
    %65 = vector.extract_strided_slice %61 {offsets = [0, 128], sizes = [2, 128], strides = [1, 1]} : vector<2x384xf32> to vector<2x128xf32>
    %66 = vector.extract_strided_slice %61 {offsets = [0, 256], sizes = [2, 128], strides = [1, 1]} : vector<2x384xf32> to vector<2x128xf32>
    %67 = arith.mulf %65, %31 : vector<2x128xf32>
    %68 = arith.mulf %64, %63 : vector<2x128xf32>
    %69 = arith.addf %67, %68 : vector<2x128xf32>
    %70 = math.tanh %69 : vector<2x128xf32>
    %71 = arith.mulf %66, %70 : vector<2x128xf32>
    %72 = tpu.concatenate %71, %52 in 1 : vector<2x128xf32>, vector<2x128xf32> -> vector<2x256xf32>
    %cst_21 = arith.constant dense<0.000000e+00> : vector<2x512xf32>
    %73 = tpu.matmul %72, %7, %cst_21 {dimension_numbers = #tpu.dot_dimension_numbers<[1], [0], [0], [1], [0, 0, 1, 1], [], []>} : vector<2x256xf32>, vector<256x512xf32>, vector<2x512xf32> -> vector<2x512xf32>
    %74 = arith.addf %73, %10 : vector<2x512xf32>
    %75 = vector.extract_strided_slice %74 {offsets = [0, 0], sizes = [2, 384], strides = [1, 1]} : vector<2x512xf32> to vector<2x384xf32>
    %76 = arith.negf %75 : vector<2x384xf32>
    %77 = math.exp %76 : vector<2x384xf32>
    %cst_22 = arith.constant 1.000000e+00 : f32
    %78 = vector.broadcast %cst_22 : f32 to vector<2x384xf32>
    %79 = arith.addf %78, %77 : vector<2x384xf32>
    %80 = arith.divf %78, %79 : vector<2x384xf32>
    %81 = vector.extract_strided_slice %74 {offsets = [0, 384], sizes = [2, 128], strides = [1, 1]} : vector<2x512xf32> to vector<2x128xf32>
    %82 = math.tanh %81 : vector<2x128xf32>
    %83 = vector.extract_strided_slice %80 {offsets = [0, 0], sizes = [2, 128], strides = [1, 1]} : vector<2x384xf32> to vector<2x128xf32>
    %84 = vector.extract_strided_slice %80 {offsets = [0, 128], sizes = [2, 128], strides = [1, 1]} : vector<2x384xf32> to vector<2x128xf32>
    %85 = vector.extract_strided_slice %80 {offsets = [0, 256], sizes = [2, 128], strides = [1, 1]} : vector<2x384xf32> to vector<2x128xf32>
    %86 = arith.mulf %84, %50 : vector<2x128xf32>
    %87 = arith.mulf %83, %82 : vector<2x128xf32>
    %88 = arith.addf %86, %87 : vector<2x128xf32>
    %89 = math.tanh %88 : vector<2x128xf32>
    %90 = arith.mulf %85, %89 : vector<2x128xf32>
    %91 = vector.extract_strided_slice %5 {offsets = [4, 0], sizes = [2, 512], strides = [1, 1]} : vector<16x512xf32> to vector<2x512xf32>
    %cst_23 = arith.constant dense<0.000000e+00> : vector<2x512xf32>
    %92 = tpu.matmul %71, %6, %cst_23 {dimension_numbers = #tpu.dot_dimension_numbers<[1], [0], [0], [1], [0, 0, 1, 1], [], []>} : vector<2x128xf32>, vector<128x512xf32>, vector<2x512xf32> -> vector<2x512xf32>
    %93 = arith.addf %91, %92 : vector<2x512xf32>
    %94 = vector.extract_strided_slice %93 {offsets = [0, 0], sizes = [2, 384], strides = [1, 1]} : vector<2x512xf32> to vector<2x384xf32>
    %95 = arith.negf %94 : vector<2x384xf32>
    %96 = math.exp %95 : vector<2x384xf32>
    %cst_24 = arith.constant 1.000000e+00 : f32
    %97 = vector.broadcast %cst_24 : f32 to vector<2x384xf32>
    %98 = arith.addf %97, %96 : vector<2x384xf32>
    %99 = arith.divf %97, %98 : vector<2x384xf32>
    %100 = vector.extract_strided_slice %93 {offsets = [0, 384], sizes = [2, 128], strides = [1, 1]} : vector<2x512xf32> to vector<2x128xf32>
    %101 = math.tanh %100 : vector<2x128xf32>
    %102 = vector.extract_strided_slice %99 {offsets = [0, 0], sizes = [2, 128], strides = [1, 1]} : vector<2x384xf32> to vector<2x128xf32>
    %103 = vector.extract_strided_slice %99 {offsets = [0, 128], sizes = [2, 128], strides = [1, 1]} : vector<2x384xf32> to vector<2x128xf32>
    %104 = vector.extract_strided_slice %99 {offsets = [0, 256], sizes = [2, 128], strides = [1, 1]} : vector<2x384xf32> to vector<2x128xf32>
    %105 = arith.mulf %103, %69 : vector<2x128xf32>
    %106 = arith.mulf %102, %101 : vector<2x128xf32>
    %107 = arith.addf %105, %106 : vector<2x128xf32>
    %108 = math.tanh %107 : vector<2x128xf32>
    %109 = arith.mulf %104, %108 : vector<2x128xf32>
    %110 = tpu.concatenate %109, %90 in 1 : vector<2x128xf32>, vector<2x128xf32> -> vector<2x256xf32>
    %cst_25 = arith.constant dense<0.000000e+00> : vector<2x512xf32>
    %111 = tpu.matmul %110, %7, %cst_25 {dimension_numbers = #tpu.dot_dimension_numbers<[1], [0], [0], [1], [0, 0, 1, 1], [], []>} : vector<2x256xf32>, vector<256x512xf32>, vector<2x512xf32> -> vector<2x512xf32>
    %112 = arith.addf %111, %10 : vector<2x512xf32>
    %113 = vector.extract_strided_slice %112 {offsets = [0, 0], sizes = [2, 384], strides = [1, 1]} : vector<2x512xf32> to vector<2x384xf32>
    %114 = arith.negf %113 : vector<2x384xf32>
    %115 = math.exp %114 : vector<2x384xf32>
    %cst_26 = arith.constant 1.000000e+00 : f32
    %116 = vector.broadcast %cst_26 : f32 to vector<2x384xf32>
    %117 = arith.addf %116, %115 : vector<2x384xf32>
    %118 = arith.divf %116, %117 : vector<2x384xf32>
    %119 = vector.extract_strided_slice %112 {offsets = [0, 384], sizes = [2, 128], strides = [1, 1]} : vector<2x512xf32> to vector<2x128xf32>
    %120 = math.tanh %119 : vector<2x128xf32>
    %121 = vector.extract_strided_slice %118 {offsets = [0, 0], sizes = [2, 128], strides = [1, 1]} : vector<2x384xf32> to vector<2x128xf32>
    %122 = vector.extract_strided_slice %118 {offsets = [0, 128], sizes = [2, 128], strides = [1, 1]} : vector<2x384xf32> to vector<2x128xf32>
    %123 = vector.extract_strided_slice %118 {offsets = [0, 256], sizes = [2, 128], strides = [1, 1]} : vector<2x384xf32> to vector<2x128xf32>
    %124 = arith.mulf %122, %88 : vector<2x128xf32>
    %125 = arith.mulf %121, %120 : vector<2x128xf32>
    %126 = arith.addf %124, %125 : vector<2x128xf32>
    %127 = math.tanh %126 : vector<2x128xf32>
    %128 = arith.mulf %123, %127 : vector<2x128xf32>
    %129 = vector.extract_strided_slice %5 {offsets = [6, 0], sizes = [2, 512], strides = [1, 1]} : vector<16x512xf32> to vector<2x512xf32>
    %cst_27 = arith.constant dense<0.000000e+00> : vector<2x512xf32>
    %130 = tpu.matmul %109, %6, %cst_27 {dimension_numbers = #tpu.dot_dimension_numbers<[1], [0], [0], [1], [0, 0, 1, 1], [], []>} : vector<2x128xf32>, vector<128x512xf32>, vector<2x512xf32> -> vector<2x512xf32>
    %131 = arith.addf %129, %130 : vector<2x512xf32>
    %132 = vector.extract_strided_slice %131 {offsets = [0, 0], sizes = [2, 384], strides = [1, 1]} : vector<2x512xf32> to vector<2x384xf32>
    %133 = arith.negf %132 : vector<2x384xf32>
    %134 = math.exp %133 : vector<2x384xf32>
    %cst_28 = arith.constant 1.000000e+00 : f32
    %135 = vector.broadcast %cst_28 : f32 to vector<2x384xf32>
    %136 = arith.addf %135, %134 : vector<2x384xf32>
    %137 = arith.divf %135, %136 : vector<2x384xf32>
    %138 = vector.extract_strided_slice %131 {offsets = [0, 384], sizes = [2, 128], strides = [1, 1]} : vector<2x512xf32> to vector<2x128xf32>
    %139 = math.tanh %138 : vector<2x128xf32>
    %140 = vector.extract_strided_slice %137 {offsets = [0, 0], sizes = [2, 128], strides = [1, 1]} : vector<2x384xf32> to vector<2x128xf32>
    %141 = vector.extract_strided_slice %137 {offsets = [0, 128], sizes = [2, 128], strides = [1, 1]} : vector<2x384xf32> to vector<2x128xf32>
    %142 = vector.extract_strided_slice %137 {offsets = [0, 256], sizes = [2, 128], strides = [1, 1]} : vector<2x384xf32> to vector<2x128xf32>
    %143 = arith.mulf %141, %107 : vector<2x128xf32>
    %144 = arith.mulf %140, %139 : vector<2x128xf32>
    %145 = arith.addf %143, %144 : vector<2x128xf32>
    %146 = math.tanh %145 : vector<2x128xf32>
    %147 = arith.mulf %142, %146 : vector<2x128xf32>
    %148 = tpu.concatenate %147, %128 in 1 : vector<2x128xf32>, vector<2x128xf32> -> vector<2x256xf32>
    %cst_29 = arith.constant dense<0.000000e+00> : vector<2x512xf32>
    %149 = tpu.matmul %148, %7, %cst_29 {dimension_numbers = #tpu.dot_dimension_numbers<[1], [0], [0], [1], [0, 0, 1, 1], [], []>} : vector<2x256xf32>, vector<256x512xf32>, vector<2x512xf32> -> vector<2x512xf32>
    %150 = arith.addf %149, %10 : vector<2x512xf32>
    %151 = vector.extract_strided_slice %150 {offsets = [0, 0], sizes = [2, 384], strides = [1, 1]} : vector<2x512xf32> to vector<2x384xf32>
    %152 = arith.negf %151 : vector<2x384xf32>
    %153 = math.exp %152 : vector<2x384xf32>
    %cst_30 = arith.constant 1.000000e+00 : f32
    %154 = vector.broadcast %cst_30 : f32 to vector<2x384xf32>
    %155 = arith.addf %154, %153 : vector<2x384xf32>
    %156 = arith.divf %154, %155 : vector<2x384xf32>
    %157 = vector.extract_strided_slice %150 {offsets = [0, 384], sizes = [2, 128], strides = [1, 1]} : vector<2x512xf32> to vector<2x128xf32>
    %158 = math.tanh %157 : vector<2x128xf32>
    %159 = vector.extract_strided_slice %156 {offsets = [0, 0], sizes = [2, 128], strides = [1, 1]} : vector<2x384xf32> to vector<2x128xf32>
    %160 = vector.extract_strided_slice %156 {offsets = [0, 128], sizes = [2, 128], strides = [1, 1]} : vector<2x384xf32> to vector<2x128xf32>
    %161 = vector.extract_strided_slice %156 {offsets = [0, 256], sizes = [2, 128], strides = [1, 1]} : vector<2x384xf32> to vector<2x128xf32>
    %162 = arith.mulf %160, %126 : vector<2x128xf32>
    %163 = arith.mulf %159, %158 : vector<2x128xf32>
    %164 = arith.addf %162, %163 : vector<2x128xf32>
    %165 = math.tanh %164 : vector<2x128xf32>
    %166 = arith.mulf %161, %165 : vector<2x128xf32>
    %167 = vector.extract_strided_slice %5 {offsets = [8, 0], sizes = [2, 512], strides = [1, 1]} : vector<16x512xf32> to vector<2x512xf32>
    %cst_31 = arith.constant dense<0.000000e+00> : vector<2x512xf32>
    %168 = tpu.matmul %147, %6, %cst_31 {dimension_numbers = #tpu.dot_dimension_numbers<[1], [0], [0], [1], [0, 0, 1, 1], [], []>} : vector<2x128xf32>, vector<128x512xf32>, vector<2x512xf32> -> vector<2x512xf32>
    %169 = arith.addf %167, %168 : vector<2x512xf32>
    %170 = vector.extract_strided_slice %169 {offsets = [0, 0], sizes = [2, 384], strides = [1, 1]} : vector<2x512xf32> to vector<2x384xf32>
    %171 = arith.negf %170 : vector<2x384xf32>
    %172 = math.exp %171 : vector<2x384xf32>
    %cst_32 = arith.constant 1.000000e+00 : f32
    %173 = vector.broadcast %cst_32 : f32 to vector<2x384xf32>
    %174 = arith.addf %173, %172 : vector<2x384xf32>
    %175 = arith.divf %173, %174 : vector<2x384xf32>
    %176 = vector.extract_strided_slice %169 {offsets = [0, 384], sizes = [2, 128], strides = [1, 1]} : vector<2x512xf32> to vector<2x128xf32>
    %177 = math.tanh %176 : vector<2x128xf32>
    %178 = vector.extract_strided_slice %175 {offsets = [0, 0], sizes = [2, 128], strides = [1, 1]} : vector<2x384xf32> to vector<2x128xf32>
    %179 = vector.extract_strided_slice %175 {offsets = [0, 128], sizes = [2, 128], strides = [1, 1]} : vector<2x384xf32> to vector<2x128xf32>
    %180 = vector.extract_strided_slice %175 {offsets = [0, 256], sizes = [2, 128], strides = [1, 1]} : vector<2x384xf32> to vector<2x128xf32>
    %181 = arith.mulf %179, %145 : vector<2x128xf32>
    %182 = arith.mulf %178, %177 : vector<2x128xf32>
    %183 = arith.addf %181, %182 : vector<2x128xf32>
    %184 = math.tanh %183 : vector<2x128xf32>
    %185 = arith.mulf %180, %184 : vector<2x128xf32>
    %186 = tpu.concatenate %185, %166 in 1 : vector<2x128xf32>, vector<2x128xf32> -> vector<2x256xf32>
    %cst_33 = arith.constant dense<0.000000e+00> : vector<2x512xf32>
    %187 = tpu.matmul %186, %7, %cst_33 {dimension_numbers = #tpu.dot_dimension_numbers<[1], [0], [0], [1], [0, 0, 1, 1], [], []>} : vector<2x256xf32>, vector<256x512xf32>, vector<2x512xf32> -> vector<2x512xf32>
    %188 = arith.addf %187, %10 : vector<2x512xf32>
    %189 = vector.extract_strided_slice %188 {offsets = [0, 0], sizes = [2, 384], strides = [1, 1]} : vector<2x512xf32> to vector<2x384xf32>
    %190 = arith.negf %189 : vector<2x384xf32>
    %191 = math.exp %190 : vector<2x384xf32>
    %cst_34 = arith.constant 1.000000e+00 : f32
    %192 = vector.broadcast %cst_34 : f32 to vector<2x384xf32>
    %193 = arith.addf %192, %191 : vector<2x384xf32>
    %194 = arith.divf %192, %193 : vector<2x384xf32>
    %195 = vector.extract_strided_slice %188 {offsets = [0, 384], sizes = [2, 128], strides = [1, 1]} : vector<2x512xf32> to vector<2x128xf32>
    %196 = math.tanh %195 : vector<2x128xf32>
    %197 = vector.extract_strided_slice %194 {offsets = [0, 0], sizes = [2, 128], strides = [1, 1]} : vector<2x384xf32> to vector<2x128xf32>
    %198 = vector.extract_strided_slice %194 {offsets = [0, 128], sizes = [2, 128], strides = [1, 1]} : vector<2x384xf32> to vector<2x128xf32>
    %199 = vector.extract_strided_slice %194 {offsets = [0, 256], sizes = [2, 128], strides = [1, 1]} : vector<2x384xf32> to vector<2x128xf32>
    %200 = arith.mulf %198, %164 : vector<2x128xf32>
    %201 = arith.mulf %197, %196 : vector<2x128xf32>
    %202 = arith.addf %200, %201 : vector<2x128xf32>
    %203 = math.tanh %202 : vector<2x128xf32>
    %204 = arith.mulf %199, %203 : vector<2x128xf32>
    %205 = vector.extract_strided_slice %5 {offsets = [10, 0], sizes = [2, 512], strides = [1, 1]} : vector<16x512xf32> to vector<2x512xf32>
    %cst_35 = arith.constant dense<0.000000e+00> : vector<2x512xf32>
    %206 = tpu.matmul %185, %6, %cst_35 {dimension_numbers = #tpu.dot_dimension_numbers<[1], [0], [0], [1], [0, 0, 1, 1], [], []>} : vector<2x128xf32>, vector<128x512xf32>, vector<2x512xf32> -> vector<2x512xf32>
    %207 = arith.addf %205, %206 : vector<2x512xf32>
    %208 = vector.extract_strided_slice %207 {offsets = [0, 0], sizes = [2, 384], strides = [1, 1]} : vector<2x512xf32> to vector<2x384xf32>
    %209 = arith.negf %208 : vector<2x384xf32>
    %210 = math.exp %209 : vector<2x384xf32>
    %cst_36 = arith.constant 1.000000e+00 : f32
    %211 = vector.broadcast %cst_36 : f32 to vector<2x384xf32>
    %212 = arith.addf %211, %210 : vector<2x384xf32>
    %213 = arith.divf %211, %212 : vector<2x384xf32>
    %214 = vector.extract_strided_slice %207 {offsets = [0, 384], sizes = [2, 128], strides = [1, 1]} : vector<2x512xf32> to vector<2x128xf32>
    %215 = math.tanh %214 : vector<2x128xf32>
    %216 = vector.extract_strided_slice %213 {offsets = [0, 0], sizes = [2, 128], strides = [1, 1]} : vector<2x384xf32> to vector<2x128xf32>
    %217 = vector.extract_strided_slice %213 {offsets = [0, 128], sizes = [2, 128], strides = [1, 1]} : vector<2x384xf32> to vector<2x128xf32>
    %218 = vector.extract_strided_slice %213 {offsets = [0, 256], sizes = [2, 128], strides = [1, 1]} : vector<2x384xf32> to vector<2x128xf32>
    %219 = arith.mulf %217, %183 : vector<2x128xf32>
    %220 = arith.mulf %216, %215 : vector<2x128xf32>
    %221 = arith.addf %219, %220 : vector<2x128xf32>
    %222 = math.tanh %221 : vector<2x128xf32>
    %223 = arith.mulf %218, %222 : vector<2x128xf32>
    %224 = tpu.concatenate %223, %204 in 1 : vector<2x128xf32>, vector<2x128xf32> -> vector<2x256xf32>
    %cst_37 = arith.constant dense<0.000000e+00> : vector<2x512xf32>
    %225 = tpu.matmul %224, %7, %cst_37 {dimension_numbers = #tpu.dot_dimension_numbers<[1], [0], [0], [1], [0, 0, 1, 1], [], []>} : vector<2x256xf32>, vector<256x512xf32>, vector<2x512xf32> -> vector<2x512xf32>
    %226 = arith.addf %225, %10 : vector<2x512xf32>
    %227 = vector.extract_strided_slice %226 {offsets = [0, 0], sizes = [2, 384], strides = [1, 1]} : vector<2x512xf32> to vector<2x384xf32>
    %228 = arith.negf %227 : vector<2x384xf32>
    %229 = math.exp %228 : vector<2x384xf32>
    %cst_38 = arith.constant 1.000000e+00 : f32
    %230 = vector.broadcast %cst_38 : f32 to vector<2x384xf32>
    %231 = arith.addf %230, %229 : vector<2x384xf32>
    %232 = arith.divf %230, %231 : vector<2x384xf32>
    %233 = vector.extract_strided_slice %226 {offsets = [0, 384], sizes = [2, 128], strides = [1, 1]} : vector<2x512xf32> to vector<2x128xf32>
    %234 = math.tanh %233 : vector<2x128xf32>
    %235 = vector.extract_strided_slice %232 {offsets = [0, 0], sizes = [2, 128], strides = [1, 1]} : vector<2x384xf32> to vector<2x128xf32>
    %236 = vector.extract_strided_slice %232 {offsets = [0, 128], sizes = [2, 128], strides = [1, 1]} : vector<2x384xf32> to vector<2x128xf32>
    %237 = vector.extract_strided_slice %232 {offsets = [0, 256], sizes = [2, 128], strides = [1, 1]} : vector<2x384xf32> to vector<2x128xf32>
    %238 = arith.mulf %236, %202 : vector<2x128xf32>
    %239 = arith.mulf %235, %234 : vector<2x128xf32>
    %240 = arith.addf %238, %239 : vector<2x128xf32>
    %241 = math.tanh %240 : vector<2x128xf32>
    %242 = arith.mulf %237, %241 : vector<2x128xf32>
    %243 = vector.extract_strided_slice %5 {offsets = [12, 0], sizes = [2, 512], strides = [1, 1]} : vector<16x512xf32> to vector<2x512xf32>
    %cst_39 = arith.constant dense<0.000000e+00> : vector<2x512xf32>
    %244 = tpu.matmul %223, %6, %cst_39 {dimension_numbers = #tpu.dot_dimension_numbers<[1], [0], [0], [1], [0, 0, 1, 1], [], []>} : vector<2x128xf32>, vector<128x512xf32>, vector<2x512xf32> -> vector<2x512xf32>
    %245 = arith.addf %243, %244 : vector<2x512xf32>
    %246 = vector.extract_strided_slice %245 {offsets = [0, 0], sizes = [2, 384], strides = [1, 1]} : vector<2x512xf32> to vector<2x384xf32>
    %247 = arith.negf %246 : vector<2x384xf32>
    %248 = math.exp %247 : vector<2x384xf32>
    %cst_40 = arith.constant 1.000000e+00 : f32
    %249 = vector.broadcast %cst_40 : f32 to vector<2x384xf32>
    %250 = arith.addf %249, %248 : vector<2x384xf32>
    %251 = arith.divf %249, %250 : vector<2x384xf32>
    %252 = vector.extract_strided_slice %245 {offsets = [0, 384], sizes = [2, 128], strides = [1, 1]} : vector<2x512xf32> to vector<2x128xf32>
    %253 = math.tanh %252 : vector<2x128xf32>
    %254 = vector.extract_strided_slice %251 {offsets = [0, 0], sizes = [2, 128], strides = [1, 1]} : vector<2x384xf32> to vector<2x128xf32>
    %255 = vector.extract_strided_slice %251 {offsets = [0, 128], sizes = [2, 128], strides = [1, 1]} : vector<2x384xf32> to vector<2x128xf32>
    %256 = vector.extract_strided_slice %251 {offsets = [0, 256], sizes = [2, 128], strides = [1, 1]} : vector<2x384xf32> to vector<2x128xf32>
    %257 = arith.mulf %255, %221 : vector<2x128xf32>
    %258 = arith.mulf %254, %253 : vector<2x128xf32>
    %259 = arith.addf %257, %258 : vector<2x128xf32>
    %260 = math.tanh %259 : vector<2x128xf32>
    %261 = arith.mulf %256, %260 : vector<2x128xf32>
    %262 = tpu.concatenate %261, %242 in 1 : vector<2x128xf32>, vector<2x128xf32> -> vector<2x256xf32>
    %cst_41 = arith.constant dense<0.000000e+00> : vector<2x512xf32>
    %263 = tpu.matmul %262, %7, %cst_41 {dimension_numbers = #tpu.dot_dimension_numbers<[1], [0], [0], [1], [0, 0, 1, 1], [], []>} : vector<2x256xf32>, vector<256x512xf32>, vector<2x512xf32> -> vector<2x512xf32>
    %264 = arith.addf %263, %10 : vector<2x512xf32>
    %265 = vector.extract_strided_slice %264 {offsets = [0, 0], sizes = [2, 384], strides = [1, 1]} : vector<2x512xf32> to vector<2x384xf32>
    %266 = arith.negf %265 : vector<2x384xf32>
    %267 = math.exp %266 : vector<2x384xf32>
    %cst_42 = arith.constant 1.000000e+00 : f32
    %268 = vector.broadcast %cst_42 : f32 to vector<2x384xf32>
    %269 = arith.addf %268, %267 : vector<2x384xf32>
    %270 = arith.divf %268, %269 : vector<2x384xf32>
    %271 = vector.extract_strided_slice %264 {offsets = [0, 384], sizes = [2, 128], strides = [1, 1]} : vector<2x512xf32> to vector<2x128xf32>
    %272 = math.tanh %271 : vector<2x128xf32>
    %273 = vector.extract_strided_slice %270 {offsets = [0, 0], sizes = [2, 128], strides = [1, 1]} : vector<2x384xf32> to vector<2x128xf32>
    %274 = vector.extract_strided_slice %270 {offsets = [0, 128], sizes = [2, 128], strides = [1, 1]} : vector<2x384xf32> to vector<2x128xf32>
    %275 = vector.extract_strided_slice %270 {offsets = [0, 256], sizes = [2, 128], strides = [1, 1]} : vector<2x384xf32> to vector<2x128xf32>
    %276 = arith.mulf %274, %240 : vector<2x128xf32>
    %277 = arith.mulf %273, %272 : vector<2x128xf32>
    %278 = arith.addf %276, %277 : vector<2x128xf32>
    %279 = math.tanh %278 : vector<2x128xf32>
    %280 = arith.mulf %275, %279 : vector<2x128xf32>
    %281 = vector.extract_strided_slice %5 {offsets = [14, 0], sizes = [2, 512], strides = [1, 1]} : vector<16x512xf32> to vector<2x512xf32>
    %cst_43 = arith.constant dense<0.000000e+00> : vector<2x512xf32>
    %282 = tpu.matmul %261, %6, %cst_43 {dimension_numbers = #tpu.dot_dimension_numbers<[1], [0], [0], [1], [0, 0, 1, 1], [], []>} : vector<2x128xf32>, vector<128x512xf32>, vector<2x512xf32> -> vector<2x512xf32>
    %283 = arith.addf %281, %282 : vector<2x512xf32>
    %284 = vector.extract_strided_slice %283 {offsets = [0, 0], sizes = [2, 384], strides = [1, 1]} : vector<2x512xf32> to vector<2x384xf32>
    %285 = arith.negf %284 : vector<2x384xf32>
    %286 = math.exp %285 : vector<2x384xf32>
    %cst_44 = arith.constant 1.000000e+00 : f32
    %287 = vector.broadcast %cst_44 : f32 to vector<2x384xf32>
    %288 = arith.addf %287, %286 : vector<2x384xf32>
    %289 = arith.divf %287, %288 : vector<2x384xf32>
    %290 = vector.extract_strided_slice %283 {offsets = [0, 384], sizes = [2, 128], strides = [1, 1]} : vector<2x512xf32> to vector<2x128xf32>
    %291 = math.tanh %290 : vector<2x128xf32>
    %292 = vector.extract_strided_slice %289 {offsets = [0, 0], sizes = [2, 128], strides = [1, 1]} : vector<2x384xf32> to vector<2x128xf32>
    %293 = vector.extract_strided_slice %289 {offsets = [0, 128], sizes = [2, 128], strides = [1, 1]} : vector<2x384xf32> to vector<2x128xf32>
    %294 = vector.extract_strided_slice %289 {offsets = [0, 256], sizes = [2, 128], strides = [1, 1]} : vector<2x384xf32> to vector<2x128xf32>
    %295 = arith.mulf %293, %259 : vector<2x128xf32>
    %296 = arith.mulf %292, %291 : vector<2x128xf32>
    %297 = arith.addf %295, %296 : vector<2x128xf32>
    %298 = math.tanh %297 : vector<2x128xf32>
    %299 = arith.mulf %294, %298 : vector<2x128xf32>
    %300 = tpu.concatenate %299, %280 in 1 : vector<2x128xf32>, vector<2x128xf32> -> vector<2x256xf32>
    %cst_45 = arith.constant dense<0.000000e+00> : vector<2x512xf32>
    %301 = tpu.matmul %300, %7, %cst_45 {dimension_numbers = #tpu.dot_dimension_numbers<[1], [0], [0], [1], [0, 0, 1, 1], [], []>} : vector<2x256xf32>, vector<256x512xf32>, vector<2x512xf32> -> vector<2x512xf32>
    %302 = arith.addf %301, %10 : vector<2x512xf32>
    %303 = vector.extract_strided_slice %302 {offsets = [0, 0], sizes = [2, 384], strides = [1, 1]} : vector<2x512xf32> to vector<2x384xf32>
    %304 = arith.negf %303 : vector<2x384xf32>
    %305 = math.exp %304 : vector<2x384xf32>
    %cst_46 = arith.constant 1.000000e+00 : f32
    %306 = vector.broadcast %cst_46 : f32 to vector<2x384xf32>
    %307 = arith.addf %306, %305 : vector<2x384xf32>
    %308 = arith.divf %306, %307 : vector<2x384xf32>
    %309 = vector.extract_strided_slice %302 {offsets = [0, 384], sizes = [2, 128], strides = [1, 1]} : vector<2x512xf32> to vector<2x128xf32>
    %310 = math.tanh %309 : vector<2x128xf32>
    %311 = vector.extract_strided_slice %308 {offsets = [0, 0], sizes = [2, 128], strides = [1, 1]} : vector<2x384xf32> to vector<2x128xf32>
    %312 = vector.extract_strided_slice %308 {offsets = [0, 128], sizes = [2, 128], strides = [1, 1]} : vector<2x384xf32> to vector<2x128xf32>
    %313 = vector.extract_strided_slice %308 {offsets = [0, 256], sizes = [2, 128], strides = [1, 1]} : vector<2x384xf32> to vector<2x128xf32>
    %314 = arith.mulf %312, %278 : vector<2x128xf32>
    %315 = arith.mulf %311, %310 : vector<2x128xf32>
    %316 = arith.addf %314, %315 : vector<2x128xf32>
    %317 = math.tanh %316 : vector<2x128xf32>
    %318 = arith.mulf %313, %317 : vector<2x128xf32>
    %c0_47 = arith.constant 0 : index
    %c0_48 = arith.constant 0 : index
    %319 = vector.load %arg6[%c0_47, %c0_48] : memref<128x1xf32, #tpu.memory_space<vmem>>, vector<128x1xf32>
    %cst_49 = arith.constant dense<0.000000e+00> : vector<2x1xf32>
    %320 = tpu.matmul %318, %319, %cst_49 {dimension_numbers = #tpu.dot_dimension_numbers<[1], [0], [0], [1], [0, 0, 1, 1], [], []>} : vector<2x128xf32>, vector<128x1xf32>, vector<2x1xf32> -> vector<2x1xf32>
    %c0_50 = arith.constant 0 : index
    %c0_51 = arith.constant 0 : index
    %321 = vector.load %arg7[%c0_50, %c0_51] : memref<1x1xf32, #tpu.memory_space<vmem>>, vector<1x1xf32>
    %322 = vector.broadcast %321 : vector<1x1xf32> to vector<2x1xf32>
    %323 = arith.addf %320, %322 : vector<2x1xf32>
    %c0_52 = arith.constant 0 : index
    %c0_53 = arith.constant 0 : index
    %324 = vector.load %arg8[%c0_52, %c0_53] : memref<2x1xf32, #tpu.memory_space<vmem>>, vector<2x1xf32>
    tpu.vector_store %arg8[%c0_52, %c0_53], %323 {strides = array<i32>} : memref<2x1xf32, #tpu.memory_space<vmem>>, vector<2x1xf32>,
    return
  }
}

</mosaic_0001>

<bundles_post_ra>
// kernel: lstm_model_forward.1
= control target key start
LH: loop header
LB: loop body
LE: loop exit
PB: predicated region body
PF: predicated region fallthrough
CT: control target
= control target key end

     0   :  { %s6675_s0 = inlined_call_operand.vmem [shape: f32[16,8], index: 0, kind: input, shape index: {}]   ;;  %s6676_s1 = inlined_call_operand.vmem [shape: f32[8,512], index: 1, kind: input, shape index: {}]   ;;  %s6677_s2 = inlined_call_operand.hbm [shape: f32[128,512], index: 2, kind: input, shape index: {}]   ;;  %s6678_s3 = inlined_call_operand.vmem [shape: f32[1,512], index: 3, kind: input, shape index: {}]   ;;  %s6679_s4 = inlined_call_operand.hbm [shape: f32[256,512], index: 4, kind: input, shape index: {}]   ;;  %s6680_s5 = inlined_call_operand.vmem [shape: f32[1,512], index: 5, kind: input, shape index: {}]   ;;  %s6681_s6 = inlined_call_operand.vmem [shape: f32[128,1], index: 6, kind: input, shape index: {}]   ;;  %s6682_s7 = inlined_call_operand.<no memory space> [shape: f32[1,1], index: 7, kind: input, shape index: {}]   ;;  %s6683_s8 = inlined_call_operand.vmem [shape: f32[2,1], index: 8, kind: output, shape index: {}]  }
   0x1   :  { %v13_v0 = vstv %s6682_s7 }
   0x2   :  { %14 = vst [vmem:[#allocation2] sm:$0x1] %v13_v0 }
   0x3   :  { %15 = vsyncpa [#allocation4], 0 }
   0x4   :  { %16 = vsyncpa [#allocation6], 0  ;;  %s5362_s29 = smov [#allocation3]   ;;  %s5314_s11 = scalar_lea.hbm %s6677_s2, 8192 }
   0x5   :  { %s26_s30 = sshll.u32 %s5362_s29, 4  ;;  %p5315_p0 = scmp.ne.s32.totalorder %s6677_s2, %s5314_s11  ;;  %s27_s30 = int_to_ptr.vmem [resolvable:$true] %s26_s30 }
   0x6   :  { %p5318_p1 = scmp.lt.u32.totalorder %s5314_s11, %s6677_s2 }
   0x8   :  { %p5320_p2 = pnand %p5318_p1, %p5315_p0 }
   0xa   :  { %5323 = shalt.err (!%p5320_p2)
}
   0xb   :  { %s5324_s7 = scalar_lea.vmem %s27_s30, 8192  ;;  %p5329_p4 = scmp.lt.s32.totalorder %s27_s30, %s27_s30 }
   0xc   :  { %p5325_p3 = scmp.ne.s32.totalorder %s27_s30, %s5324_s7  ;;  %p5330_p5 = scmp.lt.s32.totalorder %s5324_s7, %s5324_s7 }
   0xe   :  { %p5331_p6 = por %p5330_p5, %p5329_p4 }
  0x10   :  { %p5332_p7 = pnand %p5331_p6, %p5325_p3 }
  0x12   :  { %5335 = shalt.err (!%p5332_p7)
}
  0x13   :  { %s5363_s16 = smov 512   ;;  %s5364_s17 = smov 32  }
  0x14   :  { %32 = dma.hbm_to_vmem [thread:$0]  %s6677_s2, 8192, %s27_s30, [#allocation4], %s5363_s16, %s5363_s16, %s5364_s17  }
  0x15   :  { %s5365_s20 = smov [#allocation5]   ;;  %s5336_s24 = scalar_lea.hbm %s6679_s4, 16384 }
  0x16   :  { %s40_s21 = sshll.u32 %s5365_s20, 4  ;;  %p5337_p8 = scmp.ne.s32.totalorder %s6679_s4, %s5336_s24  ;;  %s41_s21 = int_to_ptr.vmem [resolvable:$true] %s40_s21 }
  0x17   :  { %p5340_p9 = scmp.lt.u32.totalorder %s5336_s24, %s6679_s4 }
  0x19   :  { %p5342_p10 = pnand %p5340_p9, %p5337_p8 }
  0x1b   :  { %5345 = shalt.err (!%p5342_p10)
}
  0x1c   :  { %s5346_s29 = scalar_lea.vmem %s41_s21, 16384  ;;  %p5351_p12 = scmp.lt.s32.totalorder %s41_s21, %s41_s21 }
  0x1d   :  { %p5347_p11 = scmp.ne.s32.totalorder %s41_s21, %s5346_s29  ;;  %p5352_p13 = scmp.lt.s32.totalorder %s5346_s29, %s5346_s29 }
  0x1f   :  { %p5353_p0 = por %p5352_p13, %p5351_p12 }
  0x21   :  { %p5354_p1 = pnand %p5353_p0, %p5347_p11 }
  0x23   :  { %5357 = shalt.err (!%p5354_p1)
}
  0x24   :  { %46 = dma.hbm_to_vmem [thread:$0]  %s6679_s4, 16384, %s41_s21, [#allocation6], %s5363_s16, %s5363_s16, %s5364_s17  }
  0x25   :  { %5358 = dma.done.wait [#allocation4], 8192  }
  0x26   :  { %5359 = vsyncadd [#allocation4], 4294959104 }
  0x27   :  { %5360 = dma.done.wait [#allocation6], 16384  }
  0x28   :  { %5361 = vsyncadd [#allocation6], 4294950912  ;;  %v6684_v1 = vmov 0.0   ;;  %v62_v2 = vld [vmem:[%s6676_s1 + $0x8] sm:$0xff]  ;;  %v61_v3 = vld [vmem:[%s6676_s1] sm:$0xff]  ;;  %vm87_vm0 = vcmask 64512  }
  0x29   :  { %158 = vmatprep.mubr.f32.mxu1 %v6684_v1  ;;  %526 = vmatprep.mubr.f32.mxu0 %v6684_v1  ;;  %v59_v4 = vld [vmem:[%s6675_s0] sm:$0xff]  ;;  %v249_v5 = vld [vmem:[#allocation3 + $0x8] sm:$0xff]  ;;  %v64_v14 = vld [vmem:[%s6676_s1 + $0x18] sm:$0xff]  ;;  %vm5368_vm1 = vmmov 0   ;;  %vm3378_vm2 = vcmask 1024  }
  0x2a   :  { %94 = vmatprep.subr.mxu1 %v62_v2  ;;  %v253_v6 = vld [vmem:[#allocation3 + $0x28] sm:$0xff]  ;;  %v248_v7 = vld [vmem:[#allocation3] sm:$0xff]  ;;  %v251_v19 = vld [vmem:[#allocation3 + $0x18] sm:$0xff] }
  0x2b   :  { %95 = vmatpush1.msra.mxu1 %v61_v3  ;;  %v5452_v8 = vpack.c.bf16 %v253_v6, %v249_v5  ;;  %v252_v9 = vld [vmem:[#allocation3 + $0x20] sm:$0xff]  ;;  %v257_v11 = vld [vmem:[#allocation3 + $0x48] sm:$0xff]  ;;  %v255_v21 = vld [vmem:[#allocation3 + $0x38] sm:$0xff] }
  0x2c   :  { %v5457_v10 = vld [vmem:[%s6675_s0 + $0x8] sm:$0xff]  ;;  %3386 = vmatmul.mubr.msk.f32.vlgmr.msra.gmra.mrb[0].mxu1 %vm87_vm0, %v59_v4  ;;  %v5460_v12 = vpack.c.bf16 %v252_v9, %v248_v7  ;;  %v63_v18 = vld [vmem:[%s6676_s1 + $0x10] sm:$0xff]  ;;  %171 = vmatprep.subr.mxu1 %v64_v14  ;;  %v5476_v24 = vpack.c.bf16 %v255_v21, %v251_v19  ;;  %v259_v30 = vld [vmem:[#allocation3 + $0x58] sm:$0xff] }
  0x2d   :  { %6825 = vst [vmem:[#allocation9_spill] sm:$0xff] %v5452_v8  ;;  %v261_v13 = vld [vmem:[#allocation3 + $0x68] sm:$0xff]  ;;  %v256_v15 = vld [vmem:[#allocation3 + $0x40] sm:$0xff]  ;;  %3492 = vmatprep.subr.bf16.mxu0 %v5452_v8  ;;  %164 = vmatprep.mubr.f32.mxu1 %v6684_v1  ;;  %v250_v26 = vld [vmem:[#allocation3 + $0x10] sm:$0xff] }
  0x2e   :  { %v5467_v16 = vpack.c.bf16 %v261_v13, %v257_v11  ;;  %v260_v17 = vld [vmem:[#allocation3 + $0x60] sm:$0xff]  ;;  %3494 = vmatpush1.bf16.msra.mxu0 %v5460_v12  ;;  %v265_v22 = vld [vmem:[#allocation3 + $0x88] sm:$0xff]  ;;  %172 = vmatpush1.msra.mxu1 %v63_v18  ;;  %6826 = vst [vmem:[#allocation10_spill] sm:$0xff] %v5476_v24  ;;  %v254_v27 = vld [vmem:[#allocation3 + $0x30] sm:$0xff] }
  0x2f   :  { %v5473_v20 = vpack.c.bf16 %v260_v17, %v256_v15  ;;  %v269_v23 = vld [vmem:[#allocation3 + $0xa8] sm:$0xff]  ;;  %v264_v28 = vld [vmem:[#allocation3 + $0x80] sm:$0xff]  ;;  %v263_v31 = vld [vmem:[#allocation3 + $0x78] sm:$0xff]  ;;  %3524 = vmatprep.subr.bf16.mxu1 %v5476_v24  ;;  %v5484_v32 = vpack.c.bf16 %v254_v27, %v250_v26 }
  0x30   :  { %3496 = vmatprep.subr.bf16.mxu0 %v5467_v16  ;;  %v5478_v25 = vpack.c.bf16 %v269_v23, %v265_v22  ;;  %3387 = vmatmul.mubr.msk.f32.gmra.mrb[2].mxu1 %vm87_vm0, %v5457_v10  ;;  %v268_v29 = vld [vmem:[#allocation3 + $0xa0] sm:$0xff]  ;;  %v273_v33 = vld [vmem:[#allocation3 + $0xc8] sm:$0xff]  ;;  %v5489_v36 = vpack.c.bf16 %v263_v31, %v259_v30  ;;  %v258_v37 = vld [vmem:[#allocation3 + $0x50] sm:$0xff] }
  0x31   :  { %235 = vmatprep.mubr.f32.mxu1 %v6684_v1  ;;  %v277_v34 = vld [vmem:[#allocation3 + $0xe8] sm:$0xff]  ;;  %v5487_v35 = vpack.c.bf16 %v268_v29, %v264_v28  ;;  %v262_v38 = vld [vmem:[#allocation3 + $0x70] sm:$0xff]  ;;  %v272_v39 = vld [vmem:[#allocation3 + $0xc0] sm:$0xff] }
  0x32   :  { %3498 = vmatpush1.bf16.msra.mxu0 %v5473_v20  ;;  %v5492_v40 = vpack.c.bf16 %v277_v34, %v273_v33  ;;  %v276_v41 = vld [vmem:[#allocation3 + $0xe0] sm:$0xff]  ;;  %v267_v42 = vld [vmem:[#allocation3 + $0x98] sm:$0xff]  ;;  %v281_v44 = vld [vmem:[#allocation3 + $0x108] sm:$0xff]  ;;  %v5496_v46 = vpack.c.bf16 %v262_v38, %v258_v37 }
  0x33   :  { %3500 = vmatprep.subr.bf16.mxu0 %v5478_v25  ;;  %v271_v43 = vld [vmem:[#allocation3 + $0xb8] sm:$0xff]  ;;  %v285_v45 = vld [vmem:[#allocation3 + $0x128] sm:$0xff]  ;;  %v5501_v47 = vpack.c.bf16 %v276_v41, %v272_v39  ;;  %v266_v49 = vld [vmem:[#allocation3 + $0x90] sm:$0xff] }
  0x34   :  { %3388 = vmatmul.mubr.msk.f32.vlgmr.msra.gmra.mrb[4].mxu1 %vm87_vm0, %v59_v4  ;;  %v5503_v48 = vpack.c.bf16 %v271_v43, %v267_v42  ;;  %v270_v50 = vld [vmem:[#allocation3 + $0xb0] sm:$0xff]  ;;  %v280_v51 = vld [vmem:[#allocation3 + $0x100] sm:$0xff]  ;;  %v5506_v52 = vpack.c.bf16 %v285_v45, %v281_v44  ;;  %v275_v54 = vld [vmem:[#allocation3 + $0xd8] sm:$0xff] }
  0x35   :  { %3526 = vmatpush1.bf16.msra.mxu1 %v5484_v32  ;;  %241 = vmatprep.mubr.f32.mxu1 %v6684_v1  ;;  %v284_v53 = vld [vmem:[#allocation3 + $0x120] sm:$0xff]  ;;  %v279_v55 = vld [vmem:[#allocation3 + $0xf8] sm:$0xff]  ;;  %v289_v56 = vld [vmem:[#allocation3 + $0x148] sm:$0xff]  ;;  %v5511_v58 = vpack.c.bf16 %v270_v50, %v266_v49 }
  0x36   :  { %3502 = vmatpush1.bf16.msra.mxu0 %v5487_v35  ;;  %3528 = vmatprep.subr.bf16.mxu1 %v5489_v36  ;;  %v293_v57 = vld [vmem:[#allocation3 + $0x168] sm:$0xff]  ;;  %v5516_v59 = vpack.c.bf16 %v284_v53, %v280_v51  ;;  %v5518_v60 = vpack.c.bf16 %v279_v55, %v275_v54  ;;  %v274_v61 = vld [vmem:[#allocation3 + $0xd0] sm:$0xff]  ;;  %v288_v63 = vld [vmem:[#allocation3 + $0x140] sm:$0xff] }
  0x37   :  { %3504 = vmatprep.subr.bf16.mxu0 %v5492_v40  ;;  %v278_v62 = vld [vmem:[#allocation3 + $0xf0] sm:$0xff]  ;;  %v5521_v0 = vpack.c.bf16 %v293_v57, %v289_v56  ;;  %v292_v2 = vld [vmem:[#allocation3 + $0x160] sm:$0xff]  ;;  %v283_v3 = vld [vmem:[#allocation3 + $0x118] sm:$0xff] }
  0x38   :  { %3389 = vmatmul.mubr.msk.f32.gmra.mrb[6].mxu1 %vm87_vm0, %v5457_v10  ;;  %v287_v4 = vld [vmem:[#allocation3 + $0x138] sm:$0xff]  ;;  %v297_v5 = vld [vmem:[#allocation3 + $0x188] sm:$0xff]  ;;  %v5524_v7 = vpack.c.bf16 %v278_v62, %v274_v61  ;;  %v5528_v9 = vpack.c.bf16 %v292_v2, %v288_v63  ;;  %v282_v11 = vld [vmem:[#allocation3 + $0x110] sm:$0xff] }
  0x39   :  { %3530 = vmatpush1.bf16.msra.mxu1 %v5496_v46  ;;  %597 = vmatprep.mubr.f32.mxu1 %v6684_v1  ;;  %v301_v6 = vld [vmem:[#allocation3 + $0x1a8] sm:$0xff]  ;;  %v5530_v10 = vpack.c.bf16 %v287_v4, %v283_v3  ;;  %v286_v13 = vld [vmem:[#allocation3 + $0x130] sm:$0xff]  ;;  %v296_v14 = vld [vmem:[#allocation3 + $0x180] sm:$0xff] }
  0x3a   :  { %3506 = vmatpush1.bf16.msra.mxu0 %v5501_v47  ;;  %3532 = vmatprep.subr.bf16.mxu1 %v5503_v48  ;;  %v5533_v15 = vpack.c.bf16 %v301_v6, %v297_v5  ;;  %v300_v17 = vld [vmem:[#allocation3 + $0x1a0] sm:$0xff]  ;;  %v291_v18 = vld [vmem:[#allocation3 + $0x158] sm:$0xff]  ;;  %v305_v21 = vld [vmem:[#allocation3 + $0x1c8] sm:$0xff]  ;;  %v5536_v23 = vpack.c.bf16 %v286_v13, %v282_v11 }
  0x3b   :  { %3508 = vmatprep.subr.bf16.mxu0 %v5506_v52  ;;  %v295_v19 = vld [vmem:[#allocation3 + $0x178] sm:$0xff]  ;;  %v309_v22 = vld [vmem:[#allocation3 + $0x1e8] sm:$0xff]  ;;  %v5540_v26 = vpack.c.bf16 %v300_v17, %v296_v14  ;;  %v290_v28 = vld [vmem:[#allocation3 + $0x150] sm:$0xff] }
  0x3c   :  { %v5542_v27 = vpack.c.bf16 %v295_v19, %v291_v18  ;;  %v294_v29 = vld [vmem:[#allocation3 + $0x170] sm:$0xff]  ;;  %v304_v30 = vld [vmem:[#allocation3 + $0x1c0] sm:$0xff]  ;;  %v5545_v31 = vpack.c.bf16 %v309_v22, %v305_v21  ;;  %v299_v34 = vld [vmem:[#allocation3 + $0x198] sm:$0xff] }
  0x3d   :  { %3534 = vmatpush1.bf16.msra.mxu1 %v5511_v58  ;;  %v308_v33 = vld [vmem:[#allocation3 + $0x1e0] sm:$0xff]  ;;  %v303_v37 = vld [vmem:[#allocation3 + $0x1b8] sm:$0xff]  ;;  %v5548_v38 = vpack.c.bf16 %v294_v29, %v290_v28  ;;  %v298_v42 = vld [vmem:[#allocation3 + $0x190] sm:$0xff] }
  0x3e   :  { %3510 = vmatpush1.bf16.msra.mxu0 %v5516_v59  ;;  %3536 = vmatprep.subr.bf16.mxu1 %v5518_v60  ;;  %v5552_v39 = vpack.c.bf16 %v308_v33, %v304_v30  ;;  %v5554_v41 = vpack.c.bf16 %v303_v37, %v299_v34  ;;  %v302_v43 = vld [vmem:[#allocation3 + $0x1b0] sm:$0xff]  ;;  %v307_v44 = vld [vmem:[#allocation3 + $0x1d8] sm:$0xff]  ;;  %v313_v55 = vld [vmem:[#allocation5 + $0x8] sm:$0xff] }
  0x3f   :  { %3512 = vmatprep.subr.bf16.mxu0 %v5521_v0  ;;  %v311_v45 = vld [vmem:[#allocation3 + $0x1f8] sm:$0xff]  ;;  %v5558_v49 = vpack.c.bf16 %v302_v43, %v298_v42  ;;  %v306_v51 = vld [vmem:[#allocation3 + $0x1d0] sm:$0xff]  ;;  %v317_v56 = vld [vmem:[#allocation5 + $0x28] sm:$0xff] }
  0x40   :  { %v5562_v50 = vpack.c.bf16 %v311_v45, %v307_v44  ;;  %v310_v53 = vld [vmem:[#allocation3 + $0x1f0] sm:$0xff]  ;;  %v315_v57 = vld [vmem:[#allocation5 + $0x18] sm:$0xff]  ;;  %v5573_v61 = vpack.c.bf16 %v317_v56, %v313_v55  ;;  %v312_v2 = vld [vmem:[#allocation5] sm:$0xff] }
  0x41   :  { %3538 = vmatpush1.bf16.msra.mxu1 %v5524_v7  ;;  %v5566_v54 = vpack.c.bf16 %v310_v53, %v306_v51  ;;  %v319_v62 = vld [vmem:[#allocation5 + $0x38] sm:$0xff]  ;;  %v316_v3 = vld [vmem:[#allocation5 + $0x20] sm:$0xff]  ;;  %v314_v4 = vld [vmem:[#allocation5 + $0x10] sm:$0xff] }
  0x42   :  { %3514 = vmatpush1.bf16.msra.mxu0 %v5528_v9  ;;  %3540 = vmatprep.subr.bf16.mxu1 %v5530_v10  ;;  %v5575_v63 = vpack.c.bf16 %v319_v62, %v315_v57  ;;  %v5579_v5 = vpack.c.bf16 %v316_v3, %v312_v2  ;;  %v318_v6 = vld [vmem:[#allocation5 + $0x30] sm:$0xff]  ;;  %v321_v11 = vld [vmem:[#allocation5 + $0x48] sm:$0xff]  ;;  %v323_v18 = vld [vmem:[#allocation5 + $0x58] sm:$0xff] }
  0x43   :  { %3516 = vmatprep.subr.bf16.mxu0 %v5533_v15  ;;  %v325_v13 = vld [vmem:[#allocation5 + $0x68] sm:$0xff]  ;;  %v5581_v14 = vpack.c.bf16 %v318_v6, %v314_v4  ;;  %v327_v19 = vld [vmem:[#allocation5 + $0x78] sm:$0xff]  ;;  %v320_v21 = vld [vmem:[#allocation5 + $0x40] sm:$0xff] }
  0x44   :  { %v5583_v17 = vpack.c.bf16 %v325_v13, %v321_v11  ;;  %v5586_v22 = vpack.c.bf16 %v327_v19, %v323_v18  ;;  %v324_v28 = vld [vmem:[#allocation5 + $0x60] sm:$0xff]  ;;  %v322_v29 = vld [vmem:[#allocation5 + $0x50] sm:$0xff]  ;;  %v329_v37 = vld [vmem:[#allocation5 + $0x88] sm:$0xff] }
  0x45   :  { %3542 = vmatpush1.bf16.msra.mxu1 %v5536_v23  ;;  %v326_v30 = vld [vmem:[#allocation5 + $0x70] sm:$0xff]  ;;  %v5590_v33 = vpack.c.bf16 %v324_v28, %v320_v21  ;;  %v333_v42 = vld [vmem:[#allocation5 + $0xa8] sm:$0xff]  ;;  %v331_v43 = vld [vmem:[#allocation5 + $0x98] sm:$0xff] }
  0x46   :  { %3518 = vmatpush1.bf16.msra.mxu0 %v5540_v26  ;;  %3544 = vmatprep.subr.bf16.mxu1 %v5542_v27  ;;  %v5592_v34 = vpack.c.bf16 %v326_v30, %v322_v29  ;;  %v5595_v44 = vpack.c.bf16 %v333_v42, %v329_v37  ;;  %v335_v45 = vld [vmem:[#allocation5 + $0xb8] sm:$0xff]  ;;  %v328_v51 = vld [vmem:[#allocation5 + $0x80] sm:$0xff]  ;;  %v330_v56 = vld [vmem:[#allocation5 + $0x90] sm:$0xff] }
  0x47   :  { %3520 = vmatprep.subr.bf16.mxu0 %v5545_v31  ;;  %v332_v53 = vld [vmem:[#allocation5 + $0xa0] sm:$0xff]  ;;  %v5597_v55 = vpack.c.bf16 %v335_v45, %v331_v43  ;;  %v334_v57 = vld [vmem:[#allocation5 + $0xb0] sm:$0xff]  ;;  %v337_v62 = vld [vmem:[#allocation5 + $0xc8] sm:$0xff] }
  0x48   :  { %v5600_v2 = vpack.c.bf16 %v332_v53, %v328_v51  ;;  %v341_v3 = vld [vmem:[#allocation5 + $0xe8] sm:$0xff]  ;;  %v339_v4 = vld [vmem:[#allocation5 + $0xd8] sm:$0xff]  ;;  %v5604_v11 = vpack.c.bf16 %v334_v57, %v330_v56  ;;  %v336_v18 = vld [vmem:[#allocation5 + $0xc0] sm:$0xff] }
  0x49   :  { %3546 = vmatpush1.bf16.msra.mxu1 %v5548_v38  ;;  %6827 = vst [vmem:[#allocation11_spill] sm:$0xff] %v5597_v55  ;;  %v343_v6 = vld [vmem:[#allocation5 + $0xf8] sm:$0xff]  ;;  %v5606_v13 = vpack.c.bf16 %v341_v3, %v337_v62  ;;  %v340_v19 = vld [vmem:[#allocation5 + $0xe0] sm:$0xff]  ;;  %v338_v21 = vld [vmem:[#allocation5 + $0xd0] sm:$0xff] }
  0x4a   :  { %3522 = vmatpush1.bf16.msra.mxu0 %v5552_v39  ;;  %3548 = vmatprep.subr.bf16.mxu1 %v5554_v41  ;;  %6828 = vst [vmem:[#allocation12_spill] sm:$0xff] %v5600_v2  ;;  %6829 = vst [vmem:[#allocation13_spill] sm:$0xff] %v5604_v11  ;;  %v5609_v28 = vpack.c.bf16 %v343_v6, %v339_v4  ;;  %v342_v29 = vld [vmem:[#allocation5 + $0xf0] sm:$0xff]  ;;  %v345_v30 = vld [vmem:[#allocation5 + $0x108] sm:$0xff]  ;;  %v5612_v45 = vpack.c.bf16 %v340_v19, %v336_v18 }
  0x4b   :  { %3556 = vmatprep.subr.bf16.mxu0 %v5573_v61  ;;  %6830 = vst [vmem:[#allocation14_spill] sm:$0xff] %v5606_v13  ;;  %v349_v37 = vld [vmem:[#allocation5 + $0x128] sm:$0xff]  ;;  %v347_v42 = vld [vmem:[#allocation5 + $0x118] sm:$0xff]  ;;  %v5616_v51 = vpack.c.bf16 %v342_v29, %v338_v21  ;;  %v344_v56 = vld [vmem:[#allocation5 + $0x100] sm:$0xff] }
  0x4c   :  { %6831 = vst [vmem:[#allocation15_spill] sm:$0xff] %v5609_v28  ;;  %v351_v43 = vld [vmem:[#allocation5 + $0x138] sm:$0xff]  ;;  %6832 = vst [vmem:[#allocation16_spill] sm:$0xff] %v5612_v45  ;;  %v5618_v53 = vpack.c.bf16 %v349_v37, %v345_v30  ;;  %v348_v57 = vld [vmem:[#allocation5 + $0x120] sm:$0xff] }
  0x4d   :  { %527 = vmatmul.mubr.f32.vlgmr.msra.gmra.mrb[0].mxu0 %v6684_v1  ;;  %3550 = vmatpush1.bf16.msra.mxu1 %v5558_v49  ;;  %6833 = vst [vmem:[#allocation17_spill] sm:$0xff] %v5616_v51  ;;  %v5621_v62 = vpack.c.bf16 %v351_v43, %v347_v42  ;;  %v346_v3 = vld [vmem:[#allocation5 + $0x110] sm:$0xff]  ;;  %v5624_v6 = vpack.c.bf16 %v348_v57, %v344_v56  ;;  %v353_v19 = vld [vmem:[#allocation5 + $0x148] sm:$0xff]  ;;  %v355_v29 = vld [vmem:[#allocation5 + $0x158] sm:$0xff] }
  0x4e   :  { %3552 = vmatprep.subr.bf16.mxu1 %v5562_v50  ;;  %696 = vmatprep.mubr.f32.mxu0 %v6684_v1  ;;  %6834 = vst [vmem:[#allocation18_spill] sm:$0xff] %v5618_v53  ;;  %v350_v4 = vld [vmem:[#allocation5 + $0x130] sm:$0xff]  ;;  %v357_v21 = vld [vmem:[#allocation5 + $0x168] sm:$0xff]  ;;  %v359_v37 = vld [vmem:[#allocation5 + $0x178] sm:$0xff] }
  0x4f   :  { %3558 = vmatpush1.bf16.msra.mxu0 %v5579_v5  ;;  %6835 = vst [vmem:[#allocation19_spill] sm:$0xff] %v5621_v62  ;;  %6836 = vst [vmem:[#allocation20_spill] sm:$0xff] %v5624_v6  ;;  %v5628_v18 = vpack.c.bf16 %v350_v4, %v346_v3  ;;  %v5633_v30 = vpack.c.bf16 %v357_v21, %v353_v19  ;;  %v352_v42 = vld [vmem:[#allocation5 + $0x140] sm:$0xff]  ;;  %v5635_v56 = vpack.c.bf16 %v359_v37, %v355_v29  ;;  %v354_v3 = vld [vmem:[#allocation5 + $0x150] sm:$0xff] }
  0x50   :  { %3560 = vmatprep.subr.bf16.mxu0 %v5583_v17  ;;  %v356_v43 = vld [vmem:[#allocation5 + $0x160] sm:$0xff]  ;;  %v358_v4 = vld [vmem:[#allocation5 + $0x170] sm:$0xff]  ;;  %v365_v19 = vld [vmem:[#allocation5 + $0x1a8] sm:$0xff] }
  0x51   :  { %3554 = vmatpush1.bf16.msra.mxu1 %v5566_v54  ;;  %6837 = vst [vmem:[#allocation21_spill] sm:$0xff] %v5628_v18  ;;  %6838 = vst [vmem:[#allocation22_spill] sm:$0xff] %v5633_v30  ;;  %v5637_v57 = vpack.c.bf16 %v356_v43, %v352_v42  ;;  %v363_v21 = vld [vmem:[#allocation5 + $0x198] sm:$0xff]  ;;  %v360_v37 = vld [vmem:[#allocation5 + $0x180] sm:$0xff] }
  0x52   :  { %3620 = vmatprep.subr.bf16.mxu1 %v5575_v63  ;;  %6839 = vst [vmem:[#allocation23_spill] sm:$0xff] %v5635_v56  ;;  %v367_v29 = vld [vmem:[#allocation5 + $0x1b8] sm:$0xff]  ;;  %v364_v42 = vld [vmem:[#allocation5 + $0x1a0] sm:$0xff] }
  0x53   :  { %3562 = vmatpush1.bf16.msra.mxu0 %v5590_v33  ;;  %6840 = vst [vmem:[#allocation24_spill] sm:$0xff] %v5637_v57  ;;  %v5647_v43 = vpack.c.bf16 %v367_v29, %v363_v21  ;;  %v375_v21 = vld [vmem:[#allocation5 + $0x1f8] sm:$0xff]  ;;  %v368_v29 = vld [vmem:[#allocation5 + $0x1c0] sm:$0xff] }
  0x54   :  { %598 = vmatmul.mubr.f32.vlgmr.msra.gmra.mrb[8].mxu1 %v6684_v1  ;;  %3564 = vmatprep.subr.bf16.mxu0 %v5595_v44 }
  0x55   :  { %767 = vmatprep.mubr.f32.mxu1 %v6684_v1  ;;  %3622 = vmatpush1.bf16.msra.mxu1 %v5581_v14  ;;  %v5640_v1 = vpack.c.bf16 %v358_v4, %v354_v3  ;;  %6843 = vst [vmem:[#allocation27_spill] sm:$0xff] %v5647_v43  ;;  %v362_v3 = vld [vmem:[#allocation5 + $0x190] sm:$0xff] }
  0x56   :  { %3624 = vmatprep.subr.bf16.mxu1 %v5586_v22  ;;  %v366_v4 = vld [vmem:[#allocation5 + $0x1b0] sm:$0xff] }
  0x57   :  { %3566 = vmatpush1.bf16.msra.mxu0 %v5600_v2  ;;  %6841 = vst [vmem:[#allocation25_spill] sm:$0xff] %v5640_v1 }
  0x58   :  { %3568 = vmatprep.subr.bf16.mxu0 %v5606_v13 }
  0x59   :  { %3626 = vmatpush1.bf16.msra.mxu1 %v5592_v34 }
  0x5a   :  { %3628 = vmatprep.subr.bf16.mxu1 %v5597_v55 }
  0x5b   :  { %3570 = vmatpush1.bf16.msra.mxu0 %v5612_v45 }
  0x5c   :  { %3572 = vmatprep.subr.bf16.mxu0 %v5618_v53  ;;  %v427_v53 = vld [vmem:[#allocation5 + $0x398] sm:$0xff] }
  0x5d   :  { %3630 = vmatpush1.bf16.msra.mxu1 %v5604_v11 }
  0x5e   :  { %3632 = vmatprep.subr.bf16.mxu1 %v5609_v28 }
  0x5f   :  { %3574 = vmatpush1.bf16.msra.mxu0 %v5624_v6 }
  0x60   :  { %3576 = vmatprep.subr.bf16.mxu0 %v5633_v30 }
  0x61   :  { %3634 = vmatpush1.bf16.msra.mxu1 %v5616_v51 }
  0x62   :  { %3636 = vmatprep.subr.bf16.mxu1 %v5621_v62  ;;  %v5649_v62 = vpack.c.bf16 %v364_v42, %v360_v37  ;;  %v372_v37 = vld [vmem:[#allocation5 + $0x1e0] sm:$0xff] }
  0x63   :  { %3578 = vmatpush1.bf16.msra.mxu0 %v5637_v57  ;;  %v5661_v30 = vpack.c.bf16 %v372_v37, %v368_v29  ;;  %v380_v29 = vld [vmem:[#allocation5 + $0x220] sm:$0xff] }
  0x64   :  { %6844 = vst [vmem:[#allocation28_spill] sm:$0xff] %v5649_v62 }
  0x65   :  { %3638 = vmatpush1.bf16.msra.mxu1 %v5628_v18  ;;  %v361_v18 = vld [vmem:[#allocation5 + $0x188] sm:$0xff]  ;;  %6848 = vst [vmem:[#allocation32_spill] sm:$0xff] %v5661_v30 }
  0x66   :  { %3640 = vmatprep.subr.bf16.mxu1 %v5635_v56  ;;  %v5645_v6 = vpack.c.bf16 %v365_v19, %v361_v18  ;;  %v5652_v56 = vpack.c.bf16 %v366_v4, %v362_v3  ;;  %v373_v18 = vld [vmem:[#allocation5 + $0x1e8] sm:$0xff]  ;;  %v371_v19 = vld [vmem:[#allocation5 + $0x1d8] sm:$0xff]  ;;  %v370_v3 = vld [vmem:[#allocation5 + $0x1d0] sm:$0xff] }
  0x67   :  { %v5659_v42 = vpack.c.bf16 %v375_v21, %v371_v19  ;;  %v374_v4 = vld [vmem:[#allocation5 + $0x1f0] sm:$0xff]  ;;  %v383_v19 = vld [vmem:[#allocation5 + $0x238] sm:$0xff]  ;;  %v376_v21 = vld [vmem:[#allocation5 + $0x200] sm:$0xff] }
  0x68   :  { %6842 = vst [vmem:[#allocation26_spill] sm:$0xff] %v5645_v6  ;;  %3580 = vmatprep.subr.bf16.mxu0 %v5645_v6  ;;  %6845 = vst [vmem:[#allocation29_spill] sm:$0xff] %v5652_v56  ;;  %v5673_v6 = vpack.c.bf16 %v380_v29, %v376_v21  ;;  %v388_v21 = vld [vmem:[#allocation5 + $0x260] sm:$0xff] }
  0x69   :  { %3642 = vmatpush1.bf16.msra.mxu1 %v5640_v1  ;;  %3582 = vmatpush1.bf16.msra.mxu0 %v5649_v62  ;;  %v369_v1 = vld [vmem:[#allocation5 + $0x1c8] sm:$0xff]  ;;  %6847 = vst [vmem:[#allocation31_spill] sm:$0xff] %v5659_v42 }
  0x6a   :  { %3644 = vmatprep.subr.bf16.mxu1 %v5647_v43  ;;  %v5657_v57 = vpack.c.bf16 %v373_v18, %v369_v1  ;;  %v5664_v43 = vpack.c.bf16 %v374_v4, %v370_v3  ;;  %v381_v1 = vld [vmem:[#allocation5 + $0x228] sm:$0xff]  ;;  %v379_v18 = vld [vmem:[#allocation5 + $0x218] sm:$0xff]  ;;  %6852 = vst [vmem:[#allocation36_spill] sm:$0xff] %v5673_v6  ;;  %v378_v3 = vld [vmem:[#allocation5 + $0x210] sm:$0xff] }
  0x6b   :  { %v5671_v37 = vpack.c.bf16 %v383_v19, %v379_v18  ;;  %v382_v4 = vld [vmem:[#allocation5 + $0x230] sm:$0xff]  ;;  %v391_v18 = vld [vmem:[#allocation5 + $0x278] sm:$0xff]  ;;  %v384_v19 = vld [vmem:[#allocation5 + $0x240] sm:$0xff] }
  0x6c   :  { %6846 = vst [vmem:[#allocation30_spill] sm:$0xff] %v5657_v57  ;;  %3584 = vmatprep.subr.bf16.mxu0 %v5657_v57  ;;  %6849 = vst [vmem:[#allocation33_spill] sm:$0xff] %v5664_v43  ;;  %v5685_v57 = vpack.c.bf16 %v388_v21, %v384_v19  ;;  %v396_v19 = vld [vmem:[#allocation5 + $0x2a0] sm:$0xff] }
  0x6d   :  { %3646 = vmatpush1.bf16.msra.mxu1 %v5652_v56  ;;  %3586 = vmatpush1.bf16.msra.mxu0 %v5661_v30  ;;  %v377_v56 = vld [vmem:[#allocation5 + $0x208] sm:$0xff]  ;;  %6851 = vst [vmem:[#allocation35_spill] sm:$0xff] %v5671_v37 }
  0x6e   :  { %3648 = vmatprep.subr.bf16.mxu1 %v5659_v42  ;;  %v5669_v62 = vpack.c.bf16 %v381_v1, %v377_v56  ;;  %v5676_v42 = vpack.c.bf16 %v382_v4, %v378_v3  ;;  %v389_v56 = vld [vmem:[#allocation5 + $0x268] sm:$0xff]  ;;  %v387_v1 = vld [vmem:[#allocation5 + $0x258] sm:$0xff]  ;;  %6856 = vst [vmem:[#allocation40_spill] sm:$0xff] %v5685_v57  ;;  %v386_v3 = vld [vmem:[#allocation5 + $0x250] sm:$0xff] }
  0x6f   :  { %v5683_v29 = vpack.c.bf16 %v391_v18, %v387_v1  ;;  %v390_v4 = vld [vmem:[#allocation5 + $0x270] sm:$0xff]  ;;  %v399_v1 = vld [vmem:[#allocation5 + $0x2b8] sm:$0xff]  ;;  %v392_v18 = vld [vmem:[#allocation5 + $0x280] sm:$0xff] }
  0x70   :  { %6850 = vst [vmem:[#allocation34_spill] sm:$0xff] %v5669_v62  ;;  %3588 = vmatprep.subr.bf16.mxu0 %v5669_v62  ;;  %6853 = vst [vmem:[#allocation37_spill] sm:$0xff] %v5676_v42  ;;  %v5697_v62 = vpack.c.bf16 %v396_v19, %v392_v18  ;;  %v404_v18 = vld [vmem:[#allocation5 + $0x2e0] sm:$0xff] }
  0x71   :  { %3650 = vmatpush1.bf16.msra.mxu1 %v5664_v43  ;;  %3590 = vmatpush1.bf16.msra.mxu0 %v5673_v6  ;;  %v385_v43 = vld [vmem:[#allocation5 + $0x248] sm:$0xff]  ;;  %6855 = vst [vmem:[#allocation39_spill] sm:$0xff] %v5683_v29 }
  0x72   :  { %3652 = vmatprep.subr.bf16.mxu1 %v5671_v37  ;;  %v5681_v30 = vpack.c.bf16 %v389_v56, %v385_v43  ;;  %v5688_v37 = vpack.c.bf16 %v390_v4, %v386_v3  ;;  %v397_v43 = vld [vmem:[#allocation5 + $0x2a8] sm:$0xff]  ;;  %v395_v56 = vld [vmem:[#allocation5 + $0x298] sm:$0xff]  ;;  %6860 = vst [vmem:[#allocation44_spill] sm:$0xff] %v5697_v62  ;;  %v394_v3 = vld [vmem:[#allocation5 + $0x290] sm:$0xff] }
  0x73   :  { %v5695_v21 = vpack.c.bf16 %v399_v1, %v395_v56  ;;  %v398_v4 = vld [vmem:[#allocation5 + $0x2b0] sm:$0xff]  ;;  %v407_v56 = vld [vmem:[#allocation5 + $0x2f8] sm:$0xff]  ;;  %v400_v1 = vld [vmem:[#allocation5 + $0x2c0] sm:$0xff] }
  0x74   :  { %6854 = vst [vmem:[#allocation38_spill] sm:$0xff] %v5681_v30  ;;  %3592 = vmatprep.subr.bf16.mxu0 %v5681_v30  ;;  %6857 = vst [vmem:[#allocation41_spill] sm:$0xff] %v5688_v37  ;;  %v5709_v30 = vpack.c.bf16 %v404_v18, %v400_v1  ;;  %v412_v1 = vld [vmem:[#allocation5 + $0x320] sm:$0xff] }
  0x75   :  { %3654 = vmatpush1.bf16.msra.mxu1 %v5676_v42  ;;  %3594 = vmatpush1.bf16.msra.mxu0 %v5685_v57  ;;  %v393_v42 = vld [vmem:[#allocation5 + $0x288] sm:$0xff]  ;;  %6859 = vst [vmem:[#allocation43_spill] sm:$0xff] %v5695_v21 }
  0x76   :  { %3656 = vmatprep.subr.bf16.mxu1 %v5683_v29  ;;  %v5693_v6 = vpack.c.bf16 %v397_v43, %v393_v42  ;;  %v5700_v29 = vpack.c.bf16 %v398_v4, %v394_v3  ;;  %v405_v42 = vld [vmem:[#allocation5 + $0x2e8] sm:$0xff]  ;;  %v403_v43 = vld [vmem:[#allocation5 + $0x2d8] sm:$0xff]  ;;  %6864 = vst [vmem:[#allocation48_spill] sm:$0xff] %v5709_v30  ;;  %v402_v3 = vld [vmem:[#allocation5 + $0x2d0] sm:$0xff] }
  0x77   :  { %v5707_v19 = vpack.c.bf16 %v407_v56, %v403_v43  ;;  %v406_v4 = vld [vmem:[#allocation5 + $0x2f0] sm:$0xff]  ;;  %v415_v43 = vld [vmem:[#allocation5 + $0x338] sm:$0xff]  ;;  %v408_v56 = vld [vmem:[#allocation5 + $0x300] sm:$0xff] }
  0x78   :  { %6858 = vst [vmem:[#allocation42_spill] sm:$0xff] %v5693_v6  ;;  %3596 = vmatprep.subr.bf16.mxu0 %v5693_v6  ;;  %6861 = vst [vmem:[#allocation45_spill] sm:$0xff] %v5700_v29  ;;  %v5721_v6 = vpack.c.bf16 %v412_v1, %v408_v56  ;;  %v420_v56 = vld [vmem:[#allocation5 + $0x360] sm:$0xff] }
  0x79   :  { %3658 = vmatpush1.bf16.msra.mxu1 %v5688_v37  ;;  %3598 = vmatpush1.bf16.msra.mxu0 %v5697_v62  ;;  %v401_v37 = vld [vmem:[#allocation5 + $0x2c8] sm:$0xff]  ;;  %6863 = vst [vmem:[#allocation47_spill] sm:$0xff] %v5707_v19 }
  0x7a   :  { %3660 = vmatprep.subr.bf16.mxu1 %v5695_v21  ;;  %v5705_v57 = vpack.c.bf16 %v405_v42, %v401_v37  ;;  %v5712_v21 = vpack.c.bf16 %v406_v4, %v402_v3  ;;  %v413_v37 = vld [vmem:[#allocation5 + $0x328] sm:$0xff]  ;;  %v411_v42 = vld [vmem:[#allocation5 + $0x318] sm:$0xff]  ;;  %6868 = vst [vmem:[#allocation52_spill] sm:$0xff] %v5721_v6  ;;  %v410_v3 = vld [vmem:[#allocation5 + $0x310] sm:$0xff] }
  0x7b   :  { %v5719_v18 = vpack.c.bf16 %v415_v43, %v411_v42  ;;  %v414_v4 = vld [vmem:[#allocation5 + $0x330] sm:$0xff]  ;;  %v423_v42 = vld [vmem:[#allocation5 + $0x378] sm:$0xff]  ;;  %v416_v43 = vld [vmem:[#allocation5 + $0x340] sm:$0xff] }
  0x7c   :  { %6862 = vst [vmem:[#allocation46_spill] sm:$0xff] %v5705_v57  ;;  %3600 = vmatprep.subr.bf16.mxu0 %v5705_v57  ;;  %6865 = vst [vmem:[#allocation49_spill] sm:$0xff] %v5712_v21  ;;  %v5733_v57 = vpack.c.bf16 %v420_v56, %v416_v43 }
  0x7d   :  { %3662 = vmatpush1.bf16.msra.mxu1 %v5700_v29  ;;  %3602 = vmatpush1.bf16.msra.mxu0 %v5709_v30  ;;  %v409_v29 = vld [vmem:[#allocation5 + $0x308] sm:$0xff]  ;;  %6867 = vst [vmem:[#allocation51_spill] sm:$0xff] %v5719_v18 }
  0x7e   :  { %3664 = vmatprep.subr.bf16.mxu1 %v5707_v19  ;;  %v5717_v62 = vpack.c.bf16 %v413_v37, %v409_v29  ;;  %v5724_v19 = vpack.c.bf16 %v414_v4, %v410_v3  ;;  %v421_v29 = vld [vmem:[#allocation5 + $0x368] sm:$0xff]  ;;  %v419_v37 = vld [vmem:[#allocation5 + $0x358] sm:$0xff]  ;;  %6872 = vst [vmem:[#allocation56_spill] sm:$0xff] %v5733_v57  ;;  %v418_v3 = vld [vmem:[#allocation5 + $0x350] sm:$0xff] }
  0x7f   :  { %v5731_v1 = vpack.c.bf16 %v423_v42, %v419_v37  ;;  %v422_v4 = vld [vmem:[#allocation5 + $0x370] sm:$0xff]  ;;  %v424_v37 = vld [vmem:[#allocation5 + $0x380] sm:$0xff] }
  0x80   :  { %6866 = vst [vmem:[#allocation50_spill] sm:$0xff] %v5717_v62  ;;  %3604 = vmatprep.subr.bf16.mxu0 %v5717_v62  ;;  %6869 = vst [vmem:[#allocation53_spill] sm:$0xff] %v5724_v19  ;;  %v429_v62 = vld [vmem:[#allocation5 + $0x3a8] sm:$0xff]  ;;  %v428_v42 = vld [vmem:[#allocation5 + $0x3a0] sm:$0xff] }
  0x81   :  { %3666 = vmatpush1.bf16.msra.mxu1 %v5712_v21  ;;  %3606 = vmatpush1.bf16.msra.mxu0 %v5721_v6  ;;  %v417_v21 = vld [vmem:[#allocation5 + $0x348] sm:$0xff]  ;;  %6871 = vst [vmem:[#allocation55_spill] sm:$0xff] %v5731_v1  ;;  %v5745_v56 = vpack.c.bf16 %v428_v42, %v424_v37  ;;  %v434_v37 = vld [vmem:[#allocation5 + $0x3d0] sm:$0xff] }
  0x82   :  { %3668 = vmatprep.subr.bf16.mxu1 %v5719_v18  ;;  %v5729_v30 = vpack.c.bf16 %v421_v29, %v417_v21  ;;  %v5736_v18 = vpack.c.bf16 %v422_v4, %v418_v3  ;;  %v425_v6 = vld [vmem:[#allocation5 + $0x388] sm:$0xff]  ;;  %v431_v29 = vld [vmem:[#allocation5 + $0x3b8] sm:$0xff]  ;;  %v426_v3 = vld [vmem:[#allocation5 + $0x390] sm:$0xff] }
  0x83   :  { %v5740_v21 = vpack.c.bf16 %v429_v62, %v425_v6  ;;  %v5743_v43 = vpack.c.bf16 %v431_v29, %v427_v53  ;;  %6876 = vst [vmem:[#allocation60_spill] sm:$0xff] %v5745_v56  ;;  %v430_v4 = vld [vmem:[#allocation5 + $0x3b0] sm:$0xff]  ;;  %v439_v62 = vld [vmem:[#allocation5 + $0x3f8] sm:$0xff]  ;;  %v432_v53 = vld [vmem:[#allocation5 + $0x3c0] sm:$0xff] }
  0x84   :  { %6870 = vst [vmem:[#allocation54_spill] sm:$0xff] %v5729_v30  ;;  %3608 = vmatprep.subr.bf16.mxu0 %v5729_v30  ;;  %6873 = vst [vmem:[#allocation57_spill] sm:$0xff] %v5736_v18  ;;  %v433_v30 = vld [vmem:[#allocation5 + $0x3c8] sm:$0xff]  ;;  %v436_v29 = vld [vmem:[#allocation5 + $0x3e0] sm:$0xff] }
  0x85   :  { %3670 = vmatpush1.bf16.msra.mxu1 %v5724_v19  ;;  %3610 = vmatpush1.bf16.msra.mxu0 %v5733_v57  ;;  %6874 = vst [vmem:[#allocation58_spill] sm:$0xff] %v5740_v21  ;;  %6875 = vst [vmem:[#allocation59_spill] sm:$0xff] %v5743_v43  ;;  %v5748_v19 = vpack.c.bf16 %v430_v4, %v426_v3  ;;  %v435_v57 = vld [vmem:[#allocation5 + $0x3d8] sm:$0xff]  ;;  %v5756_v42 = vpack.c.bf16 %v436_v29, %v432_v53 }
  0x86   :  { %3672 = vmatprep.subr.bf16.mxu1 %v5731_v1  ;;  %3612 = vmatprep.subr.bf16.mxu0 %v5740_v21  ;;  %v437_v1 = vld [vmem:[#allocation5 + $0x3e8] sm:$0xff]  ;;  %v5753_v51 = vpack.c.bf16 %v439_v62, %v435_v57 }
  0x87   :  { %6877 = vst [vmem:[#allocation61_spill] sm:$0xff] %v5748_v19  ;;  %v5751_v6 = vpack.c.bf16 %v437_v1, %v433_v30  ;;  %6880 = vst [vmem:[#allocation64_spill] sm:$0xff] %v5756_v42  ;;  %v67_v30 = vlaneseq }
  0x88   :  { %6879 = vst [vmem:[#allocation63_spill] sm:$0xff] %v5753_v51 }
  0x89   :  { %3674 = vmatpush1.bf16.msra.mxu1 %v5736_v18  ;;  %6878 = vst [vmem:[#allocation62_spill] sm:$0xff] %v5751_v6  ;;  %3614 = vmatpush1.bf16.msra.mxu0 %v5745_v56  ;;  %v438_v18 = vld [vmem:[#allocation5 + $0x3f0] sm:$0xff]  ;;  %v5767_v57 = vshrl.u32 %v67_v30, 7 }
  0x8a   :  { %3676 = vmatprep.subr.bf16.mxu1 %v5743_v43  ;;  %3616 = vmatprep.subr.bf16.mxu0 %v5751_v6  ;;  %v5760_v3 = vpack.c.bf16 %v438_v18, %v434_v37  ;;  %v65_v18 = vld [vmem:[%s6678_s3] sm:$0xf] }
  0x8b   :  { %v6784_v1 = vsub.s32 0, %v5767_v57  ;;  %v6787_v62 = vsub.s32 1, %v5767_v57  ;;  %v6801_v6 = vsub.s32 3, %v5767_v57 }
  0x8c   :  { %6881 = vst [vmem:[#allocation65_spill] sm:$0xff] %v5760_v3 }
  0x8d   :  { %3678 = vmatpush1.bf16.msra.mxu1 %v5748_v19  ;;  %3618 = vmatpush1.bf16.msra.mxu0 %v5756_v42  ;;  %v70_v29 = vrot.slane %v65_v18, %v6784_v1  ;;  %v74_v37 = vrot.slane %v65_v18, %v6787_v62  ;;  %v6798_v42 = vsub.s32 2, %v5767_v57  ;;  %v82_v1 = vrot.slane %v65_v18, %v6801_v6 }
  0x8e   :  { %3680 = vmatprep.subr.bf16.mxu1 %v5753_v51  ;;  %3684 = vmatprep.subr.bf16.mxu0 %v5452_v8 }
  0x8f   :  { %v78_v56 = vrot.slane %v65_v18, %v6798_v42 }
  0x91   :  { %3682 = vmatpush1.bf16.msra.mxu1 %v5760_v3 }
  0x92   :  { %3716 = vmatprep.subr.bf16.mxu1 %v5476_v24 }
  0xff   :  { %v160_v4 = vpop.f32.mrb[0].mxu1 }
 0x100   :  { %v162_v53 = vpop.f32.mrb[1].mxu1 }
 0x103   :  { %v166_v24 = vpop.f32.mrb[2].mxu1 }
 0x104   :  { %v5778_v8 = vadd.f32 %v166_v24, %v70_v29  ;;  %v168_v30 = vpop.f32.mrb[3].mxu1 }
 0x105   :  { %v5780_v3 = vadd.f32 %v168_v30, %v74_v37  ;;  %v5792_v30 = vadd.f32 %v160_v4, %v70_v29 }
 0x106   :  { %6882 = vst [vmem:[#allocation66_spill] sm:$0xff] %v5778_v8 }
 0x107   :  { %6883 = vst [vmem:[#allocation67_spill] sm:$0xff] %v5780_v3  ;;  %v237_v51 = vpop.f32.mrb[4].mxu1  ;;  %6886 = vst [vmem:[#allocation70_spill] sm:$0xff] %v5792_v30  ;;  %v5794_v3 = vadd.f32 %v162_v53, %v74_v37 }
 0x108   :  { %v239_v19 = vpop.f32.mrb[5].mxu1  ;;  %v5798_v18 = vadd.f32 %v237_v51, %v78_v56 }
 0x109   :  { %v5801_v4 = vadd.f32 %v239_v19, %v82_v1 }
 0x10b   :  { %v243_v43 = vpop.f32.mrb[6].mxu1 }
 0x10c   :  { %v5788_v62 = vadd.f32 %v243_v43, %v78_v56  ;;  %v245_v24 = vpop.f32.mrb[7].mxu1 }
 0x10d   :  { %v5790_v8 = vadd.f32 %v245_v24, %v82_v1 }
 0x10e   :  { %6884 = vst [vmem:[#allocation68_spill] sm:$0xff] %v5788_v62  ;;  %v6903_v62 = vld [vmem:[#allocation28_spill] sm:$0xff] }
 0x10f   :  { %6885 = vst [vmem:[#allocation69_spill] sm:$0xff] %v5790_v8 }
 0x120   :  { %v528_v21 = vpop.f32.mrb[0].mxu0 }
 0x121   :  { %v604_v45 = vadd.f32 %v528_v21, %v5792_v30  ;;  %v530_v28 = vpop.f32.mrb[1].mxu0 }
 0x122   :  { %v605_v13 = vadd.f32 %v530_v28, %v5794_v3 }
 0x123   :  { %v3390_v42 = vmul.f32 -1.442695, %v604_v45 }
 0x124   :  { %v3391_v11 = vmul.f32 -1.442695, %v605_v13 }
 0x125   :  { %5058 = vpow2.f32 %v3390_v42 }
 0x126   :  { %5060 = vpow2.f32 %v3391_v11 }
 0x127   :  { %v599_v43 = vpop.f32.mrb[8].mxu1 }
 0x128   :  { %v606_v24 = vadd.f32 %v599_v43, %v5798_v18  ;;  %v601_v6 = vpop.f32.mrb[9].mxu1 }
 0x129   :  { %v607_v29 = vadd.f32 %v601_v6, %v5801_v4 }
 0x12a   :  { %v3392_v53 = vmul.f32 -1.442695, %v606_v24 }
 0x12c   :  { %5062 = vpow2.f32 %v3392_v53  ;;  %v6888_v53 = vld [vmem:[#allocation13_spill] sm:$0xff] }
 0x12d   :  { %5064 = vtanh.f32 %v607_v29  ;;  %v6889_v29 = vld [vmem:[#allocation14_spill] sm:$0xff] }
 0x12f   :  { %v5059_v37 = vpop.eup %5058 }
 0x130   :  { %v5061_v21 = vpop.eup %5060  ;;  %v617_v8 = vadd.f32 1.0, %v5059_v37  ;;  %v6890_v37 = vld [vmem:[#allocation15_spill] sm:$0xff] }
 0x131   :  { %v618_v28 = vadd.f32 1.0, %v5061_v21  ;;  %v6891_v21 = vld [vmem:[#allocation16_spill] sm:$0xff] }
 0x132   :  { %5066 = vrcp.f32 %v617_v8  ;;  %v6887_v8 = vmov 0.0  }
 0x133   :  { %5068 = vrcp.f32 %v618_v28  ;;  %v6892_v28 = vld [vmem:[#allocation17_spill] sm:$0xff] }
 0x136   :  { %v5063_v13 = vpop.eup %5062 }
 0x137   :  { %v5065_v45 = vpop.eup %5064  ;;  %v619_v56 = vadd.f32 1.0, %v5063_v13  ;;  %v6893_v13 = vld [vmem:[#allocation18_spill] sm:$0xff] }
 0x139   :  { %5070 = vrcp.f32 %v619_v56  ;;  %v6897_v56 = vld [vmem:[#allocation22_spill] sm:$0xff] }
 0x13c   :  { %v5067_v11 = vpop.eup %5066 }
 0x13d   :  { %v5069_v51 = vpop.eup %5068  ;;  %v628_v42 = vmul.f32 %v5067_v11, %v5065_v45  ;;  %v6894_v45 = vld [vmem:[#allocation19_spill] sm:$0xff]  ;;  %v6895_v11 = vld [vmem:[#allocation20_spill] sm:$0xff] }
 0x13e   :  { %v627_v43 = vmul.f32 0.0, %v5069_v51  ;;  %v6896_v51 = vld [vmem:[#allocation21_spill] sm:$0xff] }
 0x140   :  { %v5804_v19 = vadd.f32 %v628_v42, %v627_v43  ;;  %v6898_v42 = vld [vmem:[#allocation23_spill] sm:$0xff]  ;;  %v6899_v43 = vld [vmem:[#allocation24_spill] sm:$0xff] }
 0x142   :  { %5072 = vtanh.f32 %v5804_v19 }
 0x143   :  { %v5071_v6 = vpop.eup %5070 }
 0x14c   :  { %v5073_v1 = vpop.eup %5072 }
 0x14d   :  { %v631_v24 = vmul.f32 %v5073_v1, %v5071_v6  ;;  %v6900_v6 = vld [vmem:[#allocation25_spill] sm:$0xff]  ;;  %v6901_v1 = vld [vmem:[#allocation26_spill] sm:$0xff] }
 0x14f   :  { %697 = vmatmul.mubr.f32.vlgmr.msra.gmra.mrb[2].mxu0 %v631_v24  ;;  %768 = vmatmul.mubr.f32.vlgmr.msra.gmra.mrb[10].mxu1 %v631_v24 }
 0x150   :  { %3686 = vmatpush1.bf16.msra.mxu0 %v5460_v12  ;;  %3718 = vmatpush1.bf16.msra.mxu1 %v5484_v32 }
 0x151   :  { %3688 = vmatprep.subr.bf16.mxu0 %v5467_v16  ;;  %3720 = vmatprep.subr.bf16.mxu1 %v5489_v36 }
 0x152   :  { %862 = vmatprep.mubr.f32.mxu0 %v6887_v8  ;;  %933 = vmatprep.mubr.f32.mxu1 %v6887_v8 }
 0x154   :  { %3690 = vmatpush1.bf16.msra.mxu0 %v5473_v20  ;;  %3722 = vmatpush1.bf16.msra.mxu1 %v5496_v46 }
 0x155   :  { %3692 = vmatprep.subr.bf16.mxu0 %v5478_v25  ;;  %3724 = vmatprep.subr.bf16.mxu1 %v5503_v48 }
 0x158   :  { %3694 = vmatpush1.bf16.msra.mxu0 %v5487_v35  ;;  %3726 = vmatpush1.bf16.msra.mxu1 %v5511_v58 }
 0x159   :  { %3696 = vmatprep.subr.bf16.mxu0 %v5492_v40  ;;  %3728 = vmatprep.subr.bf16.mxu1 %v5518_v60 }
 0x15c   :  { %3698 = vmatpush1.bf16.msra.mxu0 %v5501_v47  ;;  %3730 = vmatpush1.bf16.msra.mxu1 %v5524_v7 }
 0x15d   :  { %3700 = vmatprep.subr.bf16.mxu0 %v5506_v52  ;;  %3732 = vmatprep.subr.bf16.mxu1 %v5530_v10 }
 0x160   :  { %3702 = vmatpush1.bf16.msra.mxu0 %v5516_v59  ;;  %3734 = vmatpush1.bf16.msra.mxu1 %v5536_v23 }
 0x161   :  { %3704 = vmatprep.subr.bf16.mxu0 %v5521_v0  ;;  %3736 = vmatprep.subr.bf16.mxu1 %v5542_v27 }
 0x164   :  { %3706 = vmatpush1.bf16.msra.mxu0 %v5528_v9  ;;  %3738 = vmatpush1.bf16.msra.mxu1 %v5548_v38 }
 0x165   :  { %3708 = vmatprep.subr.bf16.mxu0 %v5533_v15  ;;  %3740 = vmatprep.subr.bf16.mxu1 %v5554_v41 }
 0x168   :  { %3710 = vmatpush1.bf16.msra.mxu0 %v5540_v26  ;;  %3742 = vmatpush1.bf16.msra.mxu1 %v5558_v49 }
 0x169   :  { %3712 = vmatprep.subr.bf16.mxu0 %v5545_v31  ;;  %3744 = vmatprep.subr.bf16.mxu1 %v5562_v50 }
 0x16c   :  { %3714 = vmatpush1.bf16.msra.mxu0 %v5552_v39  ;;  %3746 = vmatpush1.bf16.msra.mxu1 %v5566_v54 }
 0x16d   :  { %3748 = vmatprep.subr.bf16.mxu0 %v5573_v61  ;;  %3812 = vmatprep.subr.bf16.mxu1 %v5575_v63 }
 0x16f   :  { %863 = vmatmul.mubr.f32.vlgmr.msra.gmra.mrb[4].mxu0 %v631_v24  ;;  %934 = vmatmul.mubr.f32.vlgmr.msra.gmra.mrb[12].mxu1 %v631_v24  ;;  %v6902_v24 = vld [vmem:[#allocation27_spill] sm:$0xff] }
 0x170   :  { %3750 = vmatpush1.bf16.msra.mxu0 %v5579_v5  ;;  %3814 = vmatpush1.bf16.msra.mxu1 %v5581_v14 }
 0x171   :  { %3752 = vmatprep.subr.bf16.mxu0 %v5583_v17  ;;  %3816 = vmatprep.subr.bf16.mxu1 %v5586_v22 }
 0x174   :  { %3754 = vmatpush1.bf16.msra.mxu0 %v5590_v33  ;;  %3818 = vmatpush1.bf16.msra.mxu1 %v5592_v34 }
 0x175   :  { %3756 = vmatprep.subr.bf16.mxu0 %v5595_v44  ;;  %3820 = vmatprep.subr.bf16.mxu1 %v5597_v55 }
 0x178   :  { %3758 = vmatpush1.bf16.msra.mxu0 %v5600_v2  ;;  %3822 = vmatpush1.bf16.msra.mxu1 %v6888_v53 }
 0x179   :  { %3760 = vmatprep.subr.bf16.mxu0 %v6889_v29  ;;  %3824 = vmatprep.subr.bf16.mxu1 %v6890_v37  ;;  %v6947_v37 = vsub.s32 2, %v5767_v57 }
 0x17c   :  { %3762 = vmatpush1.bf16.msra.mxu0 %v6891_v21  ;;  %3826 = vmatpush1.bf16.msra.mxu1 %v6892_v28 }
 0x17d   :  { %3764 = vmatprep.subr.bf16.mxu0 %v6893_v13  ;;  %3828 = vmatprep.subr.bf16.mxu1 %v6894_v45  ;;  %v6904_v13 = vld [vmem:[#allocation29_spill] sm:$0xff]  ;;  %v6905_v45 = vld [vmem:[#allocation30_spill] sm:$0xff] }
 0x180   :  { %3766 = vmatpush1.bf16.msra.mxu0 %v6895_v11  ;;  %3830 = vmatpush1.bf16.msra.mxu1 %v6896_v51  ;;  %v6906_v11 = vld [vmem:[#allocation31_spill] sm:$0xff]  ;;  %v6907_v51 = vld [vmem:[#allocation32_spill] sm:$0xff] }
 0x181   :  { %3768 = vmatprep.subr.bf16.mxu0 %v6897_v56  ;;  %3832 = vmatprep.subr.bf16.mxu1 %v6898_v42  ;;  %v6908_v56 = vld [vmem:[#allocation33_spill] sm:$0xff]  ;;  %v6909_v42 = vld [vmem:[#allocation34_spill] sm:$0xff] }
 0x184   :  { %3770 = vmatpush1.bf16.msra.mxu0 %v6899_v43  ;;  %3834 = vmatpush1.bf16.msra.mxu1 %v6900_v6  ;;  %v6910_v43 = vld [vmem:[#allocation35_spill] sm:$0xff]  ;;  %v6911_v6 = vld [vmem:[#allocation36_spill] sm:$0xff] }
 0x185   :  { %3772 = vmatprep.subr.bf16.mxu0 %v6901_v1  ;;  %3836 = vmatprep.subr.bf16.mxu1 %v6902_v24  ;;  %v6912_v1 = vld [vmem:[#allocation37_spill] sm:$0xff]  ;;  %v6913_v24 = vld [vmem:[#allocation38_spill] sm:$0xff] }
 0x188   :  { %3774 = vmatpush1.bf16.msra.mxu0 %v6903_v62  ;;  %3838 = vmatpush1.bf16.msra.mxu1 %v6904_v13  ;;  %v6914_v62 = vld [vmem:[#allocation39_spill] sm:$0xff]  ;;  %v6915_v13 = vld [vmem:[#allocation40_spill] sm:$0xff] }
 0x189   :  { %3776 = vmatprep.subr.bf16.mxu0 %v6905_v45  ;;  %3840 = vmatprep.subr.bf16.mxu1 %v6906_v11  ;;  %v6916_v45 = vld [vmem:[#allocation41_spill] sm:$0xff]  ;;  %v6917_v11 = vld [vmem:[#allocation42_spill] sm:$0xff] }
 0x18c   :  { %3778 = vmatpush1.bf16.msra.mxu0 %v6907_v51  ;;  %3842 = vmatpush1.bf16.msra.mxu1 %v6908_v56  ;;  %v6918_v51 = vld [vmem:[#allocation43_spill] sm:$0xff]  ;;  %v6919_v56 = vld [vmem:[#allocation44_spill] sm:$0xff] }
 0x18d   :  { %3780 = vmatprep.subr.bf16.mxu0 %v6909_v42  ;;  %3844 = vmatprep.subr.bf16.mxu1 %v6910_v43  ;;  %v6920_v42 = vld [vmem:[#allocation45_spill] sm:$0xff]  ;;  %v6921_v43 = vld [vmem:[#allocation46_spill] sm:$0xff] }
 0x190   :  { %3782 = vmatpush1.bf16.msra.mxu0 %v6911_v6  ;;  %3846 = vmatpush1.bf16.msra.mxu1 %v6912_v1  ;;  %v6922_v6 = vld [vmem:[#allocation47_spill] sm:$0xff]  ;;  %v6923_v1 = vld [vmem:[#allocation48_spill] sm:$0xff] }
 0x191   :  { %3784 = vmatprep.subr.bf16.mxu0 %v6913_v24  ;;  %3848 = vmatprep.subr.bf16.mxu1 %v6914_v62  ;;  %v6924_v24 = vld [vmem:[#allocation49_spill] sm:$0xff]  ;;  %v6925_v62 = vld [vmem:[#allocation50_spill] sm:$0xff] }
 0x194   :  { %3786 = vmatpush1.bf16.msra.mxu0 %v6915_v13  ;;  %3850 = vmatpush1.bf16.msra.mxu1 %v6916_v45  ;;  %v6926_v13 = vld [vmem:[#allocation51_spill] sm:$0xff]  ;;  %v6927_v45 = vld [vmem:[#allocation52_spill] sm:$0xff] }
 0x195   :  { %3788 = vmatprep.subr.bf16.mxu0 %v6917_v11  ;;  %3852 = vmatprep.subr.bf16.mxu1 %v6918_v51  ;;  %v6928_v11 = vld [vmem:[#allocation53_spill] sm:$0xff]  ;;  %v6929_v51 = vld [vmem:[#allocation54_spill] sm:$0xff] }
 0x198   :  { %3790 = vmatpush1.bf16.msra.mxu0 %v6919_v56  ;;  %3854 = vmatpush1.bf16.msra.mxu1 %v6920_v42  ;;  %v6930_v56 = vld [vmem:[#allocation55_spill] sm:$0xff]  ;;  %v6931_v42 = vld [vmem:[#allocation56_spill] sm:$0xff] }
 0x199   :  { %3792 = vmatprep.subr.bf16.mxu0 %v6921_v43  ;;  %3856 = vmatprep.subr.bf16.mxu1 %v6922_v6  ;;  %v6932_v43 = vld [vmem:[#allocation57_spill] sm:$0xff]  ;;  %v6933_v6 = vld [vmem:[#allocation58_spill] sm:$0xff] }
 0x19c   :  { %3794 = vmatpush1.bf16.msra.mxu0 %v6923_v1  ;;  %3858 = vmatpush1.bf16.msra.mxu1 %v6924_v24  ;;  %v6934_v1 = vld [vmem:[#allocation59_spill] sm:$0xff]  ;;  %v6935_v24 = vld [vmem:[#allocation60_spill] sm:$0xff] }
 0x19d   :  { %3796 = vmatprep.subr.bf16.mxu0 %v6925_v62  ;;  %3860 = vmatprep.subr.bf16.mxu1 %v6926_v13  ;;  %v6936_v62 = vld [vmem:[#allocation61_spill] sm:$0xff]  ;;  %v6937_v13 = vld [vmem:[#allocation62_spill] sm:$0xff] }
 0x1a0   :  { %3798 = vmatpush1.bf16.msra.mxu0 %v6927_v45  ;;  %3862 = vmatpush1.bf16.msra.mxu1 %v6928_v11  ;;  %v6938_v45 = vld [vmem:[#allocation63_spill] sm:$0xff]  ;;  %v6939_v11 = vld [vmem:[#allocation64_spill] sm:$0xff] }
 0x1a1   :  { %3800 = vmatprep.subr.bf16.mxu0 %v6929_v51  ;;  %3864 = vmatprep.subr.bf16.mxu1 %v6930_v56  ;;  %v6940_v51 = vld [vmem:[#allocation65_spill] sm:$0xff] }
 0x1a2   :  { %v6941_v56 = vld [vmem:[#allocation9_spill] sm:$0xff] }
 0x1a4   :  { %3802 = vmatpush1.bf16.msra.mxu0 %v6931_v42  ;;  %3866 = vmatpush1.bf16.msra.mxu1 %v6932_v43  ;;  %v6942_v42 = vld [vmem:[#allocation10_spill] sm:$0xff] }
 0x1a5   :  { %3804 = vmatprep.subr.bf16.mxu0 %v6933_v6  ;;  %3868 = vmatprep.subr.bf16.mxu1 %v6934_v1  ;;  %v440_v1 = vld [vmem:[%s6680_s5] sm:$0xf] }
 0x1a6   :  { %v5920_v29 = vrot.slane %v440_v1, %v6947_v37 }
 0x1a8   :  { %3806 = vmatpush1.bf16.msra.mxu0 %v6935_v24  ;;  %3870 = vmatpush1.bf16.msra.mxu1 %v6936_v62  ;;  %v6943_v24 = vsub.s32 0, %v5767_v57  ;;  %6948 = vst [vmem:[#allocation73_spill] sm:$0xff] %v5920_v29 }
 0x1a9   :  { %3808 = vmatprep.subr.bf16.mxu0 %v6937_v13  ;;  %3872 = vmatprep.subr.bf16.mxu1 %v6938_v45  ;;  %v6945_v13 = vsub.s32 1, %v5767_v57 }
 0x1aa   :  { %v5910_v6 = vrot.slane %v440_v1, %v6943_v24  ;;  %v6949_v24 = vsub.s32 3, %v5767_v57 }
 0x1ab   :  { %v5914_v62 = vrot.slane %v440_v1, %v6945_v13 }
 0x1ac   :  { %3810 = vmatpush1.bf16.msra.mxu0 %v6939_v11  ;;  %3874 = vmatpush1.bf16.msra.mxu1 %v6940_v51  ;;  %6944 = vst [vmem:[#allocation71_spill] sm:$0xff] %v5910_v6  ;;  %v5924_v13 = vrot.slane %v440_v1, %v6949_v24 }
 0x1ad   :  { %3876 = vmatprep.subr.bf16.mxu0 %v6941_v56  ;;  %3908 = vmatprep.subr.bf16.mxu1 %v6942_v42  ;;  %6946 = vst [vmem:[#allocation72_spill] sm:$0xff] %v5914_v62 }
 0x1ae   :  { %6950 = vst [vmem:[#allocation74_spill] sm:$0xff] %v5924_v13 }
 0x222   :  { %v698_v45 = vpop.f32.mrb[2].mxu0  ;;  %v769_v11 = vpop.f32.mrb[10].mxu1 }
 0x223   :  { %v699_v51 = vadd.f32 %v698_v45, %v5910_v6  ;;  %v700_v43 = vpop.f32.mrb[3].mxu0  ;;  %v771_v56 = vpop.f32.mrb[11].mxu1  ;;  %v770_v53 = vadd.f32 %v769_v11, %v5920_v29 }
 0x224   :  { %v701_v42 = vadd.f32 %v700_v43, %v5914_v62  ;;  %v772_v45 = vadd.f32 %v771_v56, %v5924_v13 }
 0x225   :  { %v3393_v28 = vmul.f32 -1.442695, %v699_v51  ;;  %v3395_v6 = vmul.f32 -1.442695, %v770_v53 }
 0x226   :  { %v3394_v21 = vmul.f32 -1.442695, %v701_v42 }
 0x227   :  { %5074 = vpow2.f32 %v3393_v28 }
 0x228   :  { %5076 = vpow2.f32 %v3394_v21 }
 0x229   :  { %5078 = vtanh.f32 %v772_v45 }
 0x22a   :  { %5080 = vpow2.f32 %v3395_v6 }
 0x231   :  { %v5075_v2 = vpop.eup %5074 }
 0x232   :  { %v783_v55 = vadd.f32 1.0, %v5075_v2  ;;  %v5077_v51 = vpop.eup %5076 }
 0x233   :  { %v784_v42 = vadd.f32 1.0, %v5077_v51  ;;  %v5079_v37 = vpop.eup %5078 }
 0x234   :  { %5082 = vrcp.f32 %v783_v55  ;;  %v5081_v28 = vpop.eup %5080 }
 0x235   :  { %5084 = vrcp.f32 %v784_v42  ;;  %v785_v1 = vadd.f32 1.0, %v5081_v28 }
 0x237   :  { %5086 = vrcp.f32 %v785_v1 }
 0x23e   :  { %v5083_v21 = vpop.eup %5082 }
 0x23f   :  { %v794_v43 = vmul.f32 %v5083_v21, %v5079_v37  ;;  %v5085_v57 = vpop.eup %5084 }
 0x240   :  { %v793_v24 = vmul.f32 0.0, %v5085_v57 }
 0x242   :  { %v864_v62 = vpop.f32.mrb[4].mxu0  ;;  %v935_v11 = vpop.f32.mrb[12].mxu1  ;;  %v5928_v29 = vadd.f32 %v794_v43, %v793_v24 }
 0x243   :  { %v944_v53 = vrot.slane %v864_v62, 6  ;;  %v866_v56 = vpop.f32.mrb[5].mxu0  ;;  %v937_v2 = vpop.f32.mrb[13].mxu1  ;;  %v946_v37 = vrot.slane %v935_v11, 6 }
 0x244   :  { %6951 = vst [vmem:[#allocation75_spill] sm:$0xff] %v5928_v29  ;;  %v945_v45 = vrot.slane %v866_v56, 6  ;;  %5088 = vtanh.f32 %v5928_v29  ;;  %v947_v28 = vrot.slane %v937_v2, 6  ;;  %v5087_v43 = vpop.eup %5086 }
 0x245   :  { %v952_v55 = vadd.f32 %v944_v53, %v5792_v30  ;;  %v954_v21 = vadd.f32 %v946_v37, %v5798_v18 }
 0x246   :  { %v953_v6 = vadd.f32 %v945_v45, %v5794_v3  ;;  %v955_v57 = vadd.f32 %v947_v28, %v5801_v4 }
 0x247   :  { %v3396_v51 = vmul.f32 -1.442695, %v952_v55  ;;  %v3398_v24 = vmul.f32 -1.442695, %v954_v21 }
 0x248   :  { %v3397_v42 = vmul.f32 -1.442695, %v953_v6 }
 0x249   :  { %5090 = vpow2.f32 %v3396_v51  ;;  %v976_v51 = vrot.slane %v5804_v19, 6  ;;  %v6952_v19 = vld [vmem:[#allocation11_spill] sm:$0xff] }
 0x24a   :  { %5092 = vpow2.f32 %v3397_v42 }
 0x24b   :  { %5094 = vtanh.f32 %v955_v57 }
 0x24c   :  { %5096 = vpow2.f32 %v3398_v24  ;;  %v6954_v24 = vld [vmem:[#allocation13_spill] sm:$0xff] }
 0x24e   :  { %v5089_v62 = vpop.eup %5088 }
 0x24f   :  { %v797_v1 = vmul.f32 %v5089_v62, %v5087_v43 }
 0x251   :  { %v984_v56 = vrot.slane %v797_v1, 6 }
 0x253   :  { %v5091_v53 = vpop.eup %5090  ;;  %v987_v29 = vrot.slane %v984_v56, 2  ;;  %v6955_v56 = vld [vmem:[#allocation14_spill] sm:$0xff] }
 0x254   :  { %v965_v30 = vadd.f32 1.0, %v5091_v53  ;;  %v5093_v45 = vpop.eup %5092  ;;  %v6956_v53 = vld [vmem:[#allocation15_spill] sm:$0xff] }
 0x255   :  { %v966_v55 = vadd.f32 1.0, %v5093_v45  ;;  %1054 = vmatprep.mubr.f32.mxu0 %v987_v29  ;;  %1125 = vmatprep.mubr.f32.mxu1 %v987_v29  ;;  %v5095_v11 = vpop.eup %5094  ;;  %v6953_v29 = vld [vmem:[#allocation12_spill] sm:$0xff] }
 0x256   :  { %5098 = vrcp.f32 %v965_v30  ;;  %v5097_v2 = vpop.eup %5096  ;;  %v6957_v45 = vld [vmem:[#allocation16_spill] sm:$0xff] }
 0x257   :  { %5100 = vrcp.f32 %v966_v55  ;;  %v967_v28 = vadd.f32 1.0, %v5097_v2  ;;  %v6958_v55 = vld [vmem:[#allocation17_spill] sm:$0xff]  ;;  %v6960_v2 = vld [vmem:[#allocation19_spill] sm:$0xff] }
 0x259   :  { %5102 = vrcp.f32 %v967_v28  ;;  %v6965_v28 = vld [vmem:[#allocation24_spill] sm:$0xff] }
 0x260   :  { %v5099_v6 = vpop.eup %5098 }
 0x261   :  { %v979_v42 = vmul.f32 %v5099_v6, %v5095_v11  ;;  %v5101_v37 = vpop.eup %5100  ;;  %v6959_v11 = vld [vmem:[#allocation18_spill] sm:$0xff]  ;;  %v6961_v6 = vld [vmem:[#allocation20_spill] sm:$0xff] }
 0x262   :  { %v978_v21 = vmul.f32 %v5101_v37, %v976_v51  ;;  %v6962_v51 = vld [vmem:[#allocation21_spill] sm:$0xff]  ;;  %v6964_v37 = vld [vmem:[#allocation23_spill] sm:$0xff] }
 0x263   :  { %v5103_v62 = vpop.eup %5102 }
 0x264   :  { %v5936_v43 = vadd.f32 %v979_v42, %v978_v21  ;;  %v6963_v42 = vld [vmem:[#allocation22_spill] sm:$0xff]  ;;  %v6966_v21 = vld [vmem:[#allocation25_spill] sm:$0xff] }
 0x266   :  { %5104 = vtanh.f32 %v5936_v43 }
 0x270   :  { %v5105_v30 = vpop.eup %5104 }
 0x271   :  { %v982_v57 = vmul.f32 %v5105_v30, %v5103_v62  ;;  %v6967_v62 = vld [vmem:[#allocation26_spill] sm:$0xff]  ;;  %v6968_v30 = vld [vmem:[#allocation27_spill] sm:$0xff] }
 0x273   :  { %v986_v1 = vrot.slane %v982_v57, 2  ;;  %v6969_v57 = vld [vmem:[#allocation28_spill] sm:$0xff] }
 0x275   :  { %1055 = vmatmul.mubr.f32.vlgmr.msra.gmra.mrb[6].mxu0 %v986_v1  ;;  %1126 = vmatmul.mubr.f32.vlgmr.msra.gmra.mrb[14].mxu1 %v986_v1 }
 0x276   :  { %3878 = vmatpush1.bf16.msra.mxu0 %v5460_v12  ;;  %3910 = vmatpush1.bf16.msra.mxu1 %v5484_v32 }
 0x277   :  { %3880 = vmatprep.subr.bf16.mxu0 %v5467_v16  ;;  %3912 = vmatprep.subr.bf16.mxu1 %v5489_v36 }
 0x278   :  { %1220 = vmatprep.mubr.f32.mxu0 %v6887_v8  ;;  %1291 = vmatprep.mubr.f32.mxu1 %v6887_v8 }
 0x27a   :  { %3882 = vmatpush1.bf16.msra.mxu0 %v5473_v20  ;;  %3914 = vmatpush1.bf16.msra.mxu1 %v5496_v46 }
 0x27b   :  { %3884 = vmatprep.subr.bf16.mxu0 %v5478_v25  ;;  %3916 = vmatprep.subr.bf16.mxu1 %v5503_v48 }
 0x27e   :  { %3886 = vmatpush1.bf16.msra.mxu0 %v5487_v35  ;;  %3918 = vmatpush1.bf16.msra.mxu1 %v5511_v58 }
 0x27f   :  { %3888 = vmatprep.subr.bf16.mxu0 %v5492_v40  ;;  %3920 = vmatprep.subr.bf16.mxu1 %v5518_v60 }
 0x282   :  { %3890 = vmatpush1.bf16.msra.mxu0 %v5501_v47  ;;  %3922 = vmatpush1.bf16.msra.mxu1 %v5524_v7 }
 0x283   :  { %3892 = vmatprep.subr.bf16.mxu0 %v5506_v52  ;;  %3924 = vmatprep.subr.bf16.mxu1 %v5530_v10 }
 0x286   :  { %3894 = vmatpush1.bf16.msra.mxu0 %v5516_v59  ;;  %3926 = vmatpush1.bf16.msra.mxu1 %v5536_v23 }
 0x287   :  { %3896 = vmatprep.subr.bf16.mxu0 %v5521_v0  ;;  %3928 = vmatprep.subr.bf16.mxu1 %v5542_v27 }
 0x28a   :  { %3898 = vmatpush1.bf16.msra.mxu0 %v5528_v9  ;;  %3930 = vmatpush1.bf16.msra.mxu1 %v5548_v38 }
 0x28b   :  { %3900 = vmatprep.subr.bf16.mxu0 %v5533_v15  ;;  %3932 = vmatprep.subr.bf16.mxu1 %v5554_v41 }
 0x28e   :  { %3902 = vmatpush1.bf16.msra.mxu0 %v5540_v26  ;;  %3934 = vmatpush1.bf16.msra.mxu1 %v5558_v49 }
 0x28f   :  { %3904 = vmatprep.subr.bf16.mxu0 %v5545_v31  ;;  %3936 = vmatprep.subr.bf16.mxu1 %v5562_v50 }
 0x292   :  { %3906 = vmatpush1.bf16.msra.mxu0 %v5552_v39  ;;  %3938 = vmatpush1.bf16.msra.mxu1 %v5566_v54 }
 0x293   :  { %3940 = vmatprep.subr.bf16.mxu0 %v5573_v61  ;;  %4004 = vmatprep.subr.bf16.mxu1 %v5575_v63 }
 0x295   :  { %1221 = vmatmul.mubr.f32.vlgmr.msra.gmra.mrb[8].mxu0 %v986_v1  ;;  %1292 = vmatmul.mubr.f32.vlgmr.msra.gmra.mrb[16].mxu1 %v986_v1  ;;  %v6970_v1 = vld [vmem:[#allocation29_spill] sm:$0xff] }
 0x296   :  { %3942 = vmatpush1.bf16.msra.mxu0 %v5579_v5  ;;  %4006 = vmatpush1.bf16.msra.mxu1 %v5581_v14 }
 0x297   :  { %3944 = vmatprep.subr.bf16.mxu0 %v5583_v17  ;;  %4008 = vmatprep.subr.bf16.mxu1 %v5586_v22 }
 0x29a   :  { %3946 = vmatpush1.bf16.msra.mxu0 %v5590_v33  ;;  %4010 = vmatpush1.bf16.msra.mxu1 %v5592_v34 }
 0x29b   :  { %3948 = vmatprep.subr.bf16.mxu0 %v5595_v44  ;;  %4012 = vmatprep.subr.bf16.mxu1 %v6952_v19 }
 0x29e   :  { %3950 = vmatpush1.bf16.msra.mxu0 %v6953_v29  ;;  %4014 = vmatpush1.bf16.msra.mxu1 %v6954_v24 }
 0x29f   :  { %3952 = vmatprep.subr.bf16.mxu0 %v6955_v56  ;;  %4016 = vmatprep.subr.bf16.mxu1 %v6956_v53 }
 0x2a2   :  { %3954 = vmatpush1.bf16.msra.mxu0 %v6957_v45  ;;  %4018 = vmatpush1.bf16.msra.mxu1 %v6958_v55  ;;  %v7010_v45 = vld [vmem:[#allocation72_spill] sm:$0xff] }
 0x2a3   :  { %3956 = vmatprep.subr.bf16.mxu0 %v6959_v11  ;;  %4020 = vmatprep.subr.bf16.mxu1 %v6960_v2  ;;  %v6971_v2 = vld [vmem:[#allocation30_spill] sm:$0xff]  ;;  %v7009_v11 = vld [vmem:[#allocation71_spill] sm:$0xff] }
 0x2a6   :  { %3958 = vmatpush1.bf16.msra.mxu0 %v6961_v6  ;;  %4022 = vmatpush1.bf16.msra.mxu1 %v6962_v51  ;;  %v6972_v6 = vld [vmem:[#allocation31_spill] sm:$0xff]  ;;  %v6973_v51 = vld [vmem:[#allocation32_spill] sm:$0xff] }
 0x2a7   :  { %3960 = vmatprep.subr.bf16.mxu0 %v6963_v42  ;;  %4024 = vmatprep.subr.bf16.mxu1 %v6964_v37  ;;  %v6974_v42 = vld [vmem:[#allocation33_spill] sm:$0xff]  ;;  %v6975_v37 = vld [vmem:[#allocation34_spill] sm:$0xff] }
 0x2aa   :  { %3962 = vmatpush1.bf16.msra.mxu0 %v6965_v28  ;;  %4026 = vmatpush1.bf16.msra.mxu1 %v6966_v21  ;;  %v6976_v28 = vld [vmem:[#allocation35_spill] sm:$0xff]  ;;  %v6977_v21 = vld [vmem:[#allocation36_spill] sm:$0xff] }
 0x2ab   :  { %3964 = vmatprep.subr.bf16.mxu0 %v6967_v62  ;;  %4028 = vmatprep.subr.bf16.mxu1 %v6968_v30  ;;  %v6978_v62 = vld [vmem:[#allocation37_spill] sm:$0xff]  ;;  %v6979_v30 = vld [vmem:[#allocation38_spill] sm:$0xff] }
 0x2ae   :  { %3966 = vmatpush1.bf16.msra.mxu0 %v6969_v57  ;;  %4030 = vmatpush1.bf16.msra.mxu1 %v6970_v1  ;;  %v6980_v57 = vld [vmem:[#allocation39_spill] sm:$0xff]  ;;  %v6981_v1 = vld [vmem:[#allocation40_spill] sm:$0xff] }
 0x2af   :  { %3968 = vmatprep.subr.bf16.mxu0 %v6971_v2  ;;  %4032 = vmatprep.subr.bf16.mxu1 %v6972_v6  ;;  %v6982_v2 = vld [vmem:[#allocation41_spill] sm:$0xff]  ;;  %v6983_v6 = vld [vmem:[#allocation42_spill] sm:$0xff] }
 0x2b2   :  { %3970 = vmatpush1.bf16.msra.mxu0 %v6973_v51  ;;  %4034 = vmatpush1.bf16.msra.mxu1 %v6974_v42  ;;  %v6984_v51 = vld [vmem:[#allocation43_spill] sm:$0xff]  ;;  %v6985_v42 = vld [vmem:[#allocation44_spill] sm:$0xff] }
 0x2b3   :  { %3972 = vmatprep.subr.bf16.mxu0 %v6975_v37  ;;  %4036 = vmatprep.subr.bf16.mxu1 %v6976_v28  ;;  %v6986_v37 = vld [vmem:[#allocation45_spill] sm:$0xff]  ;;  %v6987_v28 = vld [vmem:[#allocation46_spill] sm:$0xff] }
 0x2b6   :  { %3974 = vmatpush1.bf16.msra.mxu0 %v6977_v21  ;;  %4038 = vmatpush1.bf16.msra.mxu1 %v6978_v62  ;;  %v6988_v21 = vld [vmem:[#allocation47_spill] sm:$0xff]  ;;  %v6989_v62 = vld [vmem:[#allocation48_spill] sm:$0xff] }
 0x2b7   :  { %3976 = vmatprep.subr.bf16.mxu0 %v6979_v30  ;;  %4040 = vmatprep.subr.bf16.mxu1 %v6980_v57  ;;  %v6990_v30 = vld [vmem:[#allocation49_spill] sm:$0xff]  ;;  %v6991_v57 = vld [vmem:[#allocation50_spill] sm:$0xff] }
 0x2ba   :  { %3978 = vmatpush1.bf16.msra.mxu0 %v6981_v1  ;;  %4042 = vmatpush1.bf16.msra.mxu1 %v6982_v2  ;;  %v6992_v1 = vld [vmem:[#allocation51_spill] sm:$0xff]  ;;  %v6993_v2 = vld [vmem:[#allocation52_spill] sm:$0xff] }
 0x2bb   :  { %3980 = vmatprep.subr.bf16.mxu0 %v6983_v6  ;;  %4044 = vmatprep.subr.bf16.mxu1 %v6984_v51  ;;  %v6994_v6 = vld [vmem:[#allocation53_spill] sm:$0xff]  ;;  %v6995_v51 = vld [vmem:[#allocation54_spill] sm:$0xff] }
 0x2be   :  { %3982 = vmatpush1.bf16.msra.mxu0 %v6985_v42  ;;  %4046 = vmatpush1.bf16.msra.mxu1 %v6986_v37  ;;  %v6996_v42 = vld [vmem:[#allocation55_spill] sm:$0xff]  ;;  %v6997_v37 = vld [vmem:[#allocation56_spill] sm:$0xff] }
 0x2bf   :  { %3984 = vmatprep.subr.bf16.mxu0 %v6987_v28  ;;  %4048 = vmatprep.subr.bf16.mxu1 %v6988_v21  ;;  %v6998_v28 = vld [vmem:[#allocation57_spill] sm:$0xff]  ;;  %v6999_v21 = vld [vmem:[#allocation58_spill] sm:$0xff] }
 0x2c2   :  { %3986 = vmatpush1.bf16.msra.mxu0 %v6989_v62  ;;  %4050 = vmatpush1.bf16.msra.mxu1 %v6990_v30  ;;  %v7000_v62 = vld [vmem:[#allocation59_spill] sm:$0xff]  ;;  %v7001_v30 = vld [vmem:[#allocation60_spill] sm:$0xff] }
 0x2c3   :  { %3988 = vmatprep.subr.bf16.mxu0 %v6991_v57  ;;  %4052 = vmatprep.subr.bf16.mxu1 %v6992_v1  ;;  %v7002_v57 = vld [vmem:[#allocation61_spill] sm:$0xff]  ;;  %v7003_v1 = vld [vmem:[#allocation62_spill] sm:$0xff] }
 0x2c6   :  { %3990 = vmatpush1.bf16.msra.mxu0 %v6993_v2  ;;  %4054 = vmatpush1.bf16.msra.mxu1 %v6994_v6  ;;  %v7004_v2 = vld [vmem:[#allocation63_spill] sm:$0xff]  ;;  %v7005_v6 = vld [vmem:[#allocation64_spill] sm:$0xff] }
 0x2c7   :  { %3992 = vmatprep.subr.bf16.mxu0 %v6995_v51  ;;  %4056 = vmatprep.subr.bf16.mxu1 %v6996_v42  ;;  %v7006_v51 = vld [vmem:[#allocation65_spill] sm:$0xff] }
 0x2c8   :  { %v7007_v42 = vld [vmem:[#allocation9_spill] sm:$0xff] }
 0x2ca   :  { %3994 = vmatpush1.bf16.msra.mxu0 %v6997_v37  ;;  %4058 = vmatpush1.bf16.msra.mxu1 %v6998_v28  ;;  %v7008_v37 = vld [vmem:[#allocation10_spill] sm:$0xff] }
 0x2cb   :  { %3996 = vmatprep.subr.bf16.mxu0 %v6999_v21  ;;  %4060 = vmatprep.subr.bf16.mxu1 %v7000_v62 }
 0x2ce   :  { %3998 = vmatpush1.bf16.msra.mxu0 %v7001_v30  ;;  %4062 = vmatpush1.bf16.msra.mxu1 %v7002_v57 }
 0x2cf   :  { %4000 = vmatprep.subr.bf16.mxu0 %v7003_v1  ;;  %4064 = vmatprep.subr.bf16.mxu1 %v7004_v2  ;;  %v7011_v2 = vld [vmem:[#allocation73_spill] sm:$0xff] }
 0x2d2   :  { %4002 = vmatpush1.bf16.msra.mxu0 %v7005_v6  ;;  %4066 = vmatpush1.bf16.msra.mxu1 %v7006_v51 }
 0x2d3   :  { %4068 = vmatprep.subr.bf16.mxu0 %v7007_v42  ;;  %4100 = vmatprep.subr.bf16.mxu1 %v7008_v37 }
 0x348   :  { %v1056_v28 = vpop.f32.mrb[6].mxu0  ;;  %v1127_v21 = vpop.f32.mrb[14].mxu1 }
 0x349   :  { %v1057_v62 = vadd.f32 %v1056_v28, %v7009_v11  ;;  %v1058_v55 = vpop.f32.mrb[7].mxu0  ;;  %v1129_v30 = vpop.f32.mrb[15].mxu1  ;;  %v1128_v6 = vadd.f32 %v1127_v21, %v7011_v2 }
 0x34a   :  { %v1059_v57 = vadd.f32 %v1058_v55, %v7010_v45  ;;  %v1130_v51 = vadd.f32 %v1129_v30, %v5924_v13 }
 0x34b   :  { %v3399_v53 = vmul.f32 -1.442695, %v1057_v62  ;;  %v3401_v56 = vmul.f32 -1.442695, %v1128_v6 }
 0x34c   :  { %v3400_v1 = vmul.f32 -1.442695, %v1059_v57 }
 0x34d   :  { %5106 = vpow2.f32 %v3399_v53 }
 0x34e   :  { %5108 = vpow2.f32 %v3400_v1  ;;  %v7012_v1 = vld [vmem:[#allocation75_spill] sm:$0xff] }
 0x34f   :  { %5110 = vtanh.f32 %v1130_v51 }
 0x350   :  { %5112 = vpow2.f32 %v3401_v56 }
 0x357   :  { %v5107_v42 = vpop.eup %5106 }
 0x358   :  { %v1141_v24 = vadd.f32 1.0, %v5107_v42  ;;  %v5109_v37 = vpop.eup %5108 }
 0x359   :  { %v1142_v28 = vadd.f32 1.0, %v5109_v37  ;;  %v5111_v11 = vpop.eup %5110 }
 0x35a   :  { %5114 = vrcp.f32 %v1141_v24  ;;  %v5113_v29 = vpop.eup %5112  ;;  %v7014_v24 = vld [vmem:[#allocation70_spill] sm:$0xff] }
 0x35b   :  { %5116 = vrcp.f32 %v1142_v28  ;;  %v1143_v53 = vadd.f32 1.0, %v5113_v29 }
 0x35d   :  { %5118 = vrcp.f32 %v1143_v53 }
 0x364   :  { %v5115_v55 = vpop.eup %5114 }
 0x365   :  { %v1152_v62 = vmul.f32 %v5115_v55, %v5111_v11  ;;  %v5117_v57 = vpop.eup %5116 }
 0x366   :  { %v1151_v45 = vmul.f32 %v5117_v57, %v7012_v1 }
 0x368   :  { %v1222_v21 = vpop.f32.mrb[8].mxu0  ;;  %v1293_v2 = vpop.f32.mrb[16].mxu1  ;;  %v6042_v30 = vadd.f32 %v1152_v62, %v1151_v45 }
 0x369   :  { %v1302_v6 = vrot.slane %v1222_v21, 4  ;;  %v1224_v42 = vpop.f32.mrb[9].mxu0  ;;  %v1295_v51 = vpop.f32.mrb[17].mxu1  ;;  %v1304_v29 = vrot.slane %v1293_v2, 4 }
 0x36a   :  { %7013 = vst [vmem:[#allocation11_spill] sm:$0xff] %v6042_v30  ;;  %v1303_v56 = vrot.slane %v1224_v42, 4  ;;  %5120 = vtanh.f32 %v6042_v30  ;;  %v1305_v57 = vrot.slane %v1295_v51, 4  ;;  %v5119_v62 = vpop.eup %5118 }
 0x36b   :  { %v1310_v37 = vadd.f32 %v1302_v6, %v7014_v24  ;;  %v1312_v45 = vadd.f32 %v1304_v29, %v5798_v18 }
 0x36c   :  { %v1311_v28 = vadd.f32 %v1303_v56, %v5794_v3  ;;  %v1313_v21 = vadd.f32 %v1305_v57, %v5801_v4 }
 0x36d   :  { %v3402_v11 = vmul.f32 -1.442695, %v1310_v37  ;;  %v3404_v42 = vmul.f32 -1.442695, %v1312_v45 }
 0x36e   :  { %v3403_v55 = vmul.f32 -1.442695, %v1311_v28 }
 0x36f   :  { %5122 = vpow2.f32 %v3402_v11  ;;  %v1334_v11 = vrot.slane %v5936_v43, 6  ;;  %v7015_v43 = vld [vmem:[#allocation12_spill] sm:$0xff] }
 0x370   :  { %5124 = vpow2.f32 %v3403_v55 }
 0x371   :  { %5126 = vtanh.f32 %v1313_v21 }
 0x372   :  { %5128 = vpow2.f32 %v3404_v42  ;;  %v7018_v42 = vld [vmem:[#allocation15_spill] sm:$0xff] }
 0x374   :  { %v5121_v1 = vpop.eup %5120 }
 0x375   :  { %v1155_v53 = vmul.f32 %v5121_v1, %v5119_v62 }
 0x377   :  { %v1342_v13 = vrot.slane %v1155_v53, 4  ;;  %v7017_v53 = vld [vmem:[#allocation14_spill] sm:$0xff] }
 0x379   :  { %v5123_v6 = vpop.eup %5122  ;;  %v1345_v30 = vrot.slane %v1342_v13, 4 }
 0x37a   :  { %v1323_v24 = vadd.f32 1.0, %v5123_v6  ;;  %v5125_v56 = vpop.eup %5124  ;;  %v7019_v6 = vld [vmem:[#allocation16_spill] sm:$0xff] }
 0x37b   :  { %v1324_v37 = vadd.f32 1.0, %v5125_v56  ;;  %1412 = vmatprep.mubr.f32.mxu0 %v1345_v30  ;;  %1483 = vmatprep.mubr.f32.mxu1 %v1345_v30  ;;  %v5127_v2 = vpop.eup %5126  ;;  %v7016_v30 = vld [vmem:[#allocation13_spill] sm:$0xff] }
 0x37c   :  { %5130 = vrcp.f32 %v1323_v24  ;;  %v5129_v51 = vpop.eup %5128  ;;  %v7020_v56 = vld [vmem:[#allocation17_spill] sm:$0xff] }
 0x37d   :  { %5132 = vrcp.f32 %v1324_v37  ;;  %v1325_v57 = vadd.f32 1.0, %v5129_v51  ;;  %v7021_v37 = vld [vmem:[#allocation18_spill] sm:$0xff]  ;;  %v7023_v51 = vld [vmem:[#allocation20_spill] sm:$0xff] }
 0x37f   :  { %5134 = vrcp.f32 %v1325_v57  ;;  %v7028_v57 = vld [vmem:[#allocation25_spill] sm:$0xff] }
 0x386   :  { %v5131_v28 = vpop.eup %5130 }
 0x387   :  { %v1337_v55 = vmul.f32 %v5131_v28, %v5127_v2  ;;  %v5133_v29 = vpop.eup %5132  ;;  %v7022_v2 = vld [vmem:[#allocation19_spill] sm:$0xff]  ;;  %v7024_v28 = vld [vmem:[#allocation21_spill] sm:$0xff] }
 0x388   :  { %v1336_v45 = vmul.f32 %v5133_v29, %v1334_v11  ;;  %v7025_v11 = vld [vmem:[#allocation22_spill] sm:$0xff]  ;;  %v7027_v29 = vld [vmem:[#allocation24_spill] sm:$0xff] }
 0x389   :  { %v5135_v13 = vpop.eup %5134 }
 0x38a   :  { %v6050_v62 = vadd.f32 %v1337_v55, %v1336_v45  ;;  %v7026_v55 = vld [vmem:[#allocation23_spill] sm:$0xff]  ;;  %v7029_v45 = vld [vmem:[#allocation26_spill] sm:$0xff] }
 0x38c   :  { %5136 = vtanh.f32 %v6050_v62 }
 0x396   :  { %v5137_v24 = vpop.eup %5136 }
 0x397   :  { %v1340_v1 = vmul.f32 %v5137_v24, %v5135_v13  ;;  %v7030_v13 = vld [vmem:[#allocation27_spill] sm:$0xff]  ;;  %v7031_v24 = vld [vmem:[#allocation28_spill] sm:$0xff] }
 0x399   :  { %v1344_v21 = vrot.slane %v1340_v1, 4  ;;  %v7032_v1 = vld [vmem:[#allocation29_spill] sm:$0xff] }
 0x39b   :  { %1413 = vmatmul.mubr.f32.vlgmr.msra.gmra.mrb[10].mxu0 %v1344_v21  ;;  %1484 = vmatmul.mubr.f32.vlgmr.msra.gmra.mrb[18].mxu1 %v1344_v21 }
 0x39c   :  { %4070 = vmatpush1.bf16.msra.mxu0 %v5460_v12  ;;  %4102 = vmatpush1.bf16.msra.mxu1 %v5484_v32 }
 0x39d   :  { %4072 = vmatprep.subr.bf16.mxu0 %v5467_v16  ;;  %4104 = vmatprep.subr.bf16.mxu1 %v5489_v36 }
 0x39e   :  { %1578 = vmatprep.mubr.f32.mxu0 %v6887_v8  ;;  %1649 = vmatprep.mubr.f32.mxu1 %v6887_v8 }
 0x3a0   :  { %4074 = vmatpush1.bf16.msra.mxu0 %v5473_v20  ;;  %4106 = vmatpush1.bf16.msra.mxu1 %v5496_v46 }
 0x3a1   :  { %4076 = vmatprep.subr.bf16.mxu0 %v5478_v25  ;;  %4108 = vmatprep.subr.bf16.mxu1 %v5503_v48 }
 0x3a4   :  { %4078 = vmatpush1.bf16.msra.mxu0 %v5487_v35  ;;  %4110 = vmatpush1.bf16.msra.mxu1 %v5511_v58 }
 0x3a5   :  { %4080 = vmatprep.subr.bf16.mxu0 %v5492_v40  ;;  %4112 = vmatprep.subr.bf16.mxu1 %v5518_v60 }
 0x3a8   :  { %4082 = vmatpush1.bf16.msra.mxu0 %v5501_v47  ;;  %4114 = vmatpush1.bf16.msra.mxu1 %v5524_v7 }
 0x3a9   :  { %4084 = vmatprep.subr.bf16.mxu0 %v5506_v52  ;;  %4116 = vmatprep.subr.bf16.mxu1 %v5530_v10 }
 0x3ac   :  { %4086 = vmatpush1.bf16.msra.mxu0 %v5516_v59  ;;  %4118 = vmatpush1.bf16.msra.mxu1 %v5536_v23 }
 0x3ad   :  { %4088 = vmatprep.subr.bf16.mxu0 %v5521_v0  ;;  %4120 = vmatprep.subr.bf16.mxu1 %v5542_v27 }
 0x3b0   :  { %4090 = vmatpush1.bf16.msra.mxu0 %v5528_v9  ;;  %4122 = vmatpush1.bf16.msra.mxu1 %v5548_v38 }
 0x3b1   :  { %4092 = vmatprep.subr.bf16.mxu0 %v5533_v15  ;;  %4124 = vmatprep.subr.bf16.mxu1 %v5554_v41 }
 0x3b4   :  { %4094 = vmatpush1.bf16.msra.mxu0 %v5540_v26  ;;  %4126 = vmatpush1.bf16.msra.mxu1 %v5558_v49 }
 0x3b5   :  { %4096 = vmatprep.subr.bf16.mxu0 %v5545_v31  ;;  %4128 = vmatprep.subr.bf16.mxu1 %v5562_v50 }
 0x3b8   :  { %4098 = vmatpush1.bf16.msra.mxu0 %v5552_v39  ;;  %4130 = vmatpush1.bf16.msra.mxu1 %v5566_v54 }
 0x3b9   :  { %4132 = vmatprep.subr.bf16.mxu0 %v5573_v61  ;;  %4196 = vmatprep.subr.bf16.mxu1 %v5575_v63 }
 0x3bb   :  { %1579 = vmatmul.mubr.f32.vlgmr.msra.gmra.mrb[12].mxu0 %v1344_v21  ;;  %1650 = vmatmul.mubr.f32.vlgmr.msra.gmra.mrb[20].mxu1 %v1344_v21  ;;  %v7033_v21 = vld [vmem:[#allocation30_spill] sm:$0xff] }
 0x3bc   :  { %4134 = vmatpush1.bf16.msra.mxu0 %v5579_v5  ;;  %4198 = vmatpush1.bf16.msra.mxu1 %v5581_v14 }
 0x3bd   :  { %4136 = vmatprep.subr.bf16.mxu0 %v5583_v17  ;;  %4200 = vmatprep.subr.bf16.mxu1 %v5586_v22 }
 0x3c0   :  { %4138 = vmatpush1.bf16.msra.mxu0 %v5590_v33  ;;  %4202 = vmatpush1.bf16.msra.mxu1 %v5592_v34 }
 0x3c1   :  { %4140 = vmatprep.subr.bf16.mxu0 %v5595_v44  ;;  %4204 = vmatprep.subr.bf16.mxu1 %v6952_v19 }
 0x3c4   :  { %4142 = vmatpush1.bf16.msra.mxu0 %v7015_v43  ;;  %4206 = vmatpush1.bf16.msra.mxu1 %v7016_v30 }
 0x3c5   :  { %4144 = vmatprep.subr.bf16.mxu0 %v7017_v53  ;;  %4208 = vmatprep.subr.bf16.mxu1 %v7018_v42  ;;  %v7074_v42 = vld [vmem:[#allocation74_spill] sm:$0xff] }
 0x3c8   :  { %4146 = vmatpush1.bf16.msra.mxu0 %v7019_v6  ;;  %4210 = vmatpush1.bf16.msra.mxu1 %v7020_v56  ;;  %v7072_v56 = vld [vmem:[#allocation72_spill] sm:$0xff] }
 0x3c9   :  { %4148 = vmatprep.subr.bf16.mxu0 %v7021_v37  ;;  %4212 = vmatprep.subr.bf16.mxu1 %v7022_v2  ;;  %v7071_v2 = vld [vmem:[#allocation71_spill] sm:$0xff] }
 0x3cc   :  { %4150 = vmatpush1.bf16.msra.mxu0 %v7023_v51  ;;  %4214 = vmatpush1.bf16.msra.mxu1 %v7024_v28  ;;  %v7034_v51 = vld [vmem:[#allocation31_spill] sm:$0xff]  ;;  %v7035_v28 = vld [vmem:[#allocation32_spill] sm:$0xff] }
 0x3cd   :  { %4152 = vmatprep.subr.bf16.mxu0 %v7025_v11  ;;  %4216 = vmatprep.subr.bf16.mxu1 %v7026_v55  ;;  %v7036_v11 = vld [vmem:[#allocation33_spill] sm:$0xff]  ;;  %v7037_v55 = vld [vmem:[#allocation34_spill] sm:$0xff] }
 0x3d0   :  { %4154 = vmatpush1.bf16.msra.mxu0 %v7027_v29  ;;  %4218 = vmatpush1.bf16.msra.mxu1 %v7028_v57  ;;  %v7038_v29 = vld [vmem:[#allocation35_spill] sm:$0xff]  ;;  %v7039_v57 = vld [vmem:[#allocation36_spill] sm:$0xff] }
 0x3d1   :  { %4156 = vmatprep.subr.bf16.mxu0 %v7029_v45  ;;  %4220 = vmatprep.subr.bf16.mxu1 %v7030_v13  ;;  %v7040_v45 = vld [vmem:[#allocation37_spill] sm:$0xff]  ;;  %v7041_v13 = vld [vmem:[#allocation38_spill] sm:$0xff] }
 0x3d4   :  { %4158 = vmatpush1.bf16.msra.mxu0 %v7031_v24  ;;  %4222 = vmatpush1.bf16.msra.mxu1 %v7032_v1  ;;  %v7042_v24 = vld [vmem:[#allocation39_spill] sm:$0xff]  ;;  %v7043_v1 = vld [vmem:[#allocation40_spill] sm:$0xff] }
 0x3d5   :  { %4160 = vmatprep.subr.bf16.mxu0 %v7033_v21  ;;  %4224 = vmatprep.subr.bf16.mxu1 %v7034_v51  ;;  %v7044_v21 = vld [vmem:[#allocation41_spill] sm:$0xff]  ;;  %v7045_v51 = vld [vmem:[#allocation42_spill] sm:$0xff] }
 0x3d8   :  { %4162 = vmatpush1.bf16.msra.mxu0 %v7035_v28  ;;  %4226 = vmatpush1.bf16.msra.mxu1 %v7036_v11  ;;  %v7046_v28 = vld [vmem:[#allocation43_spill] sm:$0xff]  ;;  %v7047_v11 = vld [vmem:[#allocation44_spill] sm:$0xff] }
 0x3d9   :  { %4164 = vmatprep.subr.bf16.mxu0 %v7037_v55  ;;  %4228 = vmatprep.subr.bf16.mxu1 %v7038_v29  ;;  %v7048_v55 = vld [vmem:[#allocation45_spill] sm:$0xff]  ;;  %v7049_v29 = vld [vmem:[#allocation46_spill] sm:$0xff] }
 0x3dc   :  { %4166 = vmatpush1.bf16.msra.mxu0 %v7039_v57  ;;  %4230 = vmatpush1.bf16.msra.mxu1 %v7040_v45  ;;  %v7050_v57 = vld [vmem:[#allocation47_spill] sm:$0xff]  ;;  %v7051_v45 = vld [vmem:[#allocation48_spill] sm:$0xff] }
 0x3dd   :  { %4168 = vmatprep.subr.bf16.mxu0 %v7041_v13  ;;  %4232 = vmatprep.subr.bf16.mxu1 %v7042_v24  ;;  %v7052_v13 = vld [vmem:[#allocation49_spill] sm:$0xff]  ;;  %v7053_v24 = vld [vmem:[#allocation50_spill] sm:$0xff] }
 0x3e0   :  { %4170 = vmatpush1.bf16.msra.mxu0 %v7043_v1  ;;  %4234 = vmatpush1.bf16.msra.mxu1 %v7044_v21  ;;  %v7054_v1 = vld [vmem:[#allocation51_spill] sm:$0xff]  ;;  %v7055_v21 = vld [vmem:[#allocation52_spill] sm:$0xff] }
 0x3e1   :  { %4172 = vmatprep.subr.bf16.mxu0 %v7045_v51  ;;  %4236 = vmatprep.subr.bf16.mxu1 %v7046_v28  ;;  %v7056_v51 = vld [vmem:[#allocation53_spill] sm:$0xff]  ;;  %v7057_v28 = vld [vmem:[#allocation54_spill] sm:$0xff] }
 0x3e4   :  { %4174 = vmatpush1.bf16.msra.mxu0 %v7047_v11  ;;  %4238 = vmatpush1.bf16.msra.mxu1 %v7048_v55  ;;  %v7058_v11 = vld [vmem:[#allocation55_spill] sm:$0xff]  ;;  %v7059_v55 = vld [vmem:[#allocation56_spill] sm:$0xff] }
 0x3e5   :  { %4176 = vmatprep.subr.bf16.mxu0 %v7049_v29  ;;  %4240 = vmatprep.subr.bf16.mxu1 %v7050_v57  ;;  %v7060_v29 = vld [vmem:[#allocation57_spill] sm:$0xff]  ;;  %v7061_v57 = vld [vmem:[#allocation58_spill] sm:$0xff] }
 0x3e8   :  { %4178 = vmatpush1.bf16.msra.mxu0 %v7051_v45  ;;  %4242 = vmatpush1.bf16.msra.mxu1 %v7052_v13  ;;  %v7062_v45 = vld [vmem:[#allocation59_spill] sm:$0xff]  ;;  %v7063_v13 = vld [vmem:[#allocation60_spill] sm:$0xff] }
 0x3e9   :  { %4180 = vmatprep.subr.bf16.mxu0 %v7053_v24  ;;  %4244 = vmatprep.subr.bf16.mxu1 %v7054_v1  ;;  %v7064_v24 = vld [vmem:[#allocation61_spill] sm:$0xff]  ;;  %v7065_v1 = vld [vmem:[#allocation62_spill] sm:$0xff] }
 0x3ec   :  { %4182 = vmatpush1.bf16.msra.mxu0 %v7055_v21  ;;  %4246 = vmatpush1.bf16.msra.mxu1 %v7056_v51  ;;  %v7066_v21 = vld [vmem:[#allocation63_spill] sm:$0xff]  ;;  %v7067_v51 = vld [vmem:[#allocation64_spill] sm:$0xff] }
 0x3ed   :  { %4184 = vmatprep.subr.bf16.mxu0 %v7057_v28  ;;  %4248 = vmatprep.subr.bf16.mxu1 %v7058_v11  ;;  %v7068_v28 = vld [vmem:[#allocation65_spill] sm:$0xff] }
 0x3ee   :  { %v7069_v11 = vld [vmem:[#allocation9_spill] sm:$0xff] }
 0x3f0   :  { %4186 = vmatpush1.bf16.msra.mxu0 %v7059_v55  ;;  %4250 = vmatpush1.bf16.msra.mxu1 %v7060_v29  ;;  %v7070_v55 = vld [vmem:[#allocation10_spill] sm:$0xff] }
 0x3f1   :  { %4188 = vmatprep.subr.bf16.mxu0 %v7061_v57  ;;  %4252 = vmatprep.subr.bf16.mxu1 %v7062_v45 }
 0x3f4   :  { %4190 = vmatpush1.bf16.msra.mxu0 %v7063_v13  ;;  %4254 = vmatpush1.bf16.msra.mxu1 %v7064_v24 }
 0x3f5   :  { %4192 = vmatprep.subr.bf16.mxu0 %v7065_v1  ;;  %4256 = vmatprep.subr.bf16.mxu1 %v7066_v21  ;;  %v7073_v21 = vld [vmem:[#allocation73_spill] sm:$0xff] }
 0x3f8   :  { %4194 = vmatpush1.bf16.msra.mxu0 %v7067_v51  ;;  %4258 = vmatpush1.bf16.msra.mxu1 %v7068_v28 }
 0x3f9   :  { %4260 = vmatprep.subr.bf16.mxu0 %v7069_v11  ;;  %4292 = vmatprep.subr.bf16.mxu1 %v7070_v55 }
 0x46e   :  { %v1414_v29 = vpop.f32.mrb[10].mxu0  ;;  %v1485_v57 = vpop.f32.mrb[18].mxu1 }
 0x46f   :  { %v1415_v45 = vadd.f32 %v1414_v29, %v7071_v2  ;;  %v1416_v37 = vpop.f32.mrb[11].mxu0  ;;  %v1487_v13 = vpop.f32.mrb[19].mxu1  ;;  %v1486_v51 = vadd.f32 %v1485_v57, %v7073_v21 }
 0x470   :  { %v1417_v24 = vadd.f32 %v1416_v37, %v7072_v56  ;;  %v1488_v28 = vadd.f32 %v1487_v13, %v7074_v42 }
 0x471   :  { %v3405_v6 = vmul.f32 -1.442695, %v1415_v45  ;;  %v3407_v53 = vmul.f32 -1.442695, %v1486_v51 }
 0x472   :  { %v3406_v1 = vmul.f32 -1.442695, %v1417_v24 }
 0x473   :  { %5138 = vpow2.f32 %v3405_v6 }
 0x474   :  { %5140 = vpow2.f32 %v3406_v1  ;;  %v7075_v1 = vld [vmem:[#allocation11_spill] sm:$0xff] }
 0x475   :  { %5142 = vtanh.f32 %v1488_v28 }
 0x476   :  { %5144 = vpow2.f32 %v3407_v53 }
 0x47d   :  { %v5139_v11 = vpop.eup %5138 }
 0x47e   :  { %v1499_v30 = vadd.f32 1.0, %v5139_v11  ;;  %v5141_v55 = vpop.eup %5140 }
 0x47f   :  { %v1500_v29 = vadd.f32 1.0, %v5141_v55  ;;  %v5143_v2 = vpop.eup %5142 }
 0x480   :  { %5146 = vrcp.f32 %v1499_v30  ;;  %v5145_v43 = vpop.eup %5144  ;;  %v7077_v30 = vld [vmem:[#allocation70_spill] sm:$0xff] }
 0x481   :  { %5148 = vrcp.f32 %v1500_v29  ;;  %v1501_v6 = vadd.f32 1.0, %v5145_v43 }
 0x483   :  { %5150 = vrcp.f32 %v1501_v6 }
 0x48a   :  { %v5147_v37 = vpop.eup %5146 }
 0x48b   :  { %v1510_v45 = vmul.f32 %v5147_v37, %v5143_v2  ;;  %v5149_v24 = vpop.eup %5148 }
 0x48c   :  { %v1509_v56 = vmul.f32 %v5149_v24, %v7075_v1 }
 0x48e   :  { %v1580_v57 = vpop.f32.mrb[12].mxu0  ;;  %v1651_v21 = vpop.f32.mrb[20].mxu1  ;;  %v6156_v13 = vadd.f32 %v1510_v45, %v1509_v56 }
 0x48f   :  { %v1660_v51 = vrot.slane %v1580_v57, 2  ;;  %v1582_v11 = vpop.f32.mrb[13].mxu0  ;;  %v1653_v28 = vpop.f32.mrb[21].mxu1  ;;  %v1662_v43 = vrot.slane %v1651_v21, 2 }
 0x490   :  { %7076 = vst [vmem:[#allocation75_spill] sm:$0xff] %v6156_v13  ;;  %v1661_v53 = vrot.slane %v1582_v11, 2  ;;  %5152 = vtanh.f32 %v6156_v13  ;;  %v1663_v24 = vrot.slane %v1653_v28, 2  ;;  %v5151_v45 = vpop.eup %5150 }
 0x491   :  { %v1668_v55 = vadd.f32 %v1660_v51, %v7077_v30  ;;  %v1670_v56 = vadd.f32 %v1662_v43, %v5798_v18 }
 0x492   :  { %v1669_v29 = vadd.f32 %v1661_v53, %v5794_v3  ;;  %v1671_v57 = vadd.f32 %v1663_v24, %v5801_v4 }
 0x493   :  { %v3408_v2 = vmul.f32 -1.442695, %v1668_v55  ;;  %v3410_v11 = vmul.f32 -1.442695, %v1670_v56  ;;  %v1692_v55 = vrot.slane %v6050_v62, 6  ;;  %v7078_v62 = vld [vmem:[#allocation12_spill] sm:$0xff] }
 0x494   :  { %v3409_v37 = vmul.f32 -1.442695, %v1669_v29 }
 0x495   :  { %5154 = vpow2.f32 %v3408_v2 }
 0x496   :  { %5156 = vpow2.f32 %v3409_v37 }
 0x497   :  { %5158 = vtanh.f32 %v1671_v57  ;;  %v7081_v57 = vld [vmem:[#allocation15_spill] sm:$0xff] }
 0x498   :  { %5160 = vpow2.f32 %v3410_v11  ;;  %v7083_v11 = vld [vmem:[#allocation17_spill] sm:$0xff] }
 0x49a   :  { %v5153_v1 = vpop.eup %5152 }
 0x49b   :  { %v1513_v6 = vmul.f32 %v5153_v1, %v5151_v45  ;;  %v7080_v1 = vld [vmem:[#allocation14_spill] sm:$0xff] }
 0x49d   :  { %v1700_v42 = vrot.slane %v1513_v6, 2  ;;  %v7082_v6 = vld [vmem:[#allocation16_spill] sm:$0xff] }
 0x49f   :  { %v5155_v51 = vpop.eup %5154  ;;  %v1703_v13 = vrot.slane %v1700_v42, 6 }
 0x4a0   :  { %v1681_v30 = vadd.f32 1.0, %v5155_v51  ;;  %v5157_v3 = vpop.eup %5156  ;;  %v7084_v51 = vld [vmem:[#allocation18_spill] sm:$0xff] }
 0x4a1   :  { %v1682_v53 = vadd.f32 1.0, %v5157_v3  ;;  %1770 = vmatprep.mubr.f32.mxu0 %v1703_v13  ;;  %1841 = vmatprep.mubr.f32.mxu1 %v1703_v13  ;;  %v5159_v21 = vpop.eup %5158  ;;  %v7079_v13 = vld [vmem:[#allocation13_spill] sm:$0xff]  ;;  %v7086_v3 = vld [vmem:[#allocation20_spill] sm:$0xff] }
 0x4a2   :  { %5162 = vrcp.f32 %v1681_v30  ;;  %v5161_v18 = vpop.eup %5160  ;;  %v7085_v30 = vld [vmem:[#allocation19_spill] sm:$0xff] }
 0x4a3   :  { %5164 = vrcp.f32 %v1682_v53  ;;  %v1683_v2 = vadd.f32 1.0, %v5161_v18  ;;  %v7087_v53 = vld [vmem:[#allocation21_spill] sm:$0xff]  ;;  %v7089_v18 = vld [vmem:[#allocation23_spill] sm:$0xff] }
 0x4a5   :  { %5166 = vrcp.f32 %v1683_v2  ;;  %v7094_v2 = vld [vmem:[#allocation28_spill] sm:$0xff] }
 0x4ac   :  { %v5163_v28 = vpop.eup %5162 }
 0x4ad   :  { %v1695_v4 = vmul.f32 %v5163_v28, %v5159_v21  ;;  %v5165_v29 = vpop.eup %5164  ;;  %v7088_v21 = vld [vmem:[#allocation22_spill] sm:$0xff]  ;;  %v7090_v28 = vld [vmem:[#allocation24_spill] sm:$0xff] }
 0x4ae   :  { %v1694_v37 = vmul.f32 %v5165_v29, %v1692_v55  ;;  %v7091_v55 = vld [vmem:[#allocation25_spill] sm:$0xff]  ;;  %v7093_v29 = vld [vmem:[#allocation27_spill] sm:$0xff] }
 0x4af   :  { %v5167_v42 = vpop.eup %5166 }
 0x4b0   :  { %v6164_v43 = vadd.f32 %v1695_v4, %v1694_v37  ;;  %v7092_v4 = vld [vmem:[#allocation26_spill] sm:$0xff]  ;;  %v7095_v37 = vld [vmem:[#allocation29_spill] sm:$0xff] }
 0x4b2   :  { %5168 = vtanh.f32 %v6164_v43 }
 0x4bc   :  { %v5169_v24 = vpop.eup %5168 }
 0x4bd   :  { %v1698_v56 = vmul.f32 %v5169_v24, %v5167_v42  ;;  %v7096_v42 = vld [vmem:[#allocation30_spill] sm:$0xff]  ;;  %v7097_v24 = vld [vmem:[#allocation31_spill] sm:$0xff] }
 0x4bf   :  { %v1702_v45 = vrot.slane %v1698_v56, 6  ;;  %v7098_v56 = vld [vmem:[#allocation32_spill] sm:$0xff] }
 0x4c1   :  { %1771 = vmatmul.mubr.f32.vlgmr.msra.gmra.mrb[14].mxu0 %v1702_v45  ;;  %1842 = vmatmul.mubr.f32.vlgmr.msra.gmra.mrb[22].mxu1 %v1702_v45 }
 0x4c2   :  { %4262 = vmatpush1.bf16.msra.mxu0 %v5460_v12  ;;  %4294 = vmatpush1.bf16.msra.mxu1 %v5484_v32 }
 0x4c3   :  { %4264 = vmatprep.subr.bf16.mxu0 %v5467_v16  ;;  %4296 = vmatprep.subr.bf16.mxu1 %v5489_v36 }
 0x4c4   :  { %1936 = vmatprep.mubr.f32.mxu0 %v6887_v8  ;;  %2007 = vmatprep.mubr.f32.mxu1 %v6887_v8 }
 0x4c6   :  { %4266 = vmatpush1.bf16.msra.mxu0 %v5473_v20  ;;  %4298 = vmatpush1.bf16.msra.mxu1 %v5496_v46 }
 0x4c7   :  { %4268 = vmatprep.subr.bf16.mxu0 %v5478_v25  ;;  %4300 = vmatprep.subr.bf16.mxu1 %v5503_v48 }
 0x4ca   :  { %4270 = vmatpush1.bf16.msra.mxu0 %v5487_v35  ;;  %4302 = vmatpush1.bf16.msra.mxu1 %v5511_v58 }
 0x4cb   :  { %4272 = vmatprep.subr.bf16.mxu0 %v5492_v40  ;;  %4304 = vmatprep.subr.bf16.mxu1 %v5518_v60 }
 0x4ce   :  { %4274 = vmatpush1.bf16.msra.mxu0 %v5501_v47  ;;  %4306 = vmatpush1.bf16.msra.mxu1 %v5524_v7 }
 0x4cf   :  { %4276 = vmatprep.subr.bf16.mxu0 %v5506_v52  ;;  %4308 = vmatprep.subr.bf16.mxu1 %v5530_v10 }
 0x4d2   :  { %4278 = vmatpush1.bf16.msra.mxu0 %v5516_v59  ;;  %4310 = vmatpush1.bf16.msra.mxu1 %v5536_v23 }
 0x4d3   :  { %4280 = vmatprep.subr.bf16.mxu0 %v5521_v0  ;;  %4312 = vmatprep.subr.bf16.mxu1 %v5542_v27 }
 0x4d6   :  { %4282 = vmatpush1.bf16.msra.mxu0 %v5528_v9  ;;  %4314 = vmatpush1.bf16.msra.mxu1 %v5548_v38 }
 0x4d7   :  { %4284 = vmatprep.subr.bf16.mxu0 %v5533_v15  ;;  %4316 = vmatprep.subr.bf16.mxu1 %v5554_v41 }
 0x4da   :  { %4286 = vmatpush1.bf16.msra.mxu0 %v5540_v26  ;;  %4318 = vmatpush1.bf16.msra.mxu1 %v5558_v49 }
 0x4db   :  { %4288 = vmatprep.subr.bf16.mxu0 %v5545_v31  ;;  %4320 = vmatprep.subr.bf16.mxu1 %v5562_v50 }
 0x4de   :  { %4290 = vmatpush1.bf16.msra.mxu0 %v5552_v39  ;;  %4322 = vmatpush1.bf16.msra.mxu1 %v5566_v54 }
 0x4df   :  { %4324 = vmatprep.subr.bf16.mxu0 %v5573_v61  ;;  %4388 = vmatprep.subr.bf16.mxu1 %v5575_v63 }
 0x4e1   :  { %1937 = vmatmul.mubr.f32.vlgmr.msra.gmra.mrb[16].mxu0 %v1702_v45  ;;  %2008 = vmatmul.mubr.f32.vlgmr.msra.gmra.mrb[24].mxu1 %v1702_v45  ;;  %v7099_v45 = vld [vmem:[#allocation33_spill] sm:$0xff] }
 0x4e2   :  { %4326 = vmatpush1.bf16.msra.mxu0 %v5579_v5  ;;  %4390 = vmatpush1.bf16.msra.mxu1 %v5581_v14 }
 0x4e3   :  { %4328 = vmatprep.subr.bf16.mxu0 %v5583_v17  ;;  %4392 = vmatprep.subr.bf16.mxu1 %v5586_v22 }
 0x4e6   :  { %4330 = vmatpush1.bf16.msra.mxu0 %v5590_v33  ;;  %4394 = vmatpush1.bf16.msra.mxu1 %v5592_v34 }
 0x4e7   :  { %4332 = vmatprep.subr.bf16.mxu0 %v5595_v44  ;;  %4396 = vmatprep.subr.bf16.mxu1 %v6952_v19 }
 0x4ea   :  { %4334 = vmatpush1.bf16.msra.mxu0 %v7078_v62  ;;  %4398 = vmatpush1.bf16.msra.mxu1 %v7079_v13 }
 0x4eb   :  { %4336 = vmatprep.subr.bf16.mxu0 %v7080_v1  ;;  %4400 = vmatprep.subr.bf16.mxu1 %v7081_v57 }
 0x4ee   :  { %4338 = vmatpush1.bf16.msra.mxu0 %v7082_v6  ;;  %4402 = vmatpush1.bf16.msra.mxu1 %v7083_v11 }
 0x4ef   :  { %4340 = vmatprep.subr.bf16.mxu0 %v7084_v51  ;;  %4404 = vmatprep.subr.bf16.mxu1 %v7085_v30  ;;  %v7137_v51 = vld [vmem:[#allocation74_spill] sm:$0xff] }
 0x4f2   :  { %4342 = vmatpush1.bf16.msra.mxu0 %v7086_v3  ;;  %4406 = vmatpush1.bf16.msra.mxu1 %v7087_v53  ;;  %v7135_v3 = vld [vmem:[#allocation72_spill] sm:$0xff] }
 0x4f3   :  { %4344 = vmatprep.subr.bf16.mxu0 %v7088_v21  ;;  %4408 = vmatprep.subr.bf16.mxu1 %v7089_v18  ;;  %v7100_v18 = vld [vmem:[#allocation34_spill] sm:$0xff]  ;;  %v7134_v21 = vld [vmem:[#allocation71_spill] sm:$0xff] }
 0x4f6   :  { %4346 = vmatpush1.bf16.msra.mxu0 %v7090_v28  ;;  %4410 = vmatpush1.bf16.msra.mxu1 %v7091_v55  ;;  %v7101_v28 = vld [vmem:[#allocation35_spill] sm:$0xff]  ;;  %v7102_v55 = vld [vmem:[#allocation36_spill] sm:$0xff] }
 0x4f7   :  { %4348 = vmatprep.subr.bf16.mxu0 %v7092_v4  ;;  %4412 = vmatprep.subr.bf16.mxu1 %v7093_v29  ;;  %v7103_v4 = vld [vmem:[#allocation37_spill] sm:$0xff]  ;;  %v7104_v29 = vld [vmem:[#allocation38_spill] sm:$0xff] }
 0x4fa   :  { %4350 = vmatpush1.bf16.msra.mxu0 %v7094_v2  ;;  %4414 = vmatpush1.bf16.msra.mxu1 %v7095_v37  ;;  %v7105_v2 = vld [vmem:[#allocation39_spill] sm:$0xff]  ;;  %v7106_v37 = vld [vmem:[#allocation40_spill] sm:$0xff] }
 0x4fb   :  { %4352 = vmatprep.subr.bf16.mxu0 %v7096_v42  ;;  %4416 = vmatprep.subr.bf16.mxu1 %v7097_v24  ;;  %v7107_v42 = vld [vmem:[#allocation41_spill] sm:$0xff]  ;;  %v7108_v24 = vld [vmem:[#allocation42_spill] sm:$0xff] }
 0x4fe   :  { %4354 = vmatpush1.bf16.msra.mxu0 %v7098_v56  ;;  %4418 = vmatpush1.bf16.msra.mxu1 %v7099_v45  ;;  %v7109_v56 = vld [vmem:[#allocation43_spill] sm:$0xff]  ;;  %v7110_v45 = vld [vmem:[#allocation44_spill] sm:$0xff] }
 0x4ff   :  { %4356 = vmatprep.subr.bf16.mxu0 %v7100_v18  ;;  %4420 = vmatprep.subr.bf16.mxu1 %v7101_v28  ;;  %v7111_v18 = vld [vmem:[#allocation45_spill] sm:$0xff]  ;;  %v7112_v28 = vld [vmem:[#allocation46_spill] sm:$0xff] }
 0x502   :  { %4358 = vmatpush1.bf16.msra.mxu0 %v7102_v55  ;;  %4422 = vmatpush1.bf16.msra.mxu1 %v7103_v4  ;;  %v7113_v55 = vld [vmem:[#allocation47_spill] sm:$0xff]  ;;  %v7114_v4 = vld [vmem:[#allocation48_spill] sm:$0xff] }
 0x503   :  { %4360 = vmatprep.subr.bf16.mxu0 %v7104_v29  ;;  %4424 = vmatprep.subr.bf16.mxu1 %v7105_v2  ;;  %v7115_v29 = vld [vmem:[#allocation49_spill] sm:$0xff]  ;;  %v7116_v2 = vld [vmem:[#allocation50_spill] sm:$0xff] }
 0x506   :  { %4362 = vmatpush1.bf16.msra.mxu0 %v7106_v37  ;;  %4426 = vmatpush1.bf16.msra.mxu1 %v7107_v42  ;;  %v7117_v37 = vld [vmem:[#allocation51_spill] sm:$0xff]  ;;  %v7118_v42 = vld [vmem:[#allocation52_spill] sm:$0xff] }
 0x507   :  { %4364 = vmatprep.subr.bf16.mxu0 %v7108_v24  ;;  %4428 = vmatprep.subr.bf16.mxu1 %v7109_v56  ;;  %v7119_v24 = vld [vmem:[#allocation53_spill] sm:$0xff]  ;;  %v7120_v56 = vld [vmem:[#allocation54_spill] sm:$0xff] }
 0x50a   :  { %4366 = vmatpush1.bf16.msra.mxu0 %v7110_v45  ;;  %4430 = vmatpush1.bf16.msra.mxu1 %v7111_v18  ;;  %v7121_v45 = vld [vmem:[#allocation55_spill] sm:$0xff]  ;;  %v7122_v18 = vld [vmem:[#allocation56_spill] sm:$0xff] }
 0x50b   :  { %4368 = vmatprep.subr.bf16.mxu0 %v7112_v28  ;;  %4432 = vmatprep.subr.bf16.mxu1 %v7113_v55  ;;  %v7123_v28 = vld [vmem:[#allocation57_spill] sm:$0xff]  ;;  %v7124_v55 = vld [vmem:[#allocation58_spill] sm:$0xff] }
 0x50e   :  { %4370 = vmatpush1.bf16.msra.mxu0 %v7114_v4  ;;  %4434 = vmatpush1.bf16.msra.mxu1 %v7115_v29  ;;  %v7125_v4 = vld [vmem:[#allocation59_spill] sm:$0xff]  ;;  %v7126_v29 = vld [vmem:[#allocation60_spill] sm:$0xff] }
 0x50f   :  { %4372 = vmatprep.subr.bf16.mxu0 %v7116_v2  ;;  %4436 = vmatprep.subr.bf16.mxu1 %v7117_v37  ;;  %v7127_v2 = vld [vmem:[#allocation61_spill] sm:$0xff]  ;;  %v7128_v37 = vld [vmem:[#allocation62_spill] sm:$0xff] }
 0x512   :  { %4374 = vmatpush1.bf16.msra.mxu0 %v7118_v42  ;;  %4438 = vmatpush1.bf16.msra.mxu1 %v7119_v24  ;;  %v7129_v42 = vld [vmem:[#allocation63_spill] sm:$0xff]  ;;  %v7130_v24 = vld [vmem:[#allocation64_spill] sm:$0xff] }
 0x513   :  { %4376 = vmatprep.subr.bf16.mxu0 %v7120_v56  ;;  %4440 = vmatprep.subr.bf16.mxu1 %v7121_v45  ;;  %v7131_v56 = vld [vmem:[#allocation65_spill] sm:$0xff] }
 0x514   :  { %v7132_v45 = vld [vmem:[#allocation9_spill] sm:$0xff] }
 0x516   :  { %4378 = vmatpush1.bf16.msra.mxu0 %v7122_v18  ;;  %4442 = vmatpush1.bf16.msra.mxu1 %v7123_v28  ;;  %v7133_v18 = vld [vmem:[#allocation10_spill] sm:$0xff] }
 0x517   :  { %4380 = vmatprep.subr.bf16.mxu0 %v7124_v55  ;;  %4444 = vmatprep.subr.bf16.mxu1 %v7125_v4 }
 0x51a   :  { %4382 = vmatpush1.bf16.msra.mxu0 %v7126_v29  ;;  %4446 = vmatpush1.bf16.msra.mxu1 %v7127_v2 }
 0x51b   :  { %4384 = vmatprep.subr.bf16.mxu0 %v7128_v37  ;;  %4448 = vmatprep.subr.bf16.mxu1 %v7129_v42  ;;  %v7136_v42 = vld [vmem:[#allocation73_spill] sm:$0xff] }
 0x51e   :  { %4386 = vmatpush1.bf16.msra.mxu0 %v7130_v24  ;;  %4450 = vmatpush1.bf16.msra.mxu1 %v7131_v56 }
 0x51f   :  { %4452 = vmatprep.subr.bf16.mxu0 %v7132_v45  ;;  %4484 = vmatprep.subr.bf16.mxu1 %v7133_v18 }
 0x594   :  { %v1772_v28 = vpop.f32.mrb[14].mxu0  ;;  %v1843_v55 = vpop.f32.mrb[22].mxu1 }
 0x595   :  { %v1773_v4 = vadd.f32 %v1772_v28, %v7134_v21  ;;  %v1774_v53 = vpop.f32.mrb[15].mxu0  ;;  %v1845_v29 = vpop.f32.mrb[23].mxu1  ;;  %v1844_v24 = vadd.f32 %v1843_v55, %v7136_v42 }
 0x596   :  { %v1775_v2 = vadd.f32 %v1774_v53, %v7135_v3  ;;  %v1846_v56 = vadd.f32 %v1845_v29, %v7137_v51 }
 0x597   :  { %v3411_v30 = vmul.f32 -1.442695, %v1773_v4  ;;  %v3413_v11 = vmul.f32 -1.442695, %v1844_v24  ;;  %v7139_v24 = vld [vmem:[#allocation66_spill] sm:$0xff] }
 0x598   :  { %v3412_v37 = vmul.f32 -1.442695, %v1775_v2 }
 0x599   :  { %5170 = vpow2.f32 %v3411_v30 }
 0x59a   :  { %5172 = vpow2.f32 %v3412_v37  ;;  %v7138_v37 = vld [vmem:[#allocation75_spill] sm:$0xff] }
 0x59b   :  { %5174 = vtanh.f32 %v1846_v56 }
 0x59c   :  { %5176 = vpow2.f32 %v3413_v11 }
 0x5a3   :  { %v5171_v45 = vpop.eup %5170 }
 0x5a4   :  { %v1857_v6 = vadd.f32 1.0, %v5171_v45  ;;  %v5173_v18 = vpop.eup %5172 }
 0x5a5   :  { %v1858_v28 = vadd.f32 1.0, %v5173_v18  ;;  %v5175_v21 = vpop.eup %5174 }
 0x5a6   :  { %5178 = vrcp.f32 %v1857_v6  ;;  %v5177_v57 = vpop.eup %5176  ;;  %v7140_v6 = vld [vmem:[#allocation67_spill] sm:$0xff] }
 0x5a7   :  { %5180 = vrcp.f32 %v1858_v28  ;;  %v1859_v30 = vadd.f32 1.0, %v5177_v57  ;;  %v7141_v57 = vld [vmem:[#allocation68_spill] sm:$0xff] }
 0x5a9   :  { %5182 = vrcp.f32 %v1859_v30 }
 0x5b0   :  { %v5179_v53 = vpop.eup %5178 }
 0x5b1   :  { %v1868_v4 = vmul.f32 %v5179_v53, %v5175_v21  ;;  %v5181_v2 = vpop.eup %5180 }
 0x5b2   :  { %v1867_v3 = vmul.f32 %v5181_v2, %v7138_v37  ;;  %v7142_v2 = vld [vmem:[#allocation69_spill] sm:$0xff] }
 0x5b3   :  { %v5183_v53 = vpop.eup %5182 }
 0x5b4   :  { %v1938_v55 = vpop.f32.mrb[16].mxu0  ;;  %v2009_v42 = vpop.f32.mrb[24].mxu1  ;;  %v6270_v29 = vadd.f32 %v1868_v4, %v1867_v3 }
 0x5b5   :  { %v2014_v45 = vadd.f32 %v1938_v55, %v7139_v24  ;;  %v1940_v56 = vpop.f32.mrb[17].mxu0  ;;  %v2011_v51 = vpop.f32.mrb[25].mxu1  ;;  %v2016_v21 = vadd.f32 %v2009_v42, %v7141_v57  ;;  %v2038_v42 = vrot.slane %v6164_v43, 6  ;;  %v7143_v43 = vld [vmem:[#allocation14_spill] sm:$0xff] }
 0x5b6   :  { %v2015_v11 = vadd.f32 %v1940_v56, %v7140_v6  ;;  %5184 = vtanh.f32 %v6270_v29  ;;  %v2017_v37 = vadd.f32 %v2011_v51, %v7142_v2 }
 0x5b7   :  { %v3414_v18 = vmul.f32 -1.442695, %v2014_v45  ;;  %v3416_v4 = vmul.f32 -1.442695, %v2016_v21 }
 0x5b8   :  { %v3415_v28 = vmul.f32 -1.442695, %v2015_v11 }
 0x5b9   :  { %5186 = vpow2.f32 %v3414_v18 }
 0x5ba   :  { %5188 = vpow2.f32 %v3415_v28 }
 0x5bb   :  { %5190 = vtanh.f32 %v2017_v37 }
 0x5bc   :  { %5192 = vpow2.f32 %v3416_v4  ;;  %v7146_v4 = vld [vmem:[#allocation17_spill] sm:$0xff] }
 0x5c0   :  { %v5185_v3 = vpop.eup %5184 }
 0x5c1   :  { %v1871_v1 = vmul.f32 %v5185_v3, %v5183_v53 }
 0x5c3   :  { %v5187_v55 = vpop.eup %5186  ;;  %2109 = vmatprep.mubr.f32.mxu0 %v1871_v1  ;;  %2180 = vmatprep.mubr.f32.mxu1 %v1871_v1 }
 0x5c4   :  { %v2027_v24 = vadd.f32 1.0, %v5187_v55  ;;  %v5189_v30 = vpop.eup %5188  ;;  %v7147_v55 = vld [vmem:[#allocation18_spill] sm:$0xff] }
 0x5c5   :  { %v2028_v45 = vadd.f32 1.0, %v5189_v30  ;;  %v5191_v56 = vpop.eup %5190  ;;  %v7148_v30 = vld [vmem:[#allocation19_spill] sm:$0xff] }
 0x5c6   :  { %5194 = vrcp.f32 %v2027_v24  ;;  %v5193_v11 = vpop.eup %5192  ;;  %v7144_v24 = vld [vmem:[#allocation15_spill] sm:$0xff] }
 0x5c7   :  { %5196 = vrcp.f32 %v2028_v45  ;;  %v2029_v2 = vadd.f32 1.0, %v5193_v11  ;;  %v7149_v45 = vld [vmem:[#allocation20_spill] sm:$0xff]  ;;  %v7151_v11 = vld [vmem:[#allocation22_spill] sm:$0xff] }
 0x5c9   :  { %5198 = vrcp.f32 %v2029_v2  ;;  %v7145_v2 = vld [vmem:[#allocation16_spill] sm:$0xff] }
 0x5d0   :  { %v5195_v18 = vpop.eup %5194 }
 0x5d1   :  { %v2041_v28 = vmul.f32 %v5195_v18, %v5191_v56  ;;  %v5197_v51 = vpop.eup %5196  ;;  %v7150_v56 = vld [vmem:[#allocation21_spill] sm:$0xff]  ;;  %v7152_v18 = vld [vmem:[#allocation23_spill] sm:$0xff] }
 0x5d2   :  { %v2040_v21 = vmul.f32 %v5197_v51, %v2038_v42  ;;  %v7153_v42 = vld [vmem:[#allocation24_spill] sm:$0xff]  ;;  %v7155_v51 = vld [vmem:[#allocation26_spill] sm:$0xff] }
 0x5d3   :  { %v5199_v1 = vpop.eup %5198 }
 0x5d4   :  { %v6278_v53 = vadd.f32 %v2041_v28, %v2040_v21  ;;  %v7154_v28 = vld [vmem:[#allocation25_spill] sm:$0xff]  ;;  %v7156_v21 = vld [vmem:[#allocation27_spill] sm:$0xff] }
 0x5d6   :  { %5200 = vtanh.f32 %v6278_v53 }
 0x5e0   :  { %v5201_v37 = vpop.eup %5200 }
 0x5e1   :  { %v2044_v3 = vmul.f32 %v5201_v37, %v5199_v1  ;;  %v7157_v1 = vld [vmem:[#allocation28_spill] sm:$0xff]  ;;  %v7158_v37 = vld [vmem:[#allocation29_spill] sm:$0xff] }
 0x5e3   :  { %2110 = vmatmul.mubr.f32.vlgmr.msra.gmra.mrb[18].mxu0 %v2044_v3  ;;  %2181 = vmatmul.mubr.f32.vlgmr.msra.gmra.mrb[26].mxu1 %v2044_v3 }
 0x5e4   :  { %4454 = vmatpush1.bf16.msra.mxu0 %v5460_v12  ;;  %4486 = vmatpush1.bf16.msra.mxu1 %v5484_v32 }
 0x5e5   :  { %4456 = vmatprep.subr.bf16.mxu0 %v5467_v16  ;;  %4488 = vmatprep.subr.bf16.mxu1 %v5489_v36 }
 0x5e6   :  { %2275 = vmatprep.mubr.f32.mxu0 %v6887_v8  ;;  %2346 = vmatprep.mubr.f32.mxu1 %v6887_v8 }
 0x5e8   :  { %4458 = vmatpush1.bf16.msra.mxu0 %v5473_v20  ;;  %4490 = vmatpush1.bf16.msra.mxu1 %v5496_v46 }
 0x5e9   :  { %4460 = vmatprep.subr.bf16.mxu0 %v5478_v25  ;;  %4492 = vmatprep.subr.bf16.mxu1 %v5503_v48 }
 0x5ec   :  { %4462 = vmatpush1.bf16.msra.mxu0 %v5487_v35  ;;  %4494 = vmatpush1.bf16.msra.mxu1 %v5511_v58 }
 0x5ed   :  { %4464 = vmatprep.subr.bf16.mxu0 %v5492_v40  ;;  %4496 = vmatprep.subr.bf16.mxu1 %v5518_v60 }
 0x5f0   :  { %4466 = vmatpush1.bf16.msra.mxu0 %v5501_v47  ;;  %4498 = vmatpush1.bf16.msra.mxu1 %v5524_v7 }
 0x5f1   :  { %4468 = vmatprep.subr.bf16.mxu0 %v5506_v52  ;;  %4500 = vmatprep.subr.bf16.mxu1 %v5530_v10 }
 0x5f4   :  { %4470 = vmatpush1.bf16.msra.mxu0 %v5516_v59  ;;  %4502 = vmatpush1.bf16.msra.mxu1 %v5536_v23 }
 0x5f5   :  { %4472 = vmatprep.subr.bf16.mxu0 %v5521_v0  ;;  %4504 = vmatprep.subr.bf16.mxu1 %v5542_v27 }
 0x5f8   :  { %4474 = vmatpush1.bf16.msra.mxu0 %v5528_v9  ;;  %4506 = vmatpush1.bf16.msra.mxu1 %v5548_v38 }
 0x5f9   :  { %4476 = vmatprep.subr.bf16.mxu0 %v5533_v15  ;;  %4508 = vmatprep.subr.bf16.mxu1 %v5554_v41 }
 0x5fc   :  { %4478 = vmatpush1.bf16.msra.mxu0 %v5540_v26  ;;  %4510 = vmatpush1.bf16.msra.mxu1 %v5558_v49 }
 0x5fd   :  { %4480 = vmatprep.subr.bf16.mxu0 %v5545_v31  ;;  %4512 = vmatprep.subr.bf16.mxu1 %v5562_v50 }
 0x600   :  { %4482 = vmatpush1.bf16.msra.mxu0 %v5552_v39  ;;  %4514 = vmatpush1.bf16.msra.mxu1 %v5566_v54 }
 0x601   :  { %4516 = vmatprep.subr.bf16.mxu0 %v5573_v61  ;;  %4580 = vmatprep.subr.bf16.mxu1 %v5575_v63 }
 0x603   :  { %2276 = vmatmul.mubr.f32.vlgmr.msra.gmra.mrb[20].mxu0 %v2044_v3  ;;  %2347 = vmatmul.mubr.f32.vlgmr.msra.gmra.mrb[28].mxu1 %v2044_v3  ;;  %v7159_v3 = vld [vmem:[#allocation30_spill] sm:$0xff] }
 0x604   :  { %4518 = vmatpush1.bf16.msra.mxu0 %v5579_v5  ;;  %4582 = vmatpush1.bf16.msra.mxu1 %v5581_v14 }
 0x605   :  { %4520 = vmatprep.subr.bf16.mxu0 %v5583_v17  ;;  %4584 = vmatprep.subr.bf16.mxu1 %v5586_v22 }
 0x608   :  { %4522 = vmatpush1.bf16.msra.mxu0 %v5590_v33  ;;  %4586 = vmatpush1.bf16.msra.mxu1 %v5592_v34 }
 0x609   :  { %4524 = vmatprep.subr.bf16.mxu0 %v5595_v44  ;;  %4588 = vmatprep.subr.bf16.mxu1 %v6952_v19 }
 0x60c   :  { %4526 = vmatpush1.bf16.msra.mxu0 %v7078_v62  ;;  %4590 = vmatpush1.bf16.msra.mxu1 %v7079_v13 }
 0x60d   :  { %4528 = vmatprep.subr.bf16.mxu0 %v7143_v43  ;;  %4592 = vmatprep.subr.bf16.mxu1 %v7144_v24  ;;  %v7200_v24 = vld [vmem:[#allocation74_spill] sm:$0xff] }
 0x610   :  { %4530 = vmatpush1.bf16.msra.mxu0 %v7145_v2  ;;  %4594 = vmatpush1.bf16.msra.mxu1 %v7146_v4  ;;  %v7198_v4 = vld [vmem:[#allocation72_spill] sm:$0xff] }
 0x611   :  { %4532 = vmatprep.subr.bf16.mxu0 %v7147_v55  ;;  %4596 = vmatprep.subr.bf16.mxu1 %v7148_v30  ;;  %v7197_v30 = vld [vmem:[#allocation71_spill] sm:$0xff] }
 0x614   :  { %4534 = vmatpush1.bf16.msra.mxu0 %v7149_v45  ;;  %4598 = vmatpush1.bf16.msra.mxu1 %v7150_v56  ;;  %v7160_v45 = vld [vmem:[#allocation31_spill] sm:$0xff]  ;;  %v7161_v56 = vld [vmem:[#allocation32_spill] sm:$0xff] }
 0x615   :  { %4536 = vmatprep.subr.bf16.mxu0 %v7151_v11  ;;  %4600 = vmatprep.subr.bf16.mxu1 %v7152_v18  ;;  %v7162_v11 = vld [vmem:[#allocation33_spill] sm:$0xff]  ;;  %v7163_v18 = vld [vmem:[#allocation34_spill] sm:$0xff] }
 0x618   :  { %4538 = vmatpush1.bf16.msra.mxu0 %v7153_v42  ;;  %4602 = vmatpush1.bf16.msra.mxu1 %v7154_v28  ;;  %v7164_v42 = vld [vmem:[#allocation35_spill] sm:$0xff]  ;;  %v7165_v28 = vld [vmem:[#allocation36_spill] sm:$0xff] }
 0x619   :  { %4540 = vmatprep.subr.bf16.mxu0 %v7155_v51  ;;  %4604 = vmatprep.subr.bf16.mxu1 %v7156_v21  ;;  %v7166_v51 = vld [vmem:[#allocation37_spill] sm:$0xff]  ;;  %v7167_v21 = vld [vmem:[#allocation38_spill] sm:$0xff] }
 0x61c   :  { %4542 = vmatpush1.bf16.msra.mxu0 %v7157_v1  ;;  %4606 = vmatpush1.bf16.msra.mxu1 %v7158_v37  ;;  %v7168_v1 = vld [vmem:[#allocation39_spill] sm:$0xff]  ;;  %v7169_v37 = vld [vmem:[#allocation40_spill] sm:$0xff] }
 0x61d   :  { %4544 = vmatprep.subr.bf16.mxu0 %v7159_v3  ;;  %4608 = vmatprep.subr.bf16.mxu1 %v7160_v45  ;;  %v7170_v3 = vld [vmem:[#allocation41_spill] sm:$0xff]  ;;  %v7171_v45 = vld [vmem:[#allocation42_spill] sm:$0xff] }
 0x620   :  { %4546 = vmatpush1.bf16.msra.mxu0 %v7161_v56  ;;  %4610 = vmatpush1.bf16.msra.mxu1 %v7162_v11  ;;  %v7172_v56 = vld [vmem:[#allocation43_spill] sm:$0xff]  ;;  %v7173_v11 = vld [vmem:[#allocation44_spill] sm:$0xff] }
 0x621   :  { %4548 = vmatprep.subr.bf16.mxu0 %v7163_v18  ;;  %4612 = vmatprep.subr.bf16.mxu1 %v7164_v42  ;;  %v7174_v18 = vld [vmem:[#allocation45_spill] sm:$0xff]  ;;  %v7175_v42 = vld [vmem:[#allocation46_spill] sm:$0xff] }
 0x624   :  { %4550 = vmatpush1.bf16.msra.mxu0 %v7165_v28  ;;  %4614 = vmatpush1.bf16.msra.mxu1 %v7166_v51  ;;  %v7176_v28 = vld [vmem:[#allocation47_spill] sm:$0xff]  ;;  %v7177_v51 = vld [vmem:[#allocation48_spill] sm:$0xff] }
 0x625   :  { %4552 = vmatprep.subr.bf16.mxu0 %v7167_v21  ;;  %4616 = vmatprep.subr.bf16.mxu1 %v7168_v1  ;;  %v7178_v21 = vld [vmem:[#allocation49_spill] sm:$0xff]  ;;  %v7179_v1 = vld [vmem:[#allocation50_spill] sm:$0xff] }
 0x628   :  { %4554 = vmatpush1.bf16.msra.mxu0 %v7169_v37  ;;  %4618 = vmatpush1.bf16.msra.mxu1 %v7170_v3  ;;  %v7180_v37 = vld [vmem:[#allocation51_spill] sm:$0xff]  ;;  %v7181_v3 = vld [vmem:[#allocation52_spill] sm:$0xff] }
 0x629   :  { %4556 = vmatprep.subr.bf16.mxu0 %v7171_v45  ;;  %4620 = vmatprep.subr.bf16.mxu1 %v7172_v56  ;;  %v7182_v45 = vld [vmem:[#allocation53_spill] sm:$0xff]  ;;  %v7183_v56 = vld [vmem:[#allocation54_spill] sm:$0xff] }
 0x62c   :  { %4558 = vmatpush1.bf16.msra.mxu0 %v7173_v11  ;;  %4622 = vmatpush1.bf16.msra.mxu1 %v7174_v18  ;;  %v7184_v11 = vld [vmem:[#allocation55_spill] sm:$0xff]  ;;  %v7185_v18 = vld [vmem:[#allocation56_spill] sm:$0xff] }
 0x62d   :  { %4560 = vmatprep.subr.bf16.mxu0 %v7175_v42  ;;  %4624 = vmatprep.subr.bf16.mxu1 %v7176_v28  ;;  %v7186_v42 = vld [vmem:[#allocation57_spill] sm:$0xff]  ;;  %v7187_v28 = vld [vmem:[#allocation58_spill] sm:$0xff] }
 0x630   :  { %4562 = vmatpush1.bf16.msra.mxu0 %v7177_v51  ;;  %4626 = vmatpush1.bf16.msra.mxu1 %v7178_v21  ;;  %v7188_v51 = vld [vmem:[#allocation59_spill] sm:$0xff]  ;;  %v7189_v21 = vld [vmem:[#allocation60_spill] sm:$0xff] }
 0x631   :  { %4564 = vmatprep.subr.bf16.mxu0 %v7179_v1  ;;  %4628 = vmatprep.subr.bf16.mxu1 %v7180_v37  ;;  %v7190_v1 = vld [vmem:[#allocation61_spill] sm:$0xff]  ;;  %v7191_v37 = vld [vmem:[#allocation62_spill] sm:$0xff] }
 0x634   :  { %4566 = vmatpush1.bf16.msra.mxu0 %v7181_v3  ;;  %4630 = vmatpush1.bf16.msra.mxu1 %v7182_v45  ;;  %v7192_v3 = vld [vmem:[#allocation63_spill] sm:$0xff]  ;;  %v7193_v45 = vld [vmem:[#allocation64_spill] sm:$0xff] }
 0x635   :  { %4568 = vmatprep.subr.bf16.mxu0 %v7183_v56  ;;  %4632 = vmatprep.subr.bf16.mxu1 %v7184_v11  ;;  %v7194_v56 = vld [vmem:[#allocation65_spill] sm:$0xff] }
 0x636   :  { %v7195_v11 = vld [vmem:[#allocation9_spill] sm:$0xff] }
 0x638   :  { %4570 = vmatpush1.bf16.msra.mxu0 %v7185_v18  ;;  %4634 = vmatpush1.bf16.msra.mxu1 %v7186_v42  ;;  %v7196_v18 = vld [vmem:[#allocation10_spill] sm:$0xff] }
 0x639   :  { %4572 = vmatprep.subr.bf16.mxu0 %v7187_v28  ;;  %4636 = vmatprep.subr.bf16.mxu1 %v7188_v51 }
 0x63c   :  { %4574 = vmatpush1.bf16.msra.mxu0 %v7189_v21  ;;  %4638 = vmatpush1.bf16.msra.mxu1 %v7190_v1 }
 0x63d   :  { %4576 = vmatprep.subr.bf16.mxu0 %v7191_v37  ;;  %4640 = vmatprep.subr.bf16.mxu1 %v7192_v3  ;;  %v7199_v3 = vld [vmem:[#allocation73_spill] sm:$0xff] }
 0x640   :  { %4578 = vmatpush1.bf16.msra.mxu0 %v7193_v45  ;;  %4642 = vmatpush1.bf16.msra.mxu1 %v7194_v56 }
 0x641   :  { %4644 = vmatprep.subr.bf16.mxu0 %v7195_v11  ;;  %4676 = vmatprep.subr.bf16.mxu1 %v7196_v18 }
 0x6b6   :  { %v2111_v42 = vpop.f32.mrb[18].mxu0  ;;  %v2182_v28 = vpop.f32.mrb[26].mxu1 }
 0x6b7   :  { %v2112_v51 = vadd.f32 %v2111_v42, %v7197_v30  ;;  %v2113_v55 = vpop.f32.mrb[19].mxu0  ;;  %v2184_v21 = vpop.f32.mrb[27].mxu1  ;;  %v2183_v45 = vadd.f32 %v2182_v28, %v7199_v3 }
 0x6b8   :  { %v2114_v1 = vadd.f32 %v2113_v55, %v7198_v4  ;;  %v2185_v56 = vadd.f32 %v2184_v21, %v7200_v24 }
 0x6b9   :  { %v3417_v2 = vmul.f32 -1.442695, %v2112_v51  ;;  %v3419_v43 = vmul.f32 -1.442695, %v2183_v45 }
 0x6ba   :  { %v3418_v37 = vmul.f32 -1.442695, %v2114_v1 }
 0x6bb   :  { %5202 = vpow2.f32 %v3417_v2 }
 0x6bc   :  { %5204 = vpow2.f32 %v3418_v37 }
 0x6bd   :  { %5206 = vtanh.f32 %v2185_v56 }
 0x6be   :  { %5208 = vpow2.f32 %v3419_v43 }
 0x6c5   :  { %v5203_v11 = vpop.eup %5202 }
 0x6c6   :  { %v2196_v13 = vadd.f32 1.0, %v5203_v11  ;;  %v5205_v18 = vpop.eup %5204 }
 0x6c7   :  { %v2197_v42 = vadd.f32 1.0, %v5205_v18  ;;  %v5207_v30 = vpop.eup %5206 }
 0x6c8   :  { %5210 = vrcp.f32 %v2196_v13  ;;  %v5209_v62 = vpop.eup %5208  ;;  %v7202_v13 = vld [vmem:[#allocation66_spill] sm:$0xff] }
 0x6c9   :  { %5212 = vrcp.f32 %v2197_v42  ;;  %v2198_v2 = vadd.f32 1.0, %v5209_v62 }
 0x6cb   :  { %5214 = vrcp.f32 %v2198_v2 }
 0x6d2   :  { %v5211_v55 = vpop.eup %5210 }
 0x6d3   :  { %v2207_v51 = vmul.f32 %v5211_v55, %v5207_v30  ;;  %v5213_v1 = vpop.eup %5212 }
 0x6d4   :  { %v2206_v37 = vmul.f32 %v5213_v1, %v6270_v29 }
 0x6d5   :  { %v5215_v1 = vpop.eup %5214 }
 0x6d6   :  { %v2277_v28 = vpop.f32.mrb[20].mxu0  ;;  %v2348_v3 = vpop.f32.mrb[28].mxu1  ;;  %v6384_v21 = vadd.f32 %v2207_v51, %v2206_v37 }
 0x6d7   :  { %v2357_v45 = vrot.slane %v2277_v28, 6  ;;  %v2279_v11 = vpop.f32.mrb[21].mxu0  ;;  %v2350_v56 = vpop.f32.mrb[29].mxu1  ;;  %v2359_v62 = vrot.slane %v2348_v3, 6  ;;  %v7203_v28 = vld [vmem:[#allocation69_spill] sm:$0xff] }
 0x6d8   :  { %7201 = vst [vmem:[#allocation11_spill] sm:$0xff] %v6384_v21  ;;  %v2358_v43 = vrot.slane %v2279_v11, 6  ;;  %5216 = vtanh.f32 %v6384_v21  ;;  %v2360_v29 = vrot.slane %v2350_v56, 6 }
 0x6d9   :  { %v2365_v18 = vadd.f32 %v2357_v45, %v7202_v13  ;;  %v2367_v51 = vadd.f32 %v2359_v62, %v7141_v57 }
 0x6da   :  { %v2366_v42 = vadd.f32 %v2358_v43, %v7140_v6  ;;  %v2368_v24 = vadd.f32 %v2360_v29, %v7203_v28 }
 0x6db   :  { %v3420_v30 = vmul.f32 -1.442695, %v2365_v18  ;;  %v3422_v11 = vmul.f32 -1.442695, %v2367_v51 }
 0x6dc   :  { %v3421_v55 = vmul.f32 -1.442695, %v2366_v42 }
 0x6dd   :  { %5218 = vpow2.f32 %v3420_v30  ;;  %v2389_v30 = vrot.slane %v6278_v53, 6  ;;  %v7204_v53 = vld [vmem:[#allocation12_spill] sm:$0xff] }
 0x6de   :  { %5220 = vpow2.f32 %v3421_v55 }
 0x6df   :  { %5222 = vtanh.f32 %v2368_v24 }
 0x6e0   :  { %5224 = vpow2.f32 %v3422_v11  ;;  %v7207_v11 = vld [vmem:[#allocation15_spill] sm:$0xff] }
 0x6e2   :  { %v5217_v37 = vpop.eup %5216 }
 0x6e3   :  { %v2210_v2 = vmul.f32 %v5217_v37, %v5215_v1 }
 0x6e5   :  { %v2397_v4 = vrot.slane %v2210_v2, 6  ;;  %v7206_v2 = vld [vmem:[#allocation14_spill] sm:$0xff] }
 0x6e7   :  { %v5219_v45 = vpop.eup %5218  ;;  %v2400_v21 = vrot.slane %v2397_v4, 2 }
 0x6e8   :  { %v2378_v13 = vadd.f32 1.0, %v5219_v45  ;;  %v5221_v43 = vpop.eup %5220  ;;  %v7208_v45 = vld [vmem:[#allocation16_spill] sm:$0xff] }
 0x6e9   :  { %v2379_v18 = vadd.f32 1.0, %v5221_v43  ;;  %2467 = vmatprep.mubr.f32.mxu0 %v2400_v21  ;;  %2538 = vmatprep.mubr.f32.mxu1 %v2400_v21  ;;  %v5223_v3 = vpop.eup %5222  ;;  %v7205_v21 = vld [vmem:[#allocation13_spill] sm:$0xff] }
 0x6ea   :  { %5226 = vrcp.f32 %v2378_v13  ;;  %v5225_v56 = vpop.eup %5224  ;;  %v7209_v43 = vld [vmem:[#allocation17_spill] sm:$0xff] }
 0x6eb   :  { %5228 = vrcp.f32 %v2379_v18  ;;  %v2380_v29 = vadd.f32 1.0, %v5225_v56  ;;  %v7210_v18 = vld [vmem:[#allocation18_spill] sm:$0xff]  ;;  %v7212_v56 = vld [vmem:[#allocation20_spill] sm:$0xff] }
 0x6ed   :  { %5230 = vrcp.f32 %v2380_v29  ;;  %v7217_v29 = vld [vmem:[#allocation25_spill] sm:$0xff] }
 0x6f4   :  { %v5227_v42 = vpop.eup %5226 }
 0x6f5   :  { %v2392_v55 = vmul.f32 %v5227_v42, %v5223_v3  ;;  %v5229_v62 = vpop.eup %5228  ;;  %v7211_v3 = vld [vmem:[#allocation19_spill] sm:$0xff]  ;;  %v7213_v42 = vld [vmem:[#allocation21_spill] sm:$0xff] }
 0x6f6   :  { %v2391_v51 = vmul.f32 %v5229_v62, %v2389_v30  ;;  %v7214_v30 = vld [vmem:[#allocation22_spill] sm:$0xff]  ;;  %v7216_v62 = vld [vmem:[#allocation24_spill] sm:$0xff] }
 0x6f7   :  { %v5231_v24 = vpop.eup %5230 }
 0x6f8   :  { %v6392_v1 = vadd.f32 %v2392_v55, %v2391_v51  ;;  %v7215_v55 = vld [vmem:[#allocation23_spill] sm:$0xff]  ;;  %v7218_v51 = vld [vmem:[#allocation26_spill] sm:$0xff] }
 0x6fa   :  { %5232 = vtanh.f32 %v6392_v1 }
 0x704   :  { %v5233_v4 = vpop.eup %5232 }
 0x705   :  { %v2395_v13 = vmul.f32 %v5233_v4, %v5231_v24  ;;  %v7219_v24 = vld [vmem:[#allocation27_spill] sm:$0xff]  ;;  %v7220_v4 = vld [vmem:[#allocation28_spill] sm:$0xff] }
 0x707   :  { %v2399_v37 = vrot.slane %v2395_v13, 2  ;;  %v7221_v13 = vld [vmem:[#allocation29_spill] sm:$0xff] }
 0x709   :  { %2468 = vmatmul.mubr.f32.vlgmr.msra.gmra.mrb[22].mxu0 %v2399_v37  ;;  %2539 = vmatmul.mubr.f32.vlgmr.msra.gmra.mrb[30].mxu1 %v2399_v37 }
 0x70a   :  { %4646 = vmatpush1.bf16.msra.mxu0 %v5460_v12  ;;  %4678 = vmatpush1.bf16.msra.mxu1 %v5484_v32 }
 0x70b   :  { %4648 = vmatprep.subr.bf16.mxu0 %v5467_v16  ;;  %4680 = vmatprep.subr.bf16.mxu1 %v5489_v36 }
 0x70c   :  { %2633 = vmatprep.mubr.f32.mxu0 %v6887_v8  ;;  %2704 = vmatprep.mubr.f32.mxu1 %v6887_v8 }
 0x70e   :  { %4650 = vmatpush1.bf16.msra.mxu0 %v5473_v20  ;;  %4682 = vmatpush1.bf16.msra.mxu1 %v5496_v46 }
 0x70f   :  { %4652 = vmatprep.subr.bf16.mxu0 %v5478_v25  ;;  %4684 = vmatprep.subr.bf16.mxu1 %v5503_v48 }
 0x712   :  { %4654 = vmatpush1.bf16.msra.mxu0 %v5487_v35  ;;  %4686 = vmatpush1.bf16.msra.mxu1 %v5511_v58 }
 0x713   :  { %4656 = vmatprep.subr.bf16.mxu0 %v5492_v40  ;;  %4688 = vmatprep.subr.bf16.mxu1 %v5518_v60 }
 0x716   :  { %4658 = vmatpush1.bf16.msra.mxu0 %v5501_v47  ;;  %4690 = vmatpush1.bf16.msra.mxu1 %v5524_v7 }
 0x717   :  { %4660 = vmatprep.subr.bf16.mxu0 %v5506_v52  ;;  %4692 = vmatprep.subr.bf16.mxu1 %v5530_v10 }
 0x71a   :  { %4662 = vmatpush1.bf16.msra.mxu0 %v5516_v59  ;;  %4694 = vmatpush1.bf16.msra.mxu1 %v5536_v23 }
 0x71b   :  { %4664 = vmatprep.subr.bf16.mxu0 %v5521_v0  ;;  %4696 = vmatprep.subr.bf16.mxu1 %v5542_v27 }
 0x71e   :  { %4666 = vmatpush1.bf16.msra.mxu0 %v5528_v9  ;;  %4698 = vmatpush1.bf16.msra.mxu1 %v5548_v38 }
 0x71f   :  { %4668 = vmatprep.subr.bf16.mxu0 %v5533_v15  ;;  %4700 = vmatprep.subr.bf16.mxu1 %v5554_v41 }
 0x722   :  { %4670 = vmatpush1.bf16.msra.mxu0 %v5540_v26  ;;  %4702 = vmatpush1.bf16.msra.mxu1 %v5558_v49 }
 0x723   :  { %4672 = vmatprep.subr.bf16.mxu0 %v5545_v31  ;;  %4704 = vmatprep.subr.bf16.mxu1 %v5562_v50 }
 0x726   :  { %4674 = vmatpush1.bf16.msra.mxu0 %v5552_v39  ;;  %4706 = vmatpush1.bf16.msra.mxu1 %v5566_v54 }
 0x727   :  { %4708 = vmatprep.subr.bf16.mxu0 %v5573_v61  ;;  %4772 = vmatprep.subr.bf16.mxu1 %v5575_v63 }
 0x729   :  { %2634 = vmatmul.mubr.f32.vlgmr.msra.gmra.mrb[24].mxu0 %v2399_v37  ;;  %2705 = vmatmul.mubr.f32.vlgmr.msra.gmra.mrb[32].mxu1 %v2399_v37  ;;  %v7222_v37 = vld [vmem:[#allocation30_spill] sm:$0xff] }
 0x72a   :  { %4710 = vmatpush1.bf16.msra.mxu0 %v5579_v5  ;;  %4774 = vmatpush1.bf16.msra.mxu1 %v5581_v14 }
 0x72b   :  { %4712 = vmatprep.subr.bf16.mxu0 %v5583_v17  ;;  %4776 = vmatprep.subr.bf16.mxu1 %v5586_v22 }
 0x72e   :  { %4714 = vmatpush1.bf16.msra.mxu0 %v5590_v33  ;;  %4778 = vmatpush1.bf16.msra.mxu1 %v5592_v34 }
 0x72f   :  { %4716 = vmatprep.subr.bf16.mxu0 %v5595_v44  ;;  %4780 = vmatprep.subr.bf16.mxu1 %v6952_v19 }
 0x732   :  { %4718 = vmatpush1.bf16.msra.mxu0 %v7204_v53  ;;  %4782 = vmatpush1.bf16.msra.mxu1 %v7205_v21 }
 0x733   :  { %4720 = vmatprep.subr.bf16.mxu0 %v7206_v2  ;;  %4784 = vmatprep.subr.bf16.mxu1 %v7207_v11  ;;  %v7263_v11 = vld [vmem:[#allocation74_spill] sm:$0xff] }
 0x736   :  { %4722 = vmatpush1.bf16.msra.mxu0 %v7208_v45  ;;  %4786 = vmatpush1.bf16.msra.mxu1 %v7209_v43  ;;  %v7261_v43 = vld [vmem:[#allocation72_spill] sm:$0xff] }
 0x737   :  { %4724 = vmatprep.subr.bf16.mxu0 %v7210_v18  ;;  %4788 = vmatprep.subr.bf16.mxu1 %v7211_v3  ;;  %v7260_v3 = vld [vmem:[#allocation71_spill] sm:$0xff] }
 0x73a   :  { %4726 = vmatpush1.bf16.msra.mxu0 %v7212_v56  ;;  %4790 = vmatpush1.bf16.msra.mxu1 %v7213_v42  ;;  %v7223_v56 = vld [vmem:[#allocation31_spill] sm:$0xff]  ;;  %v7224_v42 = vld [vmem:[#allocation32_spill] sm:$0xff] }
 0x73b   :  { %4728 = vmatprep.subr.bf16.mxu0 %v7214_v30  ;;  %4792 = vmatprep.subr.bf16.mxu1 %v7215_v55  ;;  %v7225_v30 = vld [vmem:[#allocation33_spill] sm:$0xff]  ;;  %v7226_v55 = vld [vmem:[#allocation34_spill] sm:$0xff] }
 0x73e   :  { %4730 = vmatpush1.bf16.msra.mxu0 %v7216_v62  ;;  %4794 = vmatpush1.bf16.msra.mxu1 %v7217_v29  ;;  %v7227_v62 = vld [vmem:[#allocation35_spill] sm:$0xff]  ;;  %v7228_v29 = vld [vmem:[#allocation36_spill] sm:$0xff] }
 0x73f   :  { %4732 = vmatprep.subr.bf16.mxu0 %v7218_v51  ;;  %4796 = vmatprep.subr.bf16.mxu1 %v7219_v24  ;;  %v7229_v51 = vld [vmem:[#allocation37_spill] sm:$0xff]  ;;  %v7230_v24 = vld [vmem:[#allocation38_spill] sm:$0xff] }
 0x742   :  { %4734 = vmatpush1.bf16.msra.mxu0 %v7220_v4  ;;  %4798 = vmatpush1.bf16.msra.mxu1 %v7221_v13  ;;  %v7231_v4 = vld [vmem:[#allocation39_spill] sm:$0xff]  ;;  %v7232_v13 = vld [vmem:[#allocation40_spill] sm:$0xff] }
 0x743   :  { %4736 = vmatprep.subr.bf16.mxu0 %v7222_v37  ;;  %4800 = vmatprep.subr.bf16.mxu1 %v7223_v56  ;;  %v7233_v37 = vld [vmem:[#allocation41_spill] sm:$0xff]  ;;  %v7234_v56 = vld [vmem:[#allocation42_spill] sm:$0xff] }
 0x746   :  { %4738 = vmatpush1.bf16.msra.mxu0 %v7224_v42  ;;  %4802 = vmatpush1.bf16.msra.mxu1 %v7225_v30  ;;  %v7235_v42 = vld [vmem:[#allocation43_spill] sm:$0xff]  ;;  %v7236_v30 = vld [vmem:[#allocation44_spill] sm:$0xff] }
 0x747   :  { %4740 = vmatprep.subr.bf16.mxu0 %v7226_v55  ;;  %4804 = vmatprep.subr.bf16.mxu1 %v7227_v62  ;;  %v7237_v55 = vld [vmem:[#allocation45_spill] sm:$0xff]  ;;  %v7238_v62 = vld [vmem:[#allocation46_spill] sm:$0xff] }
 0x74a   :  { %4742 = vmatpush1.bf16.msra.mxu0 %v7228_v29  ;;  %4806 = vmatpush1.bf16.msra.mxu1 %v7229_v51  ;;  %v7239_v29 = vld [vmem:[#allocation47_spill] sm:$0xff]  ;;  %v7240_v51 = vld [vmem:[#allocation48_spill] sm:$0xff] }
 0x74b   :  { %4744 = vmatprep.subr.bf16.mxu0 %v7230_v24  ;;  %4808 = vmatprep.subr.bf16.mxu1 %v7231_v4  ;;  %v7241_v24 = vld [vmem:[#allocation49_spill] sm:$0xff]  ;;  %v7242_v4 = vld [vmem:[#allocation50_spill] sm:$0xff] }
 0x74e   :  { %4746 = vmatpush1.bf16.msra.mxu0 %v7232_v13  ;;  %4810 = vmatpush1.bf16.msra.mxu1 %v7233_v37  ;;  %v7243_v13 = vld [vmem:[#allocation51_spill] sm:$0xff]  ;;  %v7244_v37 = vld [vmem:[#allocation52_spill] sm:$0xff] }
 0x74f   :  { %4748 = vmatprep.subr.bf16.mxu0 %v7234_v56  ;;  %4812 = vmatprep.subr.bf16.mxu1 %v7235_v42  ;;  %v7245_v56 = vld [vmem:[#allocation53_spill] sm:$0xff]  ;;  %v7246_v42 = vld [vmem:[#allocation54_spill] sm:$0xff] }
 0x752   :  { %4750 = vmatpush1.bf16.msra.mxu0 %v7236_v30  ;;  %4814 = vmatpush1.bf16.msra.mxu1 %v7237_v55  ;;  %v7247_v30 = vld [vmem:[#allocation55_spill] sm:$0xff]  ;;  %v7248_v55 = vld [vmem:[#allocation56_spill] sm:$0xff] }
 0x753   :  { %4752 = vmatprep.subr.bf16.mxu0 %v7238_v62  ;;  %4816 = vmatprep.subr.bf16.mxu1 %v7239_v29  ;;  %v7249_v62 = vld [vmem:[#allocation57_spill] sm:$0xff]  ;;  %v7250_v29 = vld [vmem:[#allocation58_spill] sm:$0xff] }
 0x756   :  { %4754 = vmatpush1.bf16.msra.mxu0 %v7240_v51  ;;  %4818 = vmatpush1.bf16.msra.mxu1 %v7241_v24  ;;  %v7251_v51 = vld [vmem:[#allocation59_spill] sm:$0xff]  ;;  %v7252_v24 = vld [vmem:[#allocation60_spill] sm:$0xff] }
 0x757   :  { %4756 = vmatprep.subr.bf16.mxu0 %v7242_v4  ;;  %4820 = vmatprep.subr.bf16.mxu1 %v7243_v13  ;;  %v7253_v4 = vld [vmem:[#allocation61_spill] sm:$0xff]  ;;  %v7254_v13 = vld [vmem:[#allocation62_spill] sm:$0xff] }
 0x75a   :  { %4758 = vmatpush1.bf16.msra.mxu0 %v7244_v37  ;;  %4822 = vmatpush1.bf16.msra.mxu1 %v7245_v56  ;;  %v7255_v37 = vld [vmem:[#allocation63_spill] sm:$0xff]  ;;  %v7256_v56 = vld [vmem:[#allocation64_spill] sm:$0xff] }
 0x75b   :  { %4760 = vmatprep.subr.bf16.mxu0 %v7246_v42  ;;  %4824 = vmatprep.subr.bf16.mxu1 %v7247_v30  ;;  %v7257_v42 = vld [vmem:[#allocation65_spill] sm:$0xff] }
 0x75c   :  { %v7258_v30 = vld [vmem:[#allocation9_spill] sm:$0xff] }
 0x75e   :  { %4762 = vmatpush1.bf16.msra.mxu0 %v7248_v55  ;;  %4826 = vmatpush1.bf16.msra.mxu1 %v7249_v62  ;;  %v7259_v55 = vld [vmem:[#allocation10_spill] sm:$0xff] }
 0x75f   :  { %4764 = vmatprep.subr.bf16.mxu0 %v7250_v29  ;;  %4828 = vmatprep.subr.bf16.mxu1 %v7251_v51 }
 0x762   :  { %4766 = vmatpush1.bf16.msra.mxu0 %v7252_v24  ;;  %4830 = vmatpush1.bf16.msra.mxu1 %v7253_v4 }
 0x763   :  { %4768 = vmatprep.subr.bf16.mxu0 %v7254_v13  ;;  %4832 = vmatprep.subr.bf16.mxu1 %v7255_v37  ;;  %v7262_v37 = vld [vmem:[#allocation73_spill] sm:$0xff] }
 0x766   :  { %4770 = vmatpush1.bf16.msra.mxu0 %v7256_v56  ;;  %4834 = vmatpush1.bf16.msra.mxu1 %v7257_v42 }
 0x767   :  { %4836 = vmatprep.subr.bf16.mxu0 %v7258_v30  ;;  %4868 = vmatprep.subr.bf16.mxu1 %v7259_v55 }
 0x7dc   :  { %v2469_v62 = vpop.f32.mrb[22].mxu0  ;;  %v2540_v29 = vpop.f32.mrb[30].mxu1 }
 0x7dd   :  { %v2470_v51 = vadd.f32 %v2469_v62, %v7260_v3  ;;  %v2471_v18 = vpop.f32.mrb[23].mxu0  ;;  %v2542_v24 = vpop.f32.mrb[31].mxu1  ;;  %v2541_v56 = vadd.f32 %v2540_v29, %v7262_v37 }
 0x7de   :  { %v2472_v4 = vadd.f32 %v2471_v18, %v7261_v43  ;;  %v2543_v42 = vadd.f32 %v2542_v24, %v7263_v11 }
 0x7df   :  { %v3423_v45 = vmul.f32 -1.442695, %v2470_v51  ;;  %v3425_v2 = vmul.f32 -1.442695, %v2541_v56 }
 0x7e0   :  { %v3424_v13 = vmul.f32 -1.442695, %v2472_v4 }
 0x7e1   :  { %5234 = vpow2.f32 %v3423_v45 }
 0x7e2   :  { %5236 = vpow2.f32 %v3424_v13  ;;  %v7264_v13 = vld [vmem:[#allocation11_spill] sm:$0xff] }
 0x7e3   :  { %5238 = vtanh.f32 %v2543_v42 }
 0x7e4   :  { %5240 = vpow2.f32 %v3425_v2 }
 0x7eb   :  { %v5235_v30 = vpop.eup %5234 }
 0x7ec   :  { %v2554_v21 = vadd.f32 1.0, %v5235_v30  ;;  %v5237_v55 = vpop.eup %5236 }
 0x7ed   :  { %v2555_v62 = vadd.f32 1.0, %v5237_v55  ;;  %v5239_v3 = vpop.eup %5238 }
 0x7ee   :  { %5242 = vrcp.f32 %v2554_v21  ;;  %v5241_v53 = vpop.eup %5240  ;;  %v7266_v21 = vld [vmem:[#allocation66_spill] sm:$0xff] }
 0x7ef   :  { %5244 = vrcp.f32 %v2555_v62  ;;  %v2556_v45 = vadd.f32 1.0, %v5241_v53 }
 0x7f1   :  { %5246 = vrcp.f32 %v2556_v45 }
 0x7f8   :  { %v5243_v18 = vpop.eup %5242 }
 0x7f9   :  { %v2565_v51 = vmul.f32 %v5243_v18, %v5239_v3  ;;  %v5245_v4 = vpop.eup %5244 }
 0x7fa   :  { %v2564_v43 = vmul.f32 %v5245_v4, %v7264_v13 }
 0x7fc   :  { %v2635_v29 = vpop.f32.mrb[24].mxu0  ;;  %v2706_v37 = vpop.f32.mrb[32].mxu1  ;;  %v6498_v24 = vadd.f32 %v2565_v51, %v2564_v43 }
 0x7fd   :  { %v2715_v56 = vrot.slane %v2635_v29, 4  ;;  %v2637_v30 = vpop.f32.mrb[25].mxu0  ;;  %v2708_v42 = vpop.f32.mrb[33].mxu1  ;;  %v2717_v53 = vrot.slane %v2706_v37, 4 }
 0x7fe   :  { %7265 = vst [vmem:[#allocation70_spill] sm:$0xff] %v6498_v24  ;;  %v2716_v2 = vrot.slane %v2637_v30, 4  ;;  %5248 = vtanh.f32 %v6498_v24  ;;  %v2718_v4 = vrot.slane %v2708_v42, 4  ;;  %v5247_v51 = vpop.eup %5246 }
 0x7ff   :  { %v2723_v55 = vadd.f32 %v2715_v56, %v7266_v21  ;;  %v2725_v43 = vadd.f32 %v2717_v53, %v7141_v57 }
 0x800   :  { %v2724_v62 = vadd.f32 %v2716_v2, %v7140_v6  ;;  %v2726_v29 = vadd.f32 %v2718_v4, %v7203_v28 }
 0x801   :  { %v3426_v3 = vmul.f32 -1.442695, %v2723_v55  ;;  %v3428_v30 = vmul.f32 -1.442695, %v2725_v43 }
 0x802   :  { %v3427_v18 = vmul.f32 -1.442695, %v2724_v62 }
 0x803   :  { %5250 = vpow2.f32 %v3426_v3  ;;  %v2747_v3 = vrot.slane %v6392_v1, 6  ;;  %v7307_v1 = vld [vmem:[#allocation52_spill] sm:$0xff] }
 0x804   :  { %5252 = vpow2.f32 %v3427_v18 }
 0x805   :  { %5254 = vtanh.f32 %v2726_v29 }
 0x806   :  { %5256 = vpow2.f32 %v3428_v30  ;;  %v7310_v30 = vld [vmem:[#allocation55_spill] sm:$0xff] }
 0x808   :  { %v5249_v13 = vpop.eup %5248 }
 0x809   :  { %v2568_v45 = vmul.f32 %v5249_v13, %v5247_v51 }
 0x80b   :  { %v2755_v11 = vrot.slane %v2568_v45, 4  ;;  %v7309_v45 = vld [vmem:[#allocation54_spill] sm:$0xff] }
 0x80d   :  { %v5251_v56 = vpop.eup %5250  ;;  %v2758_v24 = vrot.slane %v2755_v11, 4 }
 0x80e   :  { %v2736_v21 = vadd.f32 1.0, %v5251_v56  ;;  %v5253_v2 = vpop.eup %5252  ;;  %v7311_v56 = vld [vmem:[#allocation56_spill] sm:$0xff] }
 0x80f   :  { %v2737_v55 = vadd.f32 1.0, %v5253_v2  ;;  %2825 = vmatprep.mubr.f32.mxu0 %v2758_v24  ;;  %2896 = vmatprep.mubr.f32.mxu1 %v2758_v24  ;;  %v5255_v37 = vpop.eup %5254  ;;  %v7308_v24 = vld [vmem:[#allocation53_spill] sm:$0xff] }
 0x810   :  { %5258 = vrcp.f32 %v2736_v21  ;;  %v5257_v42 = vpop.eup %5256  ;;  %v7312_v2 = vld [vmem:[#allocation57_spill] sm:$0xff] }
 0x811   :  { %5260 = vrcp.f32 %v2737_v55  ;;  %v2738_v4 = vadd.f32 1.0, %v5257_v42  ;;  %v7313_v55 = vld [vmem:[#allocation58_spill] sm:$0xff]  ;;  %v7315_v42 = vld [vmem:[#allocation60_spill] sm:$0xff] }
 0x813   :  { %5262 = vrcp.f32 %v2738_v4  ;;  %v7320_v4 = vld [vmem:[#allocation65_spill] sm:$0xff] }
 0x81a   :  { %v5259_v62 = vpop.eup %5258 }
 0x81b   :  { %v2750_v18 = vmul.f32 %v5259_v62, %v5255_v37  ;;  %v5261_v53 = vpop.eup %5260  ;;  %v7314_v37 = vld [vmem:[#allocation59_spill] sm:$0xff]  ;;  %v7316_v62 = vld [vmem:[#allocation61_spill] sm:$0xff] }
 0x81c   :  { %v2749_v43 = vmul.f32 %v5261_v53, %v2747_v3  ;;  %v7317_v3 = vld [vmem:[#allocation62_spill] sm:$0xff]  ;;  %v7319_v53 = vld [vmem:[#allocation64_spill] sm:$0xff] }
 0x81d   :  { %v5263_v11 = vpop.eup %5262 }
 0x81e   :  { %v6506_v51 = vadd.f32 %v2750_v18, %v2749_v43  ;;  %v7318_v18 = vld [vmem:[#allocation63_spill] sm:$0xff] }
 0x820   :  { %5264 = vtanh.f32 %v6506_v51 }
 0x82a   :  { %v5265_v21 = vpop.eup %5264 }
 0x82b   :  { %v2753_v13 = vmul.f32 %v5265_v21, %v5263_v11  ;;  %v7321_v21 = vld [vmem:[#allocation71_spill] sm:$0xff] }
 0x82d   :  { %v2757_v29 = vrot.slane %v2753_v13, 4 }
 0x82f   :  { %2826 = vmatmul.mubr.f32.vlgmr.msra.gmra.mrb[26].mxu0 %v2757_v29  ;;  %2897 = vmatmul.mubr.f32.vlgmr.msra.gmra.mrb[34].mxu1 %v2757_v29 }
 0x830   :  { %4838 = vmatpush1.bf16.msra.mxu0 %v5460_v12  ;;  %4870 = vmatpush1.bf16.msra.mxu1 %v5484_v32  ;;  %v7267_v12 = vld [vmem:[#allocation12_spill] sm:$0xff] }
 0x831   :  { %4840 = vmatprep.subr.bf16.mxu0 %v5467_v16  ;;  %4872 = vmatprep.subr.bf16.mxu1 %v5489_v36  ;;  %v7268_v16 = vld [vmem:[#allocation13_spill] sm:$0xff]  ;;  %v7271_v32 = vld [vmem:[#allocation16_spill] sm:$0xff]  ;;  %v7273_v36 = vld [vmem:[#allocation18_spill] sm:$0xff] }
 0x832   :  { %2991 = vmatprep.mubr.f32.mxu0 %v6887_v8  ;;  %3062 = vmatprep.mubr.f32.mxu1 %v6887_v8 }
 0x834   :  { %4842 = vmatpush1.bf16.msra.mxu0 %v5473_v20  ;;  %4874 = vmatpush1.bf16.msra.mxu1 %v5496_v46  ;;  %v7269_v20 = vld [vmem:[#allocation14_spill] sm:$0xff]  ;;  %v7275_v46 = vld [vmem:[#allocation20_spill] sm:$0xff] }
 0x835   :  { %4844 = vmatprep.subr.bf16.mxu0 %v5478_v25  ;;  %4876 = vmatprep.subr.bf16.mxu1 %v5503_v48  ;;  %v7270_v25 = vld [vmem:[#allocation15_spill] sm:$0xff]  ;;  %v7277_v48 = vld [vmem:[#allocation22_spill] sm:$0xff] }
 0x838   :  { %4846 = vmatpush1.bf16.msra.mxu0 %v5487_v35  ;;  %4878 = vmatpush1.bf16.msra.mxu1 %v5511_v58  ;;  %v7272_v35 = vld [vmem:[#allocation17_spill] sm:$0xff]  ;;  %v7279_v58 = vld [vmem:[#allocation24_spill] sm:$0xff] }
 0x839   :  { %4848 = vmatprep.subr.bf16.mxu0 %v5492_v40  ;;  %4880 = vmatprep.subr.bf16.mxu1 %v5518_v60  ;;  %v7274_v40 = vld [vmem:[#allocation19_spill] sm:$0xff]  ;;  %v7281_v60 = vld [vmem:[#allocation26_spill] sm:$0xff] }
 0x83c   :  { %4850 = vmatpush1.bf16.msra.mxu0 %v5501_v47  ;;  %4882 = vmatpush1.bf16.msra.mxu1 %v5524_v7  ;;  %v7276_v47 = vld [vmem:[#allocation21_spill] sm:$0xff]  ;;  %v7283_v7 = vld [vmem:[#allocation28_spill] sm:$0xff] }
 0x83d   :  { %4852 = vmatprep.subr.bf16.mxu0 %v5506_v52  ;;  %4884 = vmatprep.subr.bf16.mxu1 %v5530_v10  ;;  %v7278_v52 = vld [vmem:[#allocation23_spill] sm:$0xff]  ;;  %v7285_v10 = vld [vmem:[#allocation30_spill] sm:$0xff] }
 0x840   :  { %4854 = vmatpush1.bf16.msra.mxu0 %v5516_v59  ;;  %4886 = vmatpush1.bf16.msra.mxu1 %v5536_v23  ;;  %v7280_v59 = vld [vmem:[#allocation25_spill] sm:$0xff]  ;;  %v7287_v23 = vld [vmem:[#allocation32_spill] sm:$0xff] }
 0x841   :  { %4856 = vmatprep.subr.bf16.mxu0 %v5521_v0  ;;  %4888 = vmatprep.subr.bf16.mxu1 %v5542_v27  ;;  %v7282_v0 = vld [vmem:[#allocation27_spill] sm:$0xff]  ;;  %v7289_v27 = vld [vmem:[#allocation34_spill] sm:$0xff] }
 0x844   :  { %4858 = vmatpush1.bf16.msra.mxu0 %v5528_v9  ;;  %4890 = vmatpush1.bf16.msra.mxu1 %v5548_v38  ;;  %v7284_v9 = vld [vmem:[#allocation29_spill] sm:$0xff]  ;;  %v7291_v38 = vld [vmem:[#allocation36_spill] sm:$0xff] }
 0x845   :  { %4860 = vmatprep.subr.bf16.mxu0 %v5533_v15  ;;  %4892 = vmatprep.subr.bf16.mxu1 %v5554_v41  ;;  %v7286_v15 = vld [vmem:[#allocation31_spill] sm:$0xff]  ;;  %v7293_v41 = vld [vmem:[#allocation38_spill] sm:$0xff] }
 0x848   :  { %4862 = vmatpush1.bf16.msra.mxu0 %v5540_v26  ;;  %4894 = vmatpush1.bf16.msra.mxu1 %v5558_v49  ;;  %v7288_v26 = vld [vmem:[#allocation33_spill] sm:$0xff]  ;;  %v7294_v49 = vld [vmem:[#allocation39_spill] sm:$0xff] }
 0x849   :  { %4864 = vmatprep.subr.bf16.mxu0 %v5545_v31  ;;  %4896 = vmatprep.subr.bf16.mxu1 %v5562_v50  ;;  %v7290_v31 = vld [vmem:[#allocation35_spill] sm:$0xff]  ;;  %v7295_v50 = vld [vmem:[#allocation40_spill] sm:$0xff] }
 0x84c   :  { %4866 = vmatpush1.bf16.msra.mxu0 %v5552_v39  ;;  %4898 = vmatpush1.bf16.msra.mxu1 %v5566_v54  ;;  %v7292_v39 = vld [vmem:[#allocation37_spill] sm:$0xff] }
 0x84d   :  { %4900 = vmatprep.subr.bf16.mxu0 %v5573_v61  ;;  %4964 = vmatprep.subr.bf16.mxu1 %v5575_v63  ;;  %v7296_v54 = vld [vmem:[#allocation41_spill] sm:$0xff]  ;;  %v7297_v61 = vld [vmem:[#allocation42_spill] sm:$0xff]  ;;  %v7298_v63 = vld [vmem:[#allocation43_spill] sm:$0xff] }
 0x84f   :  { %2992 = vmatmul.mubr.f32.vlgmr.msra.gmra.mrb[28].mxu0 %v2757_v29  ;;  %3063 = vmatmul.mubr.f32.vlgmr.msra.gmra.mrb[36].mxu1 %v2757_v29 }
 0x850   :  { %4902 = vmatpush1.bf16.msra.mxu0 %v5579_v5  ;;  %4966 = vmatpush1.bf16.msra.mxu1 %v5581_v14  ;;  %v7299_v5 = vld [vmem:[#allocation44_spill] sm:$0xff]  ;;  %v7300_v14 = vld [vmem:[#allocation45_spill] sm:$0xff] }
 0x851   :  { %4904 = vmatprep.subr.bf16.mxu0 %v5583_v17  ;;  %4968 = vmatprep.subr.bf16.mxu1 %v5586_v22  ;;  %v7301_v17 = vld [vmem:[#allocation46_spill] sm:$0xff]  ;;  %v7302_v22 = vld [vmem:[#allocation47_spill] sm:$0xff] }
 0x854   :  { %4906 = vmatpush1.bf16.msra.mxu0 %v5590_v33  ;;  %4970 = vmatpush1.bf16.msra.mxu1 %v5592_v34  ;;  %v7303_v33 = vld [vmem:[#allocation48_spill] sm:$0xff]  ;;  %v7304_v34 = vld [vmem:[#allocation49_spill] sm:$0xff] }
 0x855   :  { %4908 = vmatprep.subr.bf16.mxu0 %v5595_v44  ;;  %4972 = vmatprep.subr.bf16.mxu1 %v6952_v19  ;;  %v7305_v44 = vld [vmem:[#allocation50_spill] sm:$0xff]  ;;  %v7306_v19 = vld [vmem:[#allocation51_spill] sm:$0xff] }
 0x858   :  { %4910 = vmatpush1.bf16.msra.mxu0 %v7267_v12  ;;  %4974 = vmatpush1.bf16.msra.mxu1 %v7268_v16  ;;  %v7322_v16 = vld [vmem:[#allocation72_spill] sm:$0xff] }
 0x859   :  { %4912 = vmatprep.subr.bf16.mxu0 %v7269_v20  ;;  %4976 = vmatprep.subr.bf16.mxu1 %v7270_v25 }
 0x85c   :  { %4914 = vmatpush1.bf16.msra.mxu0 %v7271_v32  ;;  %4978 = vmatpush1.bf16.msra.mxu1 %v7272_v35  ;;  %v7323_v35 = vld [vmem:[#allocation73_spill] sm:$0xff] }
 0x85d   :  { %4916 = vmatprep.subr.bf16.mxu0 %v7273_v36  ;;  %4980 = vmatprep.subr.bf16.mxu1 %v7274_v40  ;;  %v7324_v40 = vld [vmem:[#allocation74_spill] sm:$0xff] }
 0x860   :  { %4918 = vmatpush1.bf16.msra.mxu0 %v7275_v46  ;;  %4982 = vmatpush1.bf16.msra.mxu1 %v7276_v47 }
 0x861   :  { %4920 = vmatprep.subr.bf16.mxu0 %v7277_v48  ;;  %4984 = vmatprep.subr.bf16.mxu1 %v7278_v52 }
 0x864   :  { %4922 = vmatpush1.bf16.msra.mxu0 %v7279_v58  ;;  %4986 = vmatpush1.bf16.msra.mxu1 %v7280_v59 }
 0x865   :  { %4924 = vmatprep.subr.bf16.mxu0 %v7281_v60  ;;  %4988 = vmatprep.subr.bf16.mxu1 %v7282_v0 }
 0x868   :  { %4926 = vmatpush1.bf16.msra.mxu0 %v7283_v7  ;;  %4990 = vmatpush1.bf16.msra.mxu1 %v7284_v9 }
 0x869   :  { %4928 = vmatprep.subr.bf16.mxu0 %v7285_v10  ;;  %4992 = vmatprep.subr.bf16.mxu1 %v7286_v15 }
 0x86c   :  { %4930 = vmatpush1.bf16.msra.mxu0 %v7287_v23  ;;  %4994 = vmatpush1.bf16.msra.mxu1 %v7288_v26  ;;  %v7325_v23 = vld [vmem:[#allocation70_spill] sm:$0xff] }
 0x86d   :  { %4932 = vmatprep.subr.bf16.mxu0 %v7289_v27  ;;  %4996 = vmatprep.subr.bf16.mxu1 %v7290_v31 }
 0x870   :  { %4934 = vmatpush1.bf16.msra.mxu0 %v7291_v38  ;;  %4998 = vmatpush1.bf16.msra.mxu1 %v7292_v39 }
 0x871   :  { %4936 = vmatprep.subr.bf16.mxu0 %v7293_v41  ;;  %5000 = vmatprep.subr.bf16.mxu1 %v7294_v49 }
 0x874   :  { %4938 = vmatpush1.bf16.msra.mxu0 %v7295_v50  ;;  %5002 = vmatpush1.bf16.msra.mxu1 %v7296_v54  ;;  %v7326_v54 = vld [vmem:[#allocation66_spill] sm:$0xff] }
 0x875   :  { %4940 = vmatprep.subr.bf16.mxu0 %v7297_v61  ;;  %5004 = vmatprep.subr.bf16.mxu1 %v7298_v63 }
 0x878   :  { %4942 = vmatpush1.bf16.msra.mxu0 %v7299_v5  ;;  %5006 = vmatpush1.bf16.msra.mxu1 %v7300_v14 }
 0x879   :  { %4944 = vmatprep.subr.bf16.mxu0 %v7301_v17  ;;  %5008 = vmatprep.subr.bf16.mxu1 %v7302_v22 }
 0x87c   :  { %4946 = vmatpush1.bf16.msra.mxu0 %v7303_v33  ;;  %5010 = vmatpush1.bf16.msra.mxu1 %v7304_v34 }
 0x87d   :  { %4948 = vmatprep.subr.bf16.mxu0 %v7305_v44  ;;  %5012 = vmatprep.subr.bf16.mxu1 %v7306_v19 }
 0x880   :  { %4950 = vmatpush1.bf16.msra.mxu0 %v7307_v1  ;;  %5014 = vmatpush1.bf16.msra.mxu1 %v7308_v24 }
 0x881   :  { %4952 = vmatprep.subr.bf16.mxu0 %v7309_v45  ;;  %5016 = vmatprep.subr.bf16.mxu1 %v7310_v30 }
 0x884   :  { %4954 = vmatpush1.bf16.msra.mxu0 %v7311_v56  ;;  %5018 = vmatpush1.bf16.msra.mxu1 %v7312_v2 }
 0x885   :  { %4956 = vmatprep.subr.bf16.mxu0 %v7313_v55  ;;  %5020 = vmatprep.subr.bf16.mxu1 %v7314_v37 }
 0x888   :  { %4958 = vmatpush1.bf16.msra.mxu0 %v7315_v42  ;;  %5022 = vmatpush1.bf16.msra.mxu1 %v7316_v62  ;;  %v3105_v62 = vrot.slane %v6506_v51, 6  ;;  %v3286_v51 = vld [vmem:[%s6681_s6 + $0x8] sm:$0xff] }
 0x889   :  { %4960 = vmatprep.subr.bf16.mxu0 %v7317_v3  ;;  %5024 = vmatprep.subr.bf16.mxu1 %v7318_v18 }
 0x88c   :  { %4962 = vmatpush1.bf16.msra.mxu0 %v7319_v53  ;;  %5026 = vmatpush1.bf16.msra.mxu1 %v7320_v4 }
 0x902   :  { %v2827_v43 = vpop.f32.mrb[26].mxu0  ;;  %v2898_v11 = vpop.f32.mrb[34].mxu1 }
 0x903   :  { %v2828_v13 = vadd.f32 %v2827_v43, %v7321_v21  ;;  %v2829_v29 = vpop.f32.mrb[27].mxu0  ;;  %v2900_v12 = vpop.f32.mrb[35].mxu1  ;;  %v2899_v36 = vadd.f32 %v2898_v11, %v7323_v35 }
 0x904   :  { %v2830_v20 = vadd.f32 %v2829_v29, %v7322_v16  ;;  %v2901_v46 = vadd.f32 %v2900_v12, %v7324_v40  ;;  %v3285_v12 = vld [vmem:[%s6681_s6] sm:$0xff] }
 0x905   :  { %v3429_v25 = vmul.f32 -1.442695, %v2828_v13  ;;  %v3431_v47 = vmul.f32 -1.442695, %v2899_v36  ;;  %v3288_v36 = vld [vmem:[%s6681_s6 + $0x18] sm:$0xff] }
 0x906   :  { %v3430_v32 = vmul.f32 -1.442695, %v2830_v20  ;;  %v5028_v20 = vpack.c.bf16 %v3286_v51, %v3285_v12 }
 0x907   :  { %5266 = vpow2.f32 %v3429_v25  ;;  %v5367_v25 = vmov 0.0|0.0  }
 0x908   :  { %5268 = vpow2.f32 %v3430_v32  ;;  %5027 = vmatprep.subr.bf16.mxu0 %v5367_v25  ;;  %v3287_v32 = vld [vmem:[%s6681_s6 + $0x10] sm:$0xff] }
 0x909   :  { %5270 = vtanh.f32 %v2901_v46  ;;  %v5031_v46 = vpack.c.bf16 %v3288_v36, %v3287_v32 }
 0x90a   :  { %5272 = vpow2.f32 %v3431_v47  ;;  %v3289_v47 = vld [vmem:[%s6681_s6 + $0x20] sm:$0xff] }
 0x911   :  { %v5267_v48 = vpop.eup %5266 }
 0x912   :  { %v2912_v52 = vadd.f32 1.0, %v5267_v48  ;;  %v5269_v58 = vpop.eup %5268  ;;  %v3290_v48 = vld [vmem:[%s6681_s6 + $0x28] sm:$0xff] }
 0x913   :  { %v2913_v59 = vadd.f32 1.0, %v5269_v58  ;;  %v5271_v60 = vpop.eup %5270  ;;  %v3291_v58 = vld [vmem:[%s6681_s6 + $0x30] sm:$0xff] }
 0x914   :  { %5274 = vrcp.f32 %v2912_v52  ;;  %v5273_v0 = vpop.eup %5272  ;;  %v5034_v52 = vpack.c.bf16 %v3290_v48, %v3289_v47 }
 0x915   :  { %5276 = vrcp.f32 %v2913_v59  ;;  %v2914_v15 = vadd.f32 1.0, %v5273_v0  ;;  %v3292_v59 = vld [vmem:[%s6681_s6 + $0x38] sm:$0xff]  ;;  %v3293_v0 = vld [vmem:[%s6681_s6 + $0x40] sm:$0xff] }
 0x917   :  { %5278 = vrcp.f32 %v2914_v15  ;;  %v3296_v15 = vld [vmem:[%s6681_s6 + $0x58] sm:$0xff] }
 0x91e   :  { %v5275_v7 = vpop.eup %5274 }
 0x91f   :  { %v2923_v9 = vmul.f32 %v5275_v7, %v5271_v60  ;;  %v5277_v10 = vpop.eup %5276  ;;  %v5037_v60 = vpack.c.bf16 %v3292_v59, %v3291_v58  ;;  %v3294_v7 = vld [vmem:[%s6681_s6 + $0x48] sm:$0xff] }
 0x920   :  { %v2922_v26 = vmul.f32 %v5277_v10, %v7325_v23  ;;  %v3295_v10 = vld [vmem:[%s6681_s6 + $0x50] sm:$0xff] }
 0x921   :  { %v5279_v34 = vpop.eup %5278  ;;  %v5043_v23 = vpack.c.bf16 %v3296_v15, %v3295_v10 }
 0x922   :  { %v2993_v27 = vpop.f32.mrb[28].mxu0  ;;  %v3064_v31 = vpop.f32.mrb[36].mxu1  ;;  %v6610_v38 = vadd.f32 %v2923_v9, %v2922_v26  ;;  %v5040_v9 = vpack.c.bf16 %v3294_v7, %v3293_v0  ;;  %v3297_v26 = vld [vmem:[%s6681_s6 + $0x60] sm:$0xff] }
 0x923   :  { %v3073_v39 = vrot.slane %v2993_v27, 2  ;;  %v2995_v41 = vpop.f32.mrb[29].mxu0  ;;  %v3066_v49 = vpop.f32.mrb[37].mxu1  ;;  %v3075_v17 = vrot.slane %v3064_v31, 2  ;;  %v3298_v27 = vld [vmem:[%s6681_s6 + $0x68] sm:$0xff] }
 0x924   :  { %v3074_v50 = vrot.slane %v2995_v41, 2  ;;  %5280 = vtanh.f32 %v6610_v38  ;;  %v3076_v22 = vrot.slane %v3066_v49, 2  ;;  %v5046_v31 = vpack.c.bf16 %v3298_v27, %v3297_v26  ;;  %v3300_v41 = vld [vmem:[%s6681_s6 + $0x78] sm:$0xff] }
 0x925   :  { %v3081_v61 = vadd.f32 %v3073_v39, %v7326_v54  ;;  %v3083_v33 = vadd.f32 %v3075_v17, %v7141_v57  ;;  %v3299_v39 = vld [vmem:[%s6681_s6 + $0x70] sm:$0xff] }
 0x926   :  { %v3082_v63 = vadd.f32 %v3074_v50, %v7140_v6  ;;  %v3084_v19 = vadd.f32 %v3076_v22, %v7203_v28  ;;  %v5049_v49 = vpack.c.bf16 %v3300_v41, %v3299_v39 }
 0x927   :  { %v3432_v5 = vmul.f32 -1.442695, %v3081_v61  ;;  %v3434_v24 = vmul.f32 -1.442695, %v3083_v33 }
 0x928   :  { %v3433_v14 = vmul.f32 -1.442695, %v3082_v63 }
 0x929   :  { %5282 = vpow2.f32 %v3432_v5 }
 0x92a   :  { %5284 = vpow2.f32 %v3433_v14 }
 0x92b   :  { %5286 = vtanh.f32 %v3084_v19 }
 0x92c   :  { %5288 = vpow2.f32 %v3434_v24 }
 0x92e   :  { %v5281_v44 = vpop.eup %5280 }
 0x92f   :  { %v2926_v1 = vmul.f32 %v5281_v44, %v5279_v34 }
 0x931   :  { %v3113_v45 = vrot.slane %v2926_v1, 2 }
 0x933   :  { %v5283_v30 = vpop.eup %5282  ;;  %v3116_v2 = vrot.slane %v3113_v45, 6 }
 0x934   :  { %v3094_v56 = vadd.f32 1.0, %v5283_v30  ;;  %v5285_v6 = vpop.eup %5284 }
 0x935   :  { %v3095_v55 = vadd.f32 1.0, %v5285_v6  ;;  %3183 = vmatprep.mubr.f32.mxu0 %v3116_v2  ;;  %3254 = vmatprep.mubr.f32.mxu1 %v3116_v2  ;;  %v5287_v37 = vpop.eup %5286 }
 0x936   :  { %5290 = vrcp.f32 %v3094_v56  ;;  %v5289_v57 = vpop.eup %5288 }
 0x937   :  { %5292 = vrcp.f32 %v3095_v55  ;;  %v3096_v18 = vadd.f32 1.0, %v5289_v57  ;;  %v3438_v57 = vld [vmem:[#allocation2] ss:$0 sm:$0xff] }
 0x939   :  { %5294 = vrcp.f32 %v3096_v18 }
 0x940   :  { %v5291_v42 = vpop.eup %5290 }
 0x941   :  { %v3108_v28 = vmul.f32 %v5291_v42, %v5287_v37  ;;  %v5293_v3 = vpop.eup %5292 }
 0x942   :  { %v3107_v53 = vmul.f32 %v5293_v3, %v3105_v62 }
 0x943   :  { %v5295_v43 = vpop.eup %5294 }
 0x944   :  { %v3109_v4 = vadd.f32 %v3108_v28, %v3107_v53 }
 0x946   :  { %5296 = vtanh.f32 %v3109_v4 }
 0x950   :  { %v5297_v11 = vpop.eup %5296 }
 0x951   :  { %v3111_v13 = vmul.f32 %v5297_v11, %v5295_v43 }
 0x953   :  { %v3115_v29 = vrot.slane %v3111_v13, 6 }
 0x955   :  { %3184 = vmatmul.mubr.f32.vlgmr.msra.gmra.mrb[30].mxu0 %v3115_v29  ;;  %3255 = vmatmul.mubr.f32.vlgmr.msra.gmra.mrb[38].mxu1 %v3115_v29 }
 0x956   :  { %5029 = vmatpush3.bf16.msra.mxu0 %v5028_v20  ;;  %3488 = vmatprep.mubr.msk.f32.mxu0 %vm5368_vm1, %v6887_v8 }
 0x957   :  { %5030 = vmatprep.subr.bf16.mxu0 %v5367_v25 }
 0x95a   :  { %5032 = vmatpush3.bf16.msra.mxu0 %v5031_v46 }
 0x95b   :  { %5033 = vmatprep.subr.bf16.mxu0 %v5367_v25 }
 0x95e   :  { %5035 = vmatpush3.bf16.msra.mxu0 %v5034_v52 }
 0x95f   :  { %5036 = vmatprep.subr.bf16.mxu0 %v5367_v25 }
 0x962   :  { %5038 = vmatpush3.bf16.msra.mxu0 %v5037_v60 }
 0x963   :  { %5039 = vmatprep.subr.bf16.mxu0 %v5367_v25 }
 0x966   :  { %5041 = vmatpush3.bf16.msra.mxu0 %v5040_v9 }
 0x967   :  { %5042 = vmatprep.subr.bf16.mxu0 %v5367_v25 }
 0x96a   :  { %5044 = vmatpush3.bf16.msra.mxu0 %v5043_v23 }
 0x96b   :  { %5045 = vmatprep.subr.bf16.mxu0 %v5367_v25 }
 0x96e   :  { %5047 = vmatpush3.bf16.msra.mxu0 %v5046_v31 }
 0x96f   :  { %5048 = vmatprep.subr.bf16.mxu0 %v5367_v25 }
 0x972   :  { %5050 = vmatpush3.bf16.msra.mxu0 %v5049_v49 }
 0xa28   :  { %v3185_v50 = vpop.f32.mrb[30].mxu0  ;;  %v3256_v54 = vpop.f32.mrb[38].mxu1 }
 0xa29   :  { %v3186_v61 = vadd.f32 %v3185_v50, %v7321_v21  ;;  %v3187_v8 = vpop.f32.mrb[31].mxu0  ;;  %v3258_v63 = vpop.f32.mrb[39].mxu1  ;;  %v3257_v22 = vadd.f32 %v3256_v54, %v7323_v35 }
 0xa2a   :  { %v3188_v5 = vadd.f32 %v3187_v8, %v7322_v16  ;;  %v3259_v33 = vadd.f32 %v3258_v63, %v7324_v40 }
 0xa2b   :  { %v3435_v14 = vmul.f32 -1.442695, %v3186_v61  ;;  %v3437_v34 = vmul.f32 -1.442695, %v3257_v22 }
 0xa2c   :  { %v3436_v17 = vmul.f32 -1.442695, %v3188_v5 }
 0xa2d   :  { %5298 = vpow2.f32 %v3435_v14 }
 0xa2e   :  { %5300 = vpow2.f32 %v3436_v17 }
 0xa2f   :  { %5302 = vtanh.f32 %v3259_v33 }
 0xa30   :  { %5304 = vpow2.f32 %v3437_v34 }
 0xa37   :  { %v5299_v44 = vpop.eup %5298 }
 0xa38   :  { %v3270_v19 = vadd.f32 1.0, %v5299_v44  ;;  %v5301_v1 = vpop.eup %5300 }
 0xa39   :  { %v3271_v21 = vadd.f32 1.0, %v5301_v1  ;;  %v5303_v24 = vpop.eup %5302 }
 0xa3a   :  { %5306 = vrcp.f32 %v3270_v19  ;;  %v5305_v45 = vpop.eup %5304 }
 0xa3b   :  { %5308 = vrcp.f32 %v3271_v21  ;;  %v3272_v2 = vadd.f32 1.0, %v5305_v45 }
 0xa3d   :  { %5310 = vrcp.f32 %v3272_v2 }
 0xa44   :  { %v5307_v16 = vpop.eup %5306 }
 0xa45   :  { %v3281_v30 = vmul.f32 %v5307_v16, %v5303_v24  ;;  %v5309_v56 = vpop.eup %5308 }
 0xa46   :  { %v3280_v6 = vmul.f32 %v5309_v56, %v6610_v38 }
 0xa47   :  { %v5311_v40 = vpop.eup %5310 }
 0xa48   :  { %v3282_v35 = vadd.f32 %v3281_v30, %v3280_v6 }
 0xa4a   :  { %5312 = vtanh.f32 %v3282_v35 }
 0xa54   :  { %v5313_v55 = vpop.eup %5312 }
 0xa55   :  { %v3284_v37 = vmul.f32 %v5313_v55, %v5311_v40 }
 0xa57   :  { %3489 = vmatmul.mubr.f32.vlgmr.msra.gmra.mrb[32].mxu0 %v3284_v37 }
 0xb2a   :  { %v3374_v42 = vpop.f32.mrb[32].mxu0 }
 0xb2b   :  { %v3375_v62 = vadd.f32 %v3438_v57, %v3374_v42  ;;  %v3490_v28 = vpop.f32.mrb[33].mxu0 }
 0xb2d   :  { %3379 = vst.msk [vmem:[%s6683_s8] sm:$0x3] %vm3378_vm2, %v3375_v62 }
 0xb2e   :  { %3384 = vsyncpa [#allocation4], 1 }
 0xb2f   :  { %3385 = vsyncpa [#allocation6], 1 }

</bundles_post_ra>
